<compile_context>
chip_gen: v5e
topology: v5e:2x2
jax: 0.10.0
libtpu: 0.0.40
codegen_flags: <defaults>
</compile_context>

<pallas_src>
import functools

import numpy as np
import jax
import jax.numpy as jnp
from jax import lax
from jax.experimental import pallas as pl
from jax.experimental.pallas import tpu as pltpu


# --------------------------------------------------------------------------
# Pallas kernel: full step recurrence of one ConvLSTMCell (grid over steps).
# --------------------------------------------------------------------------
def _layer_kernel(x_ref, wx_ref, wh_ref, b_ref, m_ref, ch_ref, h_s, c_s,
                  *, ch, shifts):
    """One grid step = one time step of the cell.

    x_ref  : (1, Cin, N)     this step's input, channel-major, N = B*F*T
    wx_ref : (KK, 4*Ch, Cin) per-tap input->gates weights (bf16), gates [i,f,c,o]
    wh_ref : (KK, 4*Ch, Ch)  per-tap hidden->gates weights (bf16)
    b_ref  : (4*Ch, 1)       gate biases (f32)
    m_ref  : (KK, 1, N)      per-tap spatial-validity mask (f32, 0/1)
    ch_ref : (1, Ch, N)      output hidden state for this step
    h_s/c_s: (Ch, N)         VMEM-resident recurrent state
    """
    s = pl.program_id(0)

    @pl.when(s == 0)
    def _():
        h_s[...] = jnp.zeros_like(h_s)
        c_s[...] = jnp.zeros_like(c_s)

    x = x_ref[0]            # (Cin, N) f32
    h = h_s[...]            # (Ch, N)  f32
    n = x.shape[-1]

    acc = jnp.zeros((4 * ch, n), jnp.float32)
    for t, shift in enumerate(shifts):        # static unrolled tap loop
        xs = x if shift == 0 else pltpu.roll(x, shift=shift, axis=1)
        hs = h if shift == 0 else pltpu.roll(h, shift=shift, axis=1)
        m = m_ref[t]                          # (1, N)
        xs = (xs * m).astype(jnp.bfloat16)
        hs = (hs * m).astype(jnp.bfloat16)
        acc = acc + jnp.dot(wx_ref[t], xs, preferred_element_type=jnp.float32)
        acc = acc + jnp.dot(wh_ref[t], hs, preferred_element_type=jnp.float32)

    acc = acc + b_ref[...]                    # (4*Ch, 1) lane-broadcast

    # TODO(synk): peephole terms (c * Wci etc.) omitted — they are
    # zero-initialized in the reference module and never non-zero here.
    i_g = jax.nn.sigmoid(acc[0 * ch:1 * ch])
    f_g = jax.nn.sigmoid(acc[1 * ch:2 * ch])
    g_g = jnp.tanh(acc[2 * ch:3 * ch])
    o_g = jax.nn.sigmoid(acc[3 * ch:4 * ch])

    c_prev = c_s[...]
    c_new = f_g * c_prev + i_g * g_g
    h_new = o_g * jnp.tanh(c_new)

    c_s[...] = c_new
    h_s[...] = h_new
    ch_ref[0] = h_new


# --------------------------------------------------------------------------
# Per-layer wrapper (builds tap shifts/masks and calls pallas_call)
# --------------------------------------------------------------------------
def _make_tap_data(kh, kw, F_, T_, B):
    """Static roll amounts + spatial-validity masks for each conv tap."""
    ph, pw = (kh - 1) // 2, (kw - 1) // 2
    bn = B * F_ * T_
    f = np.arange(F_)[:, None]
    t = np.arange(T_)[None, :]
    shifts, masks = [], []
    for dy in range(kh):
        for dx in range(kw):
            off = (dy - ph) * T_ + (dx - pw)          # source = dest + off
            shifts.append((-off) % bn)                # roll so dest reads source
            valid = ((f + dy - ph >= 0) & (f + dy - ph < F_) &
                     (t + dx - pw >= 0) & (t + dx - pw < T_))
            masks.append(np.tile(valid.reshape(-1).astype(np.float32), B))
    mask = np.stack(masks, axis=0).reshape(kh * kw, 1, bn)
    return tuple(shifts), jnp.asarray(mask, jnp.float32)


def conv_lstm_layer(x_all, p, ksize, B, F_, T_):
    """x_all: (step, Cin, B*F*T) f32. Returns unpooled h per step: (step, Ch, B*F*T)."""
    step, cin, bn = x_all.shape
    kh, kw = ksize
    kk = kh * kw
    ch = p["wh"].shape[2]
    shifts, mask = _make_tap_data(kh, kw, F_, T_, B)

    kernel = functools.partial(_layer_kernel, ch=ch, shifts=shifts)

    in_specs = [
        pl.BlockSpec((1, cin, bn), lambda s: (s, 0, 0)),        # x for step s
        pl.BlockSpec((kk, 4 * ch, cin), lambda s: (0, 0, 0)),   # wx (resident)
        pl.BlockSpec((kk, 4 * ch, ch), lambda s: (0, 0, 0)),    # wh (resident)
        pl.BlockSpec((4 * ch, 1), lambda s: (0, 0)),            # bias
        pl.BlockSpec((kk, 1, bn), lambda s: (0, 0, 0)),         # tap masks
    ]
    out_specs = pl.BlockSpec((1, ch, bn), lambda s: (s, 0, 0))
    out_shape = jax.ShapeDtypeStruct((step, ch, bn), jnp.float32)

    return pl.pallas_call(
        kernel,
        grid=(step,),
        in_specs=in_specs,
        out_specs=out_specs,
        out_shape=out_shape,
        scratch_shapes=[pltpu.VMEM((ch, bn), jnp.float32),   # h state
                        pltpu.VMEM((ch, bn), jnp.float32)],  # c state
        compiler_params=pltpu.CompilerParams(
            dimension_semantics=("arbitrary",)),              # sequential recurrence
    )(x_all, p["wx"], p["wh"], p["bias"], mask)


# --------------------------------------------------------------------------
# Full forward pass (pool / BN / head are XLA glue fused under jit)
# --------------------------------------------------------------------------
def conv_lstm_forward(x_seq, target, params, cfg):
    """x_seq: (B, Cin, F, T, step) [PyTorch layout]; target: (B, num_labels).
    Returns (losses_batch[1], correct_batch[1]) like the PyTorch module."""
    B, cin, F0, T0, step = x_seq.shape

    # NCHW(+step) -> (step, C, B*F*T) channel-major, lane-dense layout.
    x_all = jnp.transpose(x_seq, (4, 1, 0, 2, 3)).reshape(step, cin, B * F0 * T0)

    Fc, Tc = F0, T0
    y = None
    for i, ch in enumerate(cfg["hidden_channels"]):
        p = params["cells"][i]

        ch_all = conv_lstm_layer(x_all, p, cfg["kernel_size"][i], B, Fc, Tc)
        y = ch_all.reshape(step, ch, B, Fc, Tc)

        # TODO(synk): max-pool / BatchNorm left as XLA ops (fused under jit)
        # rather than an in-kernel epilogue.
        kp = cfg["kernel_size_pool"][i]
        sp = cfg["kernel_stride_pool"][i]
        pph, ppw = (kp[0] - 1) // 2, (kp[1] - 1) // 2
        y = lax.reduce_window(
            y, jnp.array(-jnp.inf, y.dtype), lax.max,
            window_dimensions=(1, 1, 1, kp[0], kp[1]),
            window_strides=(1, 1, 1, sp[0], sp[1]),
            padding=((0, 0), (0, 0), (0, 0), (pph, pph), (ppw, ppw)))
        Fc = (Fc + 2 * pph - kp[0]) // sp[0] + 1
        Tc = (Tc + 2 * ppw - kp[1]) // sp[1] + 1

        # BatchNorm2d in training mode: batch statistics per step, per channel.
        mean = jnp.mean(y, axis=(2, 3, 4), keepdims=True)
        var = jnp.mean(jnp.square(y - mean), axis=(2, 3, 4), keepdims=True)
        gamma = p["gamma"].reshape(1, ch, 1, 1, 1)
        beta = p["beta"].reshape(1, ch, 1, 1, 1)
        y = (y - mean) * lax.rsqrt(var + 1e-5) * gamma + beta

        x_all = y.reshape(step, ch, B * Fc * Tc)

    # torch: cat over step, flatten (C,F,T) channel-major, mean over step.
    feats = jnp.transpose(jnp.mean(y, axis=0), (1, 0, 2, 3)).reshape(B, -1)
    logits = feats @ params["w_cls"] + params["b_cls"]        # attention_flag=False

    target_index = jnp.argmax(target, axis=1)
    pred_index = jnp.argmax(logits, axis=1)
    correct_batch = jnp.expand_dims(jnp.sum(target_index == pred_index), 0)
    logp = jax.nn.log_softmax(logits, axis=1)
    loss = -jnp.mean(jnp.take_along_axis(logp, target_index[:, None], axis=1))
    losses_batch = jnp.expand_dims(loss, 0)
    return losses_batch, correct_batch


# --------------------------------------------------------------------------
# Deterministic parameter init (synthetic, shapes per the module's __init__)
# --------------------------------------------------------------------------
def init_params(key, cfg, F0, T0, num_labels=4):
    hidden = cfg["hidden_channels"]
    cins = [cfg["input_channels"]] + hidden
    cells = []
    Fi, Ti = F0, T0
    for i, ch in enumerate(hidden):
        cin = cins[i]
        kh, kw = cfg["kernel_size"][i]
        kk = kh * kw
        key, k_wx, k_wh, k_b = jax.random.split(key, 4)
        bx = 1.0 / np.sqrt(cin * kk)          # PyTorch Conv2d default bound
        bh = 1.0 / np.sqrt(ch * kk)
        wx = jax.random.uniform(k_wx, (kk, 4 * ch, cin), jnp.float32, -bx, bx)
        wh = jax.random.uniform(k_wh, (kk, 4 * ch, ch), jnp.float32, -bh, bh)
        bias = jax.random.uniform(k_b, (4 * ch, 1), jnp.float32, -bx, bx)
        cells.append({
            "wx": wx.astype(jnp.bfloat16),    # gates packed as [i, f, c, o]
            "wh": wh.astype(jnp.bfloat16),
            "bias": bias,
            "gamma": jnp.ones((ch,), jnp.float32),
            "beta": jnp.zeros((ch,), jnp.float32),
        })
        kp = cfg["kernel_size_pool"][i]
        sp = cfg["kernel_stride_pool"][i]
        pph, ppw = (kp[0] - 1) // 2, (kp[1] - 1) // 2
        Fi = (Fi + 2 * pph - kp[0]) // sp[0] + 1
        Ti = (Ti + 2 * ppw - kp[1]) // sp[1] + 1

    # linear_dim from the actual output size (PyTorch hard-codes a 96x128 input).
    D = hidden[-1] * Fi * Ti
    key, k1, k2 = jax.random.split(key, 3)
    bd = 1.0 / np.sqrt(D)
    w_cls = jax.random.uniform(k1, (D, num_labels), jnp.float32, -bd, bd)
    b_cls = jax.random.uniform(k2, (num_labels,), jnp.float32, -bd, bd)
    return {"cells": cells, "w_cls": w_cls, "b_cls": b_cls}


# --------------------------------------------------------------------------
if __name__ == "__main__":
    cfg = {
        "input_channels": 4,
        "hidden_channels": [8, 16],
        "kernel_size": [(3, 3), (3, 3)],
        "kernel_size_pool": [(2, 2), (2, 2)],
        "kernel_stride_pool": [(2, 2), (2, 2)],
        "step": 4,
    }
    B, F0, T0 = 2, 16, 16
    num_labels = 4

    key = jax.random.PRNGKey(0)
    k_x, k_t, k_p = jax.random.split(key, 3)
    x = jax.random.normal(
        k_x, (B, cfg["input_channels"], F0, T0, cfg["step"]), jnp.float32)
    target = jax.random.normal(k_t, (B, num_labels), jnp.float32)

    params = init_params(k_p, cfg, F0, T0, num_labels)

    fwd = jax.jit(functools.partial(conv_lstm_forward, cfg=cfg))
    losses_batch, correct_batch = fwd(x, target, params)
    jax.block_until_ready((losses_batch, correct_batch))

    assert losses_batch.shape == (1,) and correct_batch.shape == (1,)
    print("KERNEL_OK")
</pallas_src>

<mosaic_0001>
module attributes {stable_mosaic.version = 11 : i64} {
  func.func @_layer_kernel(%arg0: i32, %arg1: memref<1x4x512xf32, #tpu.memory_space<vmem>>, %arg2: memref<9x32x4xbf16, #tpu.memory_space<vmem>>, %arg3: memref<9x32x8xbf16, #tpu.memory_space<vmem>>, %arg4: memref<32x1xf32, #tpu.memory_space<vmem>>, %arg5: memref<9x1x512xf32, #tpu.memory_space<vmem>>, %arg6: memref<1x8x512xf32, #tpu.memory_space<vmem>>, %arg7: memref<8x512xf32, #tpu.memory_space<vmem>>, %arg8: memref<8x512xf32, #tpu.memory_space<vmem>>) attributes {dimension_semantics = [#tpu.dimension_semantics<arbitrary>], iteration_bounds = array<i64: 4>, scalar_prefetch = 0 : i64, scratch_operands = 2 : i64, tpu.core_type = #tpu.core_type<tc>, window_params = [{transform_indices = @transform_0, window_bounds = array<i64: 1, 4, 512>}, {pipeline_mode = #tpu.pipeline_mode<synchronous>, transform_indices = @transform_1, window_bounds = array<i64: 9, 32, 4>}, {pipeline_mode = #tpu.pipeline_mode<synchronous>, transform_indices = @transform_2, window_bounds = array<i64: 9, 32, 8>}, {pipeline_mode = #tpu.pipeline_mode<synchronous>, transform_indices = @transform_3, window_bounds = array<i64: 32, 1>}, {pipeline_mode = #tpu.pipeline_mode<synchronous>, transform_indices = @transform_4, window_bounds = array<i64: 9, 1, 512>}, {transform_indices = @transform_5, window_bounds = array<i64: 1, 8, 512>}]} {
    %c0_i32 = arith.constant 0 : i32
    %0 = arith.cmpi eq, %arg0, %c0_i32 : i32
    %1 = arith.extui %0 : i1 to i32
    %c0_i32_0 = arith.constant 0 : i32
    %2 = arith.cmpi ne, %1, %c0_i32_0 : i32
    scf.if %2 {
      %cst_118 = arith.constant 0.000000e+00 : f32
      %201 = vector.broadcast %cst_118 : f32 to vector<8x512xf32>
      %c0_119 = arith.constant 0 : index
      %c0_120 = arith.constant 0 : index
      %202 = vector.load %arg7[%c0_119, %c0_120] : memref<8x512xf32, #tpu.memory_space<vmem>>, vector<8x512xf32>
      tpu.vector_store %arg7[%c0_119, %c0_120], %201 {strides = array<i32>} : memref<8x512xf32, #tpu.memory_space<vmem>>, vector<8x512xf32>,
      %cst_121 = arith.constant 0.000000e+00 : f32
      %203 = vector.broadcast %cst_121 : f32 to vector<8x512xf32>
      %c0_122 = arith.constant 0 : index
      %c0_123 = arith.constant 0 : index
      %204 = vector.load %arg8[%c0_122, %c0_123] : memref<8x512xf32, #tpu.memory_space<vmem>>, vector<8x512xf32>
      tpu.vector_store %arg8[%c0_122, %c0_123], %203 {strides = array<i32>} : memref<8x512xf32, #tpu.memory_space<vmem>>, vector<8x512xf32>,
    } else {
    }
    %c0 = arith.constant 0 : index
    %c0_1 = arith.constant 0 : index
    %c0_2 = arith.constant 0 : index
    %3 = vector.load %arg1[%c0, %c0_1, %c0_2] : memref<1x4x512xf32, #tpu.memory_space<vmem>>, vector<1x4x512xf32>
    %4 = vector.shape_cast %3 : vector<1x4x512xf32> to vector<4x512xf32>
    %c0_3 = arith.constant 0 : index
    %c0_4 = arith.constant 0 : index
    %5 = vector.load %arg7[%c0_3, %c0_4] : memref<8x512xf32, #tpu.memory_space<vmem>>, vector<8x512xf32>
    %cst = arith.constant 0.000000e+00 : f32
    %6 = vector.broadcast %cst : f32 to vector<32x512xf32>
    %c17_i32 = arith.constant 17 : i32
    %7 = tpu.dynamic_rotate %4 by %c17_i32 dim 1 : vector<4x512xf32>, i32 -> vector<4x512xf32>
    %c17_i32_5 = arith.constant 17 : i32
    %8 = tpu.dynamic_rotate %5 by %c17_i32_5 dim 1 : vector<8x512xf32>, i32 -> vector<8x512xf32>
    %c0_6 = arith.constant 0 : index
    %c0_7 = arith.constant 0 : index
    %c0_8 = arith.constant 0 : index
    %9 = vector.load %arg5[%c0_6, %c0_7, %c0_8] : memref<9x1x512xf32, #tpu.memory_space<vmem>>, vector<1x1x512xf32>
    %10 = vector.shape_cast %9 : vector<1x1x512xf32> to vector<1x512xf32>
    %11 = vector.broadcast %10 : vector<1x512xf32> to vector<4x512xf32>
    %12 = arith.mulf %7, %11 : vector<4x512xf32>
    %13 = arith.truncf %12 : vector<4x512xf32> to vector<4x512xbf16>
    %14 = vector.broadcast %10 : vector<1x512xf32> to vector<8x512xf32>
    %15 = arith.mulf %8, %14 : vector<8x512xf32>
    %16 = arith.truncf %15 : vector<8x512xf32> to vector<8x512xbf16>
    %c0_9 = arith.constant 0 : index
    %c0_10 = arith.constant 0 : index
    %c0_11 = arith.constant 0 : index
    %17 = vector.load %arg2[%c0_9, %c0_10, %c0_11] : memref<9x32x4xbf16, #tpu.memory_space<vmem>>, vector<1x32x4xbf16>
    %18 = vector.shape_cast %17 : vector<1x32x4xbf16> to vector<32x4xbf16>
    %cst_12 = arith.constant dense<0.000000e+00> : vector<32x512xf32>
    %19 = tpu.matmul %18, %13, %cst_12 {dimension_numbers = #tpu.dot_dimension_numbers<[1], [0], [0], [1], [0, 0, 1, 1], [], []>} : vector<32x4xbf16>, vector<4x512xbf16>, vector<32x512xf32> -> vector<32x512xf32>
    %20 = arith.addf %6, %19 : vector<32x512xf32>
    %c0_13 = arith.constant 0 : index
    %c0_14 = arith.constant 0 : index
    %c0_15 = arith.constant 0 : index
    %21 = vector.load %arg3[%c0_13, %c0_14, %c0_15] : memref<9x32x8xbf16, #tpu.memory_space<vmem>>, vector<1x32x8xbf16>
    %22 = vector.shape_cast %21 : vector<1x32x8xbf16> to vector<32x8xbf16>
    %cst_16 = arith.constant dense<0.000000e+00> : vector<32x512xf32>
    %23 = tpu.matmul %22, %16, %cst_16 {dimension_numbers = #tpu.dot_dimension_numbers<[1], [0], [0], [1], [0, 0, 1, 1], [], []>} : vector<32x8xbf16>, vector<8x512xbf16>, vector<32x512xf32> -> vector<32x512xf32>
    %24 = arith.addf %20, %23 : vector<32x512xf32>
    %c16_i32 = arith.constant 16 : i32
    %25 = tpu.dynamic_rotate %4 by %c16_i32 dim 1 : vector<4x512xf32>, i32 -> vector<4x512xf32>
    %c16_i32_17 = arith.constant 16 : i32
    %26 = tpu.dynamic_rotate %5 by %c16_i32_17 dim 1 : vector<8x512xf32>, i32 -> vector<8x512xf32>
    %c1 = arith.constant 1 : index
    %c0_18 = arith.constant 0 : index
    %c0_19 = arith.constant 0 : index
    %27 = vector.load %arg5[%c1, %c0_18, %c0_19] : memref<9x1x512xf32, #tpu.memory_space<vmem>>, vector<1x1x512xf32>
    %28 = vector.shape_cast %27 : vector<1x1x512xf32> to vector<1x512xf32>
    %29 = vector.broadcast %28 : vector<1x512xf32> to vector<4x512xf32>
    %30 = arith.mulf %25, %29 : vector<4x512xf32>
    %31 = arith.truncf %30 : vector<4x512xf32> to vector<4x512xbf16>
    %32 = vector.broadcast %28 : vector<1x512xf32> to vector<8x512xf32>
    %33 = arith.mulf %26, %32 : vector<8x512xf32>
    %34 = arith.truncf %33 : vector<8x512xf32> to vector<8x512xbf16>
    %c1_20 = arith.constant 1 : index
    %c0_21 = arith.constant 0 : index
    %c0_22 = arith.constant 0 : index
    %35 = vector.load %arg2[%c1_20, %c0_21, %c0_22] : memref<9x32x4xbf16, #tpu.memory_space<vmem>>, vector<1x32x4xbf16>
    %36 = vector.shape_cast %35 : vector<1x32x4xbf16> to vector<32x4xbf16>
    %cst_23 = arith.constant dense<0.000000e+00> : vector<32x512xf32>
    %37 = tpu.matmul %36, %31, %cst_23 {dimension_numbers = #tpu.dot_dimension_numbers<[1], [0], [0], [1], [0, 0, 1, 1], [], []>} : vector<32x4xbf16>, vector<4x512xbf16>, vector<32x512xf32> -> vector<32x512xf32>
    %38 = arith.addf %24, %37 : vector<32x512xf32>
    %c1_24 = arith.constant 1 : index
    %c0_25 = arith.constant 0 : index
    %c0_26 = arith.constant 0 : index
    %39 = vector.load %arg3[%c1_24, %c0_25, %c0_26] : memref<9x32x8xbf16, #tpu.memory_space<vmem>>, vector<1x32x8xbf16>
    %40 = vector.shape_cast %39 : vector<1x32x8xbf16> to vector<32x8xbf16>
    %cst_27 = arith.constant dense<0.000000e+00> : vector<32x512xf32>
    %41 = tpu.matmul %40, %34, %cst_27 {dimension_numbers = #tpu.dot_dimension_numbers<[1], [0], [0], [1], [0, 0, 1, 1], [], []>} : vector<32x8xbf16>, vector<8x512xbf16>, vector<32x512xf32> -> vector<32x512xf32>
    %42 = arith.addf %38, %41 : vector<32x512xf32>
    %c15_i32 = arith.constant 15 : i32
    %43 = tpu.dynamic_rotate %4 by %c15_i32 dim 1 : vector<4x512xf32>, i32 -> vector<4x512xf32>
    %c15_i32_28 = arith.constant 15 : i32
    %44 = tpu.dynamic_rotate %5 by %c15_i32_28 dim 1 : vector<8x512xf32>, i32 -> vector<8x512xf32>
    %c2 = arith.constant 2 : index
    %c0_29 = arith.constant 0 : index
    %c0_30 = arith.constant 0 : index
    %45 = vector.load %arg5[%c2, %c0_29, %c0_30] : memref<9x1x512xf32, #tpu.memory_space<vmem>>, vector<1x1x512xf32>
    %46 = vector.shape_cast %45 : vector<1x1x512xf32> to vector<1x512xf32>
    %47 = vector.broadcast %46 : vector<1x512xf32> to vector<4x512xf32>
    %48 = arith.mulf %43, %47 : vector<4x512xf32>
    %49 = arith.truncf %48 : vector<4x512xf32> to vector<4x512xbf16>
    %50 = vector.broadcast %46 : vector<1x512xf32> to vector<8x512xf32>
    %51 = arith.mulf %44, %50 : vector<8x512xf32>
    %52 = arith.truncf %51 : vector<8x512xf32> to vector<8x512xbf16>
    %c2_31 = arith.constant 2 : index
    %c0_32 = arith.constant 0 : index
    %c0_33 = arith.constant 0 : index
    %53 = vector.load %arg2[%c2_31, %c0_32, %c0_33] : memref<9x32x4xbf16, #tpu.memory_space<vmem>>, vector<1x32x4xbf16>
    %54 = vector.shape_cast %53 : vector<1x32x4xbf16> to vector<32x4xbf16>
    %cst_34 = arith.constant dense<0.000000e+00> : vector<32x512xf32>
    %55 = tpu.matmul %54, %49, %cst_34 {dimension_numbers = #tpu.dot_dimension_numbers<[1], [0], [0], [1], [0, 0, 1, 1], [], []>} : vector<32x4xbf16>, vector<4x512xbf16>, vector<32x512xf32> -> vector<32x512xf32>
    %56 = arith.addf %42, %55 : vector<32x512xf32>
    %c2_35 = arith.constant 2 : index
    %c0_36 = arith.constant 0 : index
    %c0_37 = arith.constant 0 : index
    %57 = vector.load %arg3[%c2_35, %c0_36, %c0_37] : memref<9x32x8xbf16, #tpu.memory_space<vmem>>, vector<1x32x8xbf16>
    %58 = vector.shape_cast %57 : vector<1x32x8xbf16> to vector<32x8xbf16>
    %cst_38 = arith.constant dense<0.000000e+00> : vector<32x512xf32>
    %59 = tpu.matmul %58, %52, %cst_38 {dimension_numbers = #tpu.dot_dimension_numbers<[1], [0], [0], [1], [0, 0, 1, 1], [], []>} : vector<32x8xbf16>, vector<8x512xbf16>, vector<32x512xf32> -> vector<32x512xf32>
    %60 = arith.addf %56, %59 : vector<32x512xf32>
    %c1_i32 = arith.constant 1 : i32
    %61 = tpu.dynamic_rotate %4 by %c1_i32 dim 1 : vector<4x512xf32>, i32 -> vector<4x512xf32>
    %c1_i32_39 = arith.constant 1 : i32
    %62 = tpu.dynamic_rotate %5 by %c1_i32_39 dim 1 : vector<8x512xf32>, i32 -> vector<8x512xf32>
    %c3 = arith.constant 3 : index
    %c0_40 = arith.constant 0 : index
    %c0_41 = arith.constant 0 : index
    %63 = vector.load %arg5[%c3, %c0_40, %c0_41] : memref<9x1x512xf32, #tpu.memory_space<vmem>>, vector<1x1x512xf32>
    %64 = vector.shape_cast %63 : vector<1x1x512xf32> to vector<1x512xf32>
    %65 = vector.broadcast %64 : vector<1x512xf32> to vector<4x512xf32>
    %66 = arith.mulf %61, %65 : vector<4x512xf32>
    %67 = arith.truncf %66 : vector<4x512xf32> to vector<4x512xbf16>
    %68 = vector.broadcast %64 : vector<1x512xf32> to vector<8x512xf32>
    %69 = arith.mulf %62, %68 : vector<8x512xf32>
    %70 = arith.truncf %69 : vector<8x512xf32> to vector<8x512xbf16>
    %c3_42 = arith.constant 3 : index
    %c0_43 = arith.constant 0 : index
    %c0_44 = arith.constant 0 : index
    %71 = vector.load %arg2[%c3_42, %c0_43, %c0_44] : memref<9x32x4xbf16, #tpu.memory_space<vmem>>, vector<1x32x4xbf16>
    %72 = vector.shape_cast %71 : vector<1x32x4xbf16> to vector<32x4xbf16>
    %cst_45 = arith.constant dense<0.000000e+00> : vector<32x512xf32>
    %73 = tpu.matmul %72, %67, %cst_45 {dimension_numbers = #tpu.dot_dimension_numbers<[1], [0], [0], [1], [0, 0, 1, 1], [], []>} : vector<32x4xbf16>, vector<4x512xbf16>, vector<32x512xf32> -> vector<32x512xf32>
    %74 = arith.addf %60, %73 : vector<32x512xf32>
    %c3_46 = arith.constant 3 : index
    %c0_47 = arith.constant 0 : index
    %c0_48 = arith.constant 0 : index
    %75 = vector.load %arg3[%c3_46, %c0_47, %c0_48] : memref<9x32x8xbf16, #tpu.memory_space<vmem>>, vector<1x32x8xbf16>
    %76 = vector.shape_cast %75 : vector<1x32x8xbf16> to vector<32x8xbf16>
    %cst_49 = arith.constant dense<0.000000e+00> : vector<32x512xf32>
    %77 = tpu.matmul %76, %70, %cst_49 {dimension_numbers = #tpu.dot_dimension_numbers<[1], [0], [0], [1], [0, 0, 1, 1], [], []>} : vector<32x8xbf16>, vector<8x512xbf16>, vector<32x512xf32> -> vector<32x512xf32>
    %78 = arith.addf %74, %77 : vector<32x512xf32>
    %c4 = arith.constant 4 : index
    %c0_50 = arith.constant 0 : index
    %c0_51 = arith.constant 0 : index
    %79 = vector.load %arg5[%c4, %c0_50, %c0_51] : memref<9x1x512xf32, #tpu.memory_space<vmem>>, vector<1x1x512xf32>
    %80 = vector.shape_cast %79 : vector<1x1x512xf32> to vector<1x512xf32>
    %81 = vector.broadcast %80 : vector<1x512xf32> to vector<4x512xf32>
    %82 = arith.mulf %4, %81 : vector<4x512xf32>
    %83 = arith.truncf %82 : vector<4x512xf32> to vector<4x512xbf16>
    %84 = vector.broadcast %80 : vector<1x512xf32> to vector<8x512xf32>
    %85 = arith.mulf %5, %84 : vector<8x512xf32>
    %86 = arith.truncf %85 : vector<8x512xf32> to vector<8x512xbf16>
    %c4_52 = arith.constant 4 : index
    %c0_53 = arith.constant 0 : index
    %c0_54 = arith.constant 0 : index
    %87 = vector.load %arg2[%c4_52, %c0_53, %c0_54] : memref<9x32x4xbf16, #tpu.memory_space<vmem>>, vector<1x32x4xbf16>
    %88 = vector.shape_cast %87 : vector<1x32x4xbf16> to vector<32x4xbf16>
    %cst_55 = arith.constant dense<0.000000e+00> : vector<32x512xf32>
    %89 = tpu.matmul %88, %83, %cst_55 {dimension_numbers = #tpu.dot_dimension_numbers<[1], [0], [0], [1], [0, 0, 1, 1], [], []>} : vector<32x4xbf16>, vector<4x512xbf16>, vector<32x512xf32> -> vector<32x512xf32>
    %90 = arith.addf %78, %89 : vector<32x512xf32>
    %c4_56 = arith.constant 4 : index
    %c0_57 = arith.constant 0 : index
    %c0_58 = arith.constant 0 : index
    %91 = vector.load %arg3[%c4_56, %c0_57, %c0_58] : memref<9x32x8xbf16, #tpu.memory_space<vmem>>, vector<1x32x8xbf16>
    %92 = vector.shape_cast %91 : vector<1x32x8xbf16> to vector<32x8xbf16>
    %cst_59 = arith.constant dense<0.000000e+00> : vector<32x512xf32>
    %93 = tpu.matmul %92, %86, %cst_59 {dimension_numbers = #tpu.dot_dimension_numbers<[1], [0], [0], [1], [0, 0, 1, 1], [], []>} : vector<32x8xbf16>, vector<8x512xbf16>, vector<32x512xf32> -> vector<32x512xf32>
    %94 = arith.addf %90, %93 : vector<32x512xf32>
    %c511_i32 = arith.constant 511 : i32
    %95 = tpu.dynamic_rotate %4 by %c511_i32 dim 1 : vector<4x512xf32>, i32 -> vector<4x512xf32>
    %c511_i32_60 = arith.constant 511 : i32
    %96 = tpu.dynamic_rotate %5 by %c511_i32_60 dim 1 : vector<8x512xf32>, i32 -> vector<8x512xf32>
    %c5 = arith.constant 5 : index
    %c0_61 = arith.constant 0 : index
    %c0_62 = arith.constant 0 : index
    %97 = vector.load %arg5[%c5, %c0_61, %c0_62] : memref<9x1x512xf32, #tpu.memory_space<vmem>>, vector<1x1x512xf32>
    %98 = vector.shape_cast %97 : vector<1x1x512xf32> to vector<1x512xf32>
    %99 = vector.broadcast %98 : vector<1x512xf32> to vector<4x512xf32>
    %100 = arith.mulf %95, %99 : vector<4x512xf32>
    %101 = arith.truncf %100 : vector<4x512xf32> to vector<4x512xbf16>
    %102 = vector.broadcast %98 : vector<1x512xf32> to vector<8x512xf32>
    %103 = arith.mulf %96, %102 : vector<8x512xf32>
    %104 = arith.truncf %103 : vector<8x512xf32> to vector<8x512xbf16>
    %c5_63 = arith.constant 5 : index
    %c0_64 = arith.constant 0 : index
    %c0_65 = arith.constant 0 : index
    %105 = vector.load %arg2[%c5_63, %c0_64, %c0_65] : memref<9x32x4xbf16, #tpu.memory_space<vmem>>, vector<1x32x4xbf16>
    %106 = vector.shape_cast %105 : vector<1x32x4xbf16> to vector<32x4xbf16>
    %cst_66 = arith.constant dense<0.000000e+00> : vector<32x512xf32>
    %107 = tpu.matmul %106, %101, %cst_66 {dimension_numbers = #tpu.dot_dimension_numbers<[1], [0], [0], [1], [0, 0, 1, 1], [], []>} : vector<32x4xbf16>, vector<4x512xbf16>, vector<32x512xf32> -> vector<32x512xf32>
    %108 = arith.addf %94, %107 : vector<32x512xf32>
    %c5_67 = arith.constant 5 : index
    %c0_68 = arith.constant 0 : index
    %c0_69 = arith.constant 0 : index
    %109 = vector.load %arg3[%c5_67, %c0_68, %c0_69] : memref<9x32x8xbf16, #tpu.memory_space<vmem>>, vector<1x32x8xbf16>
    %110 = vector.shape_cast %109 : vector<1x32x8xbf16> to vector<32x8xbf16>
    %cst_70 = arith.constant dense<0.000000e+00> : vector<32x512xf32>
    %111 = tpu.matmul %110, %104, %cst_70 {dimension_numbers = #tpu.dot_dimension_numbers<[1], [0], [0], [1], [0, 0, 1, 1], [], []>} : vector<32x8xbf16>, vector<8x512xbf16>, vector<32x512xf32> -> vector<32x512xf32>
    %112 = arith.addf %108, %111 : vector<32x512xf32>
    %c497_i32 = arith.constant 497 : i32
    %113 = tpu.dynamic_rotate %4 by %c497_i32 dim 1 : vector<4x512xf32>, i32 -> vector<4x512xf32>
    %c497_i32_71 = arith.constant 497 : i32
    %114 = tpu.dynamic_rotate %5 by %c497_i32_71 dim 1 : vector<8x512xf32>, i32 -> vector<8x512xf32>
    %c6 = arith.constant 6 : index
    %c0_72 = arith.constant 0 : index
    %c0_73 = arith.constant 0 : index
    %115 = vector.load %arg5[%c6, %c0_72, %c0_73] : memref<9x1x512xf32, #tpu.memory_space<vmem>>, vector<1x1x512xf32>
    %116 = vector.shape_cast %115 : vector<1x1x512xf32> to vector<1x512xf32>
    %117 = vector.broadcast %116 : vector<1x512xf32> to vector<4x512xf32>
    %118 = arith.mulf %113, %117 : vector<4x512xf32>
    %119 = arith.truncf %118 : vector<4x512xf32> to vector<4x512xbf16>
    %120 = vector.broadcast %116 : vector<1x512xf32> to vector<8x512xf32>
    %121 = arith.mulf %114, %120 : vector<8x512xf32>
    %122 = arith.truncf %121 : vector<8x512xf32> to vector<8x512xbf16>
    %c6_74 = arith.constant 6 : index
    %c0_75 = arith.constant 0 : index
    %c0_76 = arith.constant 0 : index
    %123 = vector.load %arg2[%c6_74, %c0_75, %c0_76] : memref<9x32x4xbf16, #tpu.memory_space<vmem>>, vector<1x32x4xbf16>
    %124 = vector.shape_cast %123 : vector<1x32x4xbf16> to vector<32x4xbf16>
    %cst_77 = arith.constant dense<0.000000e+00> : vector<32x512xf32>
    %125 = tpu.matmul %124, %119, %cst_77 {dimension_numbers = #tpu.dot_dimension_numbers<[1], [0], [0], [1], [0, 0, 1, 1], [], []>} : vector<32x4xbf16>, vector<4x512xbf16>, vector<32x512xf32> -> vector<32x512xf32>
    %126 = arith.addf %112, %125 : vector<32x512xf32>
    %c6_78 = arith.constant 6 : index
    %c0_79 = arith.constant 0 : index
    %c0_80 = arith.constant 0 : index
    %127 = vector.load %arg3[%c6_78, %c0_79, %c0_80] : memref<9x32x8xbf16, #tpu.memory_space<vmem>>, vector<1x32x8xbf16>
    %128 = vector.shape_cast %127 : vector<1x32x8xbf16> to vector<32x8xbf16>
    %cst_81 = arith.constant dense<0.000000e+00> : vector<32x512xf32>
    %129 = tpu.matmul %128, %122, %cst_81 {dimension_numbers = #tpu.dot_dimension_numbers<[1], [0], [0], [1], [0, 0, 1, 1], [], []>} : vector<32x8xbf16>, vector<8x512xbf16>, vector<32x512xf32> -> vector<32x512xf32>
    %130 = arith.addf %126, %129 : vector<32x512xf32>
    %c496_i32 = arith.constant 496 : i32
    %131 = tpu.dynamic_rotate %4 by %c496_i32 dim 1 : vector<4x512xf32>, i32 -> vector<4x512xf32>
    %c496_i32_82 = arith.constant 496 : i32
    %132 = tpu.dynamic_rotate %5 by %c496_i32_82 dim 1 : vector<8x512xf32>, i32 -> vector<8x512xf32>
    %c7 = arith.constant 7 : index
    %c0_83 = arith.constant 0 : index
    %c0_84 = arith.constant 0 : index
    %133 = vector.load %arg5[%c7, %c0_83, %c0_84] : memref<9x1x512xf32, #tpu.memory_space<vmem>>, vector<1x1x512xf32>
    %134 = vector.shape_cast %133 : vector<1x1x512xf32> to vector<1x512xf32>
    %135 = vector.broadcast %134 : vector<1x512xf32> to vector<4x512xf32>
    %136 = arith.mulf %131, %135 : vector<4x512xf32>
    %137 = arith.truncf %136 : vector<4x512xf32> to vector<4x512xbf16>
    %138 = vector.broadcast %134 : vector<1x512xf32> to vector<8x512xf32>
    %139 = arith.mulf %132, %138 : vector<8x512xf32>
    %140 = arith.truncf %139 : vector<8x512xf32> to vector<8x512xbf16>
    %c7_85 = arith.constant 7 : index
    %c0_86 = arith.constant 0 : index
    %c0_87 = arith.constant 0 : index
    %141 = vector.load %arg2[%c7_85, %c0_86, %c0_87] : memref<9x32x4xbf16, #tpu.memory_space<vmem>>, vector<1x32x4xbf16>
    %142 = vector.shape_cast %141 : vector<1x32x4xbf16> to vector<32x4xbf16>
    %cst_88 = arith.constant dense<0.000000e+00> : vector<32x512xf32>
    %143 = tpu.matmul %142, %137, %cst_88 {dimension_numbers = #tpu.dot_dimension_numbers<[1], [0], [0], [1], [0, 0, 1, 1], [], []>} : vector<32x4xbf16>, vector<4x512xbf16>, vector<32x512xf32> -> vector<32x512xf32>
    %144 = arith.addf %130, %143 : vector<32x512xf32>
    %c7_89 = arith.constant 7 : index
    %c0_90 = arith.constant 0 : index
    %c0_91 = arith.constant 0 : index
    %145 = vector.load %arg3[%c7_89, %c0_90, %c0_91] : memref<9x32x8xbf16, #tpu.memory_space<vmem>>, vector<1x32x8xbf16>
    %146 = vector.shape_cast %145 : vector<1x32x8xbf16> to vector<32x8xbf16>
    %cst_92 = arith.constant dense<0.000000e+00> : vector<32x512xf32>
    %147 = tpu.matmul %146, %140, %cst_92 {dimension_numbers = #tpu.dot_dimension_numbers<[1], [0], [0], [1], [0, 0, 1, 1], [], []>} : vector<32x8xbf16>, vector<8x512xbf16>, vector<32x512xf32> -> vector<32x512xf32>
    %148 = arith.addf %144, %147 : vector<32x512xf32>
    %c495_i32 = arith.constant 495 : i32
    %149 = tpu.dynamic_rotate %4 by %c495_i32 dim 1 : vector<4x512xf32>, i32 -> vector<4x512xf32>
    %c495_i32_93 = arith.constant 495 : i32
    %150 = tpu.dynamic_rotate %5 by %c495_i32_93 dim 1 : vector<8x512xf32>, i32 -> vector<8x512xf32>
    %c8 = arith.constant 8 : index
    %c0_94 = arith.constant 0 : index
    %c0_95 = arith.constant 0 : index
    %151 = vector.load %arg5[%c8, %c0_94, %c0_95] : memref<9x1x512xf32, #tpu.memory_space<vmem>>, vector<1x1x512xf32>
    %152 = vector.shape_cast %151 : vector<1x1x512xf32> to vector<1x512xf32>
    %153 = vector.broadcast %152 : vector<1x512xf32> to vector<4x512xf32>
    %154 = arith.mulf %149, %153 : vector<4x512xf32>
    %155 = arith.truncf %154 : vector<4x512xf32> to vector<4x512xbf16>
    %156 = vector.broadcast %152 : vector<1x512xf32> to vector<8x512xf32>
    %157 = arith.mulf %150, %156 : vector<8x512xf32>
    %158 = arith.truncf %157 : vector<8x512xf32> to vector<8x512xbf16>
    %c8_96 = arith.constant 8 : index
    %c0_97 = arith.constant 0 : index
    %c0_98 = arith.constant 0 : index
    %159 = vector.load %arg2[%c8_96, %c0_97, %c0_98] : memref<9x32x4xbf16, #tpu.memory_space<vmem>>, vector<1x32x4xbf16>
    %160 = vector.shape_cast %159 : vector<1x32x4xbf16> to vector<32x4xbf16>
    %cst_99 = arith.constant dense<0.000000e+00> : vector<32x512xf32>
    %161 = tpu.matmul %160, %155, %cst_99 {dimension_numbers = #tpu.dot_dimension_numbers<[1], [0], [0], [1], [0, 0, 1, 1], [], []>} : vector<32x4xbf16>, vector<4x512xbf16>, vector<32x512xf32> -> vector<32x512xf32>
    %162 = arith.addf %148, %161 : vector<32x512xf32>
    %c8_100 = arith.constant 8 : index
    %c0_101 = arith.constant 0 : index
    %c0_102 = arith.constant 0 : index
    %163 = vector.load %arg3[%c8_100, %c0_101, %c0_102] : memref<9x32x8xbf16, #tpu.memory_space<vmem>>, vector<1x32x8xbf16>
    %164 = vector.shape_cast %163 : vector<1x32x8xbf16> to vector<32x8xbf16>
    %cst_103 = arith.constant dense<0.000000e+00> : vector<32x512xf32>
    %165 = tpu.matmul %164, %158, %cst_103 {dimension_numbers = #tpu.dot_dimension_numbers<[1], [0], [0], [1], [0, 0, 1, 1], [], []>} : vector<32x8xbf16>, vector<8x512xbf16>, vector<32x512xf32> -> vector<32x512xf32>
    %166 = arith.addf %162, %165 : vector<32x512xf32>
    %c0_104 = arith.constant 0 : index
    %c0_105 = arith.constant 0 : index
    %167 = vector.load %arg4[%c0_104, %c0_105] : memref<32x1xf32, #tpu.memory_space<vmem>>, vector<32x1xf32>
    %168 = vector.broadcast %167 : vector<32x1xf32> to vector<32x512xf32>
    %169 = arith.addf %166, %168 : vector<32x512xf32>
    %170 = vector.extract_strided_slice %169 {offsets = [0, 0], sizes = [8, 512], strides = [1, 1]} : vector<32x512xf32> to vector<8x512xf32>
    %171 = arith.negf %170 : vector<8x512xf32>
    %172 = math.exp %171 : vector<8x512xf32>
    %cst_106 = arith.constant 1.000000e+00 : f32
    %173 = vector.broadcast %cst_106 : f32 to vector<8x512xf32>
    %174 = arith.addf %173, %172 : vector<8x512xf32>
    %175 = arith.divf %173, %174 : vector<8x512xf32>
    %176 = vector.extract_strided_slice %169 {offsets = [8, 0], sizes = [8, 512], strides = [1, 1]} : vector<32x512xf32> to vector<8x512xf32>
    %177 = arith.negf %176 : vector<8x512xf32>
    %178 = math.exp %177 : vector<8x512xf32>
    %cst_107 = arith.constant 1.000000e+00 : f32
    %179 = vector.broadcast %cst_107 : f32 to vector<8x512xf32>
    %180 = arith.addf %179, %178 : vector<8x512xf32>
    %181 = arith.divf %179, %180 : vector<8x512xf32>
    %182 = vector.extract_strided_slice %169 {offsets = [16, 0], sizes = [8, 512], strides = [1, 1]} : vector<32x512xf32> to vector<8x512xf32>
    %183 = math.tanh %182 : vector<8x512xf32>
    %184 = vector.extract_strided_slice %169 {offsets = [24, 0], sizes = [8, 512], strides = [1, 1]} : vector<32x512xf32> to vector<8x512xf32>
    %185 = arith.negf %184 : vector<8x512xf32>
    %186 = math.exp %185 : vector<8x512xf32>
    %cst_108 = arith.constant 1.000000e+00 : f32
    %187 = vector.broadcast %cst_108 : f32 to vector<8x512xf32>
    %188 = arith.addf %187, %186 : vector<8x512xf32>
    %189 = arith.divf %187, %188 : vector<8x512xf32>
    %c0_109 = arith.constant 0 : index
    %c0_110 = arith.constant 0 : index
    %190 = vector.load %arg8[%c0_109, %c0_110] : memref<8x512xf32, #tpu.memory_space<vmem>>, vector<8x512xf32>
    %191 = arith.mulf %181, %190 : vector<8x512xf32>
    %192 = arith.mulf %175, %183 : vector<8x512xf32>
    %193 = arith.addf %191, %192 : vector<8x512xf32>
    %194 = math.tanh %193 : vector<8x512xf32>
    %195 = arith.mulf %189, %194 : vector<8x512xf32>
    %c0_111 = arith.constant 0 : index
    %c0_112 = arith.constant 0 : index
    %196 = vector.load %arg8[%c0_111, %c0_112] : memref<8x512xf32, #tpu.memory_space<vmem>>, vector<8x512xf32>
    tpu.vector_store %arg8[%c0_111, %c0_112], %193 {strides = array<i32>} : memref<8x512xf32, #tpu.memory_space<vmem>>, vector<8x512xf32>,
    %c0_113 = arith.constant 0 : index
    %c0_114 = arith.constant 0 : index
    %197 = vector.load %arg7[%c0_113, %c0_114] : memref<8x512xf32, #tpu.memory_space<vmem>>, vector<8x512xf32>
    tpu.vector_store %arg7[%c0_113, %c0_114], %195 {strides = array<i32>} : memref<8x512xf32, #tpu.memory_space<vmem>>, vector<8x512xf32>,
    %c0_115 = arith.constant 0 : index
    %c0_116 = arith.constant 0 : index
    %c0_117 = arith.constant 0 : index
    %198 = vector.load %arg6[%c0_115, %c0_116, %c0_117] : memref<1x8x512xf32, #tpu.memory_space<vmem>>, vector<1x8x512xf32>
    %199 = vector.shape_cast %198 : vector<1x8x512xf32> to vector<8x512xf32>
    %200 = vector.shape_cast %195 : vector<8x512xf32> to vector<1x8x512xf32>
    tpu.vector_store %arg6[%c0_115, %c0_116, %c0_117], %200 {strides = array<i32>} : memref<1x8x512xf32, #tpu.memory_space<vmem>>, vector<1x8x512xf32>,
    return
  }
  func.func @transform_0(%arg0: i32) -> (i32, i32, i32) {
    %c0_i32 = arith.constant 0 : i32
    %c0_i32_0 = arith.constant 0 : i32
    %c0_i32_1 = arith.constant 0 : i32
    return %arg0, %c0_i32, %c0_i32_0 : i32, i32, i32
  }
  func.func @transform_1(%arg0: i32) -> (i32, i32, i32) {
    %c0_i32 = arith.constant 0 : i32
    %c0_i32_0 = arith.constant 0 : i32
    %c0_i32_1 = arith.constant 0 : i32
    %c0_i32_2 = arith.constant 0 : i32
    return %c0_i32, %c0_i32_0, %c0_i32_1 : i32, i32, i32
  }
  func.func @transform_2(%arg0: i32) -> (i32, i32, i32) {
    %c0_i32 = arith.constant 0 : i32
    %c0_i32_0 = arith.constant 0 : i32
    %c0_i32_1 = arith.constant 0 : i32
    %c0_i32_2 = arith.constant 0 : i32
    return %c0_i32, %c0_i32_0, %c0_i32_1 : i32, i32, i32
  }
  func.func @transform_3(%arg0: i32) -> (i32, i32) {
    %c0_i32 = arith.constant 0 : i32
    %c0_i32_0 = arith.constant 0 : i32
    %c0_i32_1 = arith.constant 0 : i32
    return %c0_i32, %c0_i32_0 : i32, i32
  }
  func.func @transform_4(%arg0: i32) -> (i32, i32, i32) {
    %c0_i32 = arith.constant 0 : i32
    %c0_i32_0 = arith.constant 0 : i32
    %c0_i32_1 = arith.constant 0 : i32
    %c0_i32_2 = arith.constant 0 : i32
    return %c0_i32, %c0_i32_0, %c0_i32_1 : i32, i32, i32
  }
  func.func @transform_5(%arg0: i32) -> (i32, i32, i32) {
    %c0_i32 = arith.constant 0 : i32
    %c0_i32_0 = arith.constant 0 : i32
    %c0_i32_1 = arith.constant 0 : i32
    return %arg0, %c0_i32, %c0_i32_0 : i32, i32, i32
  }
}

module attributes {stable_mosaic.version = 11 : i64} {
  func.func @_layer_kernel(%arg0: i32, %arg1: memref<1x8x128xf32, #tpu.memory_space<vmem>>, %arg2: memref<9x64x8xbf16, #tpu.memory_space<vmem>>, %arg3: memref<9x64x16xbf16, #tpu.memory_space<vmem>>, %arg4: memref<64x1xf32, #tpu.memory_space<vmem>>, %arg5: memref<9x1x128xf32, #tpu.memory_space<vmem>>, %arg6: memref<1x16x128xf32, #tpu.memory_space<vmem>>, %arg7: memref<16x128xf32, #tpu.memory_space<vmem>>, %arg8: memref<16x128xf32, #tpu.memory_space<vmem>>) attributes {dimension_semantics = [#tpu.dimension_semantics<arbitrary>], iteration_bounds = array<i64: 4>, scalar_prefetch = 0 : i64, scratch_operands = 2 : i64, tpu.core_type = #tpu.core_type<tc>, window_params = [{transform_indices = @transform_0, window_bounds = array<i64: 1, 8, 128>}, {pipeline_mode = #tpu.pipeline_mode<synchronous>, transform_indices = @transform_1, window_bounds = array<i64: 9, 64, 8>}, {pipeline_mode = #tpu.pipeline_mode<synchronous>, transform_indices = @transform_2, window_bounds = array<i64: 9, 64, 16>}, {pipeline_mode = #tpu.pipeline_mode<synchronous>, transform_indices = @transform_3, window_bounds = array<i64: 64, 1>}, {pipeline_mode = #tpu.pipeline_mode<synchronous>, transform_indices = @transform_4, window_bounds = array<i64: 9, 1, 128>}, {transform_indices = @transform_5, window_bounds = array<i64: 1, 16, 128>}]} {
    %c0_i32 = arith.constant 0 : i32
    %0 = arith.cmpi eq, %arg0, %c0_i32 : i32
    %1 = arith.extui %0 : i1 to i32
    %c0_i32_0 = arith.constant 0 : i32
    %2 = arith.cmpi ne, %1, %c0_i32_0 : i32
    scf.if %2 {
      %cst_118 = arith.constant 0.000000e+00 : f32
      %201 = vector.broadcast %cst_118 : f32 to vector<16x128xf32>
      %c0_119 = arith.constant 0 : index
      %c0_120 = arith.constant 0 : index
      %202 = vector.load %arg7[%c0_119, %c0_120] : memref<16x128xf32, #tpu.memory_space<vmem>>, vector<16x128xf32>
      tpu.vector_store %arg7[%c0_119, %c0_120], %201 {strides = array<i32>} : memref<16x128xf32, #tpu.memory_space<vmem>>, vector<16x128xf32>,
      %cst_121 = arith.constant 0.000000e+00 : f32
      %203 = vector.broadcast %cst_121 : f32 to vector<16x128xf32>
      %c0_122 = arith.constant 0 : index
      %c0_123 = arith.constant 0 : index
      %204 = vector.load %arg8[%c0_122, %c0_123] : memref<16x128xf32, #tpu.memory_space<vmem>>, vector<16x128xf32>
      tpu.vector_store %arg8[%c0_122, %c0_123], %203 {strides = array<i32>} : memref<16x128xf32, #tpu.memory_space<vmem>>, vector<16x128xf32>,
    } else {
    }
    %c0 = arith.constant 0 : index
    %c0_1 = arith.constant 0 : index
    %c0_2 = arith.constant 0 : index
    %3 = vector.load %arg1[%c0, %c0_1, %c0_2] : memref<1x8x128xf32, #tpu.memory_space<vmem>>, vector<1x8x128xf32>
    %4 = vector.shape_cast %3 : vector<1x8x128xf32> to vector<8x128xf32>
    %c0_3 = arith.constant 0 : index
    %c0_4 = arith.constant 0 : index
    %5 = vector.load %arg7[%c0_3, %c0_4] : memref<16x128xf32, #tpu.memory_space<vmem>>, vector<16x128xf32>
    %cst = arith.constant 0.000000e+00 : f32
    %6 = vector.broadcast %cst : f32 to vector<64x128xf32>
    %c9_i32 = arith.constant 9 : i32
    %7 = tpu.dynamic_rotate %4 by %c9_i32 dim 1 : vector<8x128xf32>, i32 -> vector<8x128xf32>
    %c9_i32_5 = arith.constant 9 : i32
    %8 = tpu.dynamic_rotate %5 by %c9_i32_5 dim 1 : vector<16x128xf32>, i32 -> vector<16x128xf32>
    %c0_6 = arith.constant 0 : index
    %c0_7 = arith.constant 0 : index
    %c0_8 = arith.constant 0 : index
    %9 = vector.load %arg5[%c0_6, %c0_7, %c0_8] : memref<9x1x128xf32, #tpu.memory_space<vmem>>, vector<1x1x128xf32>
    %10 = vector.shape_cast %9 : vector<1x1x128xf32> to vector<1x128xf32>
    %11 = vector.broadcast %10 : vector<1x128xf32> to vector<8x128xf32>
    %12 = arith.mulf %7, %11 : vector<8x128xf32>
    %13 = arith.truncf %12 : vector<8x128xf32> to vector<8x128xbf16>
    %14 = vector.broadcast %10 : vector<1x128xf32> to vector<16x128xf32>
    %15 = arith.mulf %8, %14 : vector<16x128xf32>
    %16 = arith.truncf %15 : vector<16x128xf32> to vector<16x128xbf16>
    %c0_9 = arith.constant 0 : index
    %c0_10 = arith.constant 0 : index
    %c0_11 = arith.constant 0 : index
    %17 = vector.load %arg2[%c0_9, %c0_10, %c0_11] : memref<9x64x8xbf16, #tpu.memory_space<vmem>>, vector<1x64x8xbf16>
    %18 = vector.shape_cast %17 : vector<1x64x8xbf16> to vector<64x8xbf16>
    %cst_12 = arith.constant dense<0.000000e+00> : vector<64x128xf32>
    %19 = tpu.matmul %18, %13, %cst_12 {dimension_numbers = #tpu.dot_dimension_numbers<[1], [0], [0], [1], [0, 0, 1, 1], [], []>} : vector<64x8xbf16>, vector<8x128xbf16>, vector<64x128xf32> -> vector<64x128xf32>
    %20 = arith.addf %6, %19 : vector<64x128xf32>
    %c0_13 = arith.constant 0 : index
    %c0_14 = arith.constant 0 : index
    %c0_15 = arith.constant 0 : index
    %21 = vector.load %arg3[%c0_13, %c0_14, %c0_15] : memref<9x64x16xbf16, #tpu.memory_space<vmem>>, vector<1x64x16xbf16>
    %22 = vector.shape_cast %21 : vector<1x64x16xbf16> to vector<64x16xbf16>
    %cst_16 = arith.constant dense<0.000000e+00> : vector<64x128xf32>
    %23 = tpu.matmul %22, %16, %cst_16 {dimension_numbers = #tpu.dot_dimension_numbers<[1], [0], [0], [1], [0, 0, 1, 1], [], []>} : vector<64x16xbf16>, vector<16x128xbf16>, vector<64x128xf32> -> vector<64x128xf32>
    %24 = arith.addf %20, %23 : vector<64x128xf32>
    %c8_i32 = arith.constant 8 : i32
    %25 = tpu.dynamic_rotate %4 by %c8_i32 dim 1 : vector<8x128xf32>, i32 -> vector<8x128xf32>
    %c8_i32_17 = arith.constant 8 : i32
    %26 = tpu.dynamic_rotate %5 by %c8_i32_17 dim 1 : vector<16x128xf32>, i32 -> vector<16x128xf32>
    %c1 = arith.constant 1 : index
    %c0_18 = arith.constant 0 : index
    %c0_19 = arith.constant 0 : index
    %27 = vector.load %arg5[%c1, %c0_18, %c0_19] : memref<9x1x128xf32, #tpu.memory_space<vmem>>, vector<1x1x128xf32>
    %28 = vector.shape_cast %27 : vector<1x1x128xf32> to vector<1x128xf32>
    %29 = vector.broadcast %28 : vector<1x128xf32> to vector<8x128xf32>
    %30 = arith.mulf %25, %29 : vector<8x128xf32>
    %31 = arith.truncf %30 : vector<8x128xf32> to vector<8x128xbf16>
    %32 = vector.broadcast %28 : vector<1x128xf32> to vector<16x128xf32>
    %33 = arith.mulf %26, %32 : vector<16x128xf32>
    %34 = arith.truncf %33 : vector<16x128xf32> to vector<16x128xbf16>
    %c1_20 = arith.constant 1 : index
    %c0_21 = arith.constant 0 : index
    %c0_22 = arith.constant 0 : index
    %35 = vector.load %arg2[%c1_20, %c0_21, %c0_22] : memref<9x64x8xbf16, #tpu.memory_space<vmem>>, vector<1x64x8xbf16>
    %36 = vector.shape_cast %35 : vector<1x64x8xbf16> to vector<64x8xbf16>
    %cst_23 = arith.constant dense<0.000000e+00> : vector<64x128xf32>
    %37 = tpu.matmul %36, %31, %cst_23 {dimension_numbers = #tpu.dot_dimension_numbers<[1], [0], [0], [1], [0, 0, 1, 1], [], []>} : vector<64x8xbf16>, vector<8x128xbf16>, vector<64x128xf32> -> vector<64x128xf32>
    %38 = arith.addf %24, %37 : vector<64x128xf32>
    %c1_24 = arith.constant 1 : index
    %c0_25 = arith.constant 0 : index
    %c0_26 = arith.constant 0 : index
    %39 = vector.load %arg3[%c1_24, %c0_25, %c0_26] : memref<9x64x16xbf16, #tpu.memory_space<vmem>>, vector<1x64x16xbf16>
    %40 = vector.shape_cast %39 : vector<1x64x16xbf16> to vector<64x16xbf16>
    %cst_27 = arith.constant dense<0.000000e+00> : vector<64x128xf32>
    %41 = tpu.matmul %40, %34, %cst_27 {dimension_numbers = #tpu.dot_dimension_numbers<[1], [0], [0], [1], [0, 0, 1, 1], [], []>} : vector<64x16xbf16>, vector<16x128xbf16>, vector<64x128xf32> -> vector<64x128xf32>
    %42 = arith.addf %38, %41 : vector<64x128xf32>
    %c7_i32 = arith.constant 7 : i32
    %43 = tpu.dynamic_rotate %4 by %c7_i32 dim 1 : vector<8x128xf32>, i32 -> vector<8x128xf32>
    %c7_i32_28 = arith.constant 7 : i32
    %44 = tpu.dynamic_rotate %5 by %c7_i32_28 dim 1 : vector<16x128xf32>, i32 -> vector<16x128xf32>
    %c2 = arith.constant 2 : index
    %c0_29 = arith.constant 0 : index
    %c0_30 = arith.constant 0 : index
    %45 = vector.load %arg5[%c2, %c0_29, %c0_30] : memref<9x1x128xf32, #tpu.memory_space<vmem>>, vector<1x1x128xf32>
    %46 = vector.shape_cast %45 : vector<1x1x128xf32> to vector<1x128xf32>
    %47 = vector.broadcast %46 : vector<1x128xf32> to vector<8x128xf32>
    %48 = arith.mulf %43, %47 : vector<8x128xf32>
    %49 = arith.truncf %48 : vector<8x128xf32> to vector<8x128xbf16>
    %50 = vector.broadcast %46 : vector<1x128xf32> to vector<16x128xf32>
    %51 = arith.mulf %44, %50 : vector<16x128xf32>
    %52 = arith.truncf %51 : vector<16x128xf32> to vector<16x128xbf16>
    %c2_31 = arith.constant 2 : index
    %c0_32 = arith.constant 0 : index
    %c0_33 = arith.constant 0 : index
    %53 = vector.load %arg2[%c2_31, %c0_32, %c0_33] : memref<9x64x8xbf16, #tpu.memory_space<vmem>>, vector<1x64x8xbf16>
    %54 = vector.shape_cast %53 : vector<1x64x8xbf16> to vector<64x8xbf16>
    %cst_34 = arith.constant dense<0.000000e+00> : vector<64x128xf32>
    %55 = tpu.matmul %54, %49, %cst_34 {dimension_numbers = #tpu.dot_dimension_numbers<[1], [0], [0], [1], [0, 0, 1, 1], [], []>} : vector<64x8xbf16>, vector<8x128xbf16>, vector<64x128xf32> -> vector<64x128xf32>
    %56 = arith.addf %42, %55 : vector<64x128xf32>
    %c2_35 = arith.constant 2 : index
    %c0_36 = arith.constant 0 : index
    %c0_37 = arith.constant 0 : index
    %57 = vector.load %arg3[%c2_35, %c0_36, %c0_37] : memref<9x64x16xbf16, #tpu.memory_space<vmem>>, vector<1x64x16xbf16>
    %58 = vector.shape_cast %57 : vector<1x64x16xbf16> to vector<64x16xbf16>
    %cst_38 = arith.constant dense<0.000000e+00> : vector<64x128xf32>
    %59 = tpu.matmul %58, %52, %cst_38 {dimension_numbers = #tpu.dot_dimension_numbers<[1], [0], [0], [1], [0, 0, 1, 1], [], []>} : vector<64x16xbf16>, vector<16x128xbf16>, vector<64x128xf32> -> vector<64x128xf32>
    %60 = arith.addf %56, %59 : vector<64x128xf32>
    %c1_i32 = arith.constant 1 : i32
    %61 = tpu.dynamic_rotate %4 by %c1_i32 dim 1 : vector<8x128xf32>, i32 -> vector<8x128xf32>
    %c1_i32_39 = arith.constant 1 : i32
    %62 = tpu.dynamic_rotate %5 by %c1_i32_39 dim 1 : vector<16x128xf32>, i32 -> vector<16x128xf32>
    %c3 = arith.constant 3 : index
    %c0_40 = arith.constant 0 : index
    %c0_41 = arith.constant 0 : index
    %63 = vector.load %arg5[%c3, %c0_40, %c0_41] : memref<9x1x128xf32, #tpu.memory_space<vmem>>, vector<1x1x128xf32>
    %64 = vector.shape_cast %63 : vector<1x1x128xf32> to vector<1x128xf32>
    %65 = vector.broadcast %64 : vector<1x128xf32> to vector<8x128xf32>
    %66 = arith.mulf %61, %65 : vector<8x128xf32>
    %67 = arith.truncf %66 : vector<8x128xf32> to vector<8x128xbf16>
    %68 = vector.broadcast %64 : vector<1x128xf32> to vector<16x128xf32>
    %69 = arith.mulf %62, %68 : vector<16x128xf32>
    %70 = arith.truncf %69 : vector<16x128xf32> to vector<16x128xbf16>
    %c3_42 = arith.constant 3 : index
    %c0_43 = arith.constant 0 : index
    %c0_44 = arith.constant 0 : index
    %71 = vector.load %arg2[%c3_42, %c0_43, %c0_44] : memref<9x64x8xbf16, #tpu.memory_space<vmem>>, vector<1x64x8xbf16>
    %72 = vector.shape_cast %71 : vector<1x64x8xbf16> to vector<64x8xbf16>
    %cst_45 = arith.constant dense<0.000000e+00> : vector<64x128xf32>
    %73 = tpu.matmul %72, %67, %cst_45 {dimension_numbers = #tpu.dot_dimension_numbers<[1], [0], [0], [1], [0, 0, 1, 1], [], []>} : vector<64x8xbf16>, vector<8x128xbf16>, vector<64x128xf32> -> vector<64x128xf32>
    %74 = arith.addf %60, %73 : vector<64x128xf32>
    %c3_46 = arith.constant 3 : index
    %c0_47 = arith.constant 0 : index
    %c0_48 = arith.constant 0 : index
    %75 = vector.load %arg3[%c3_46, %c0_47, %c0_48] : memref<9x64x16xbf16, #tpu.memory_space<vmem>>, vector<1x64x16xbf16>
    %76 = vector.shape_cast %75 : vector<1x64x16xbf16> to vector<64x16xbf16>
    %cst_49 = arith.constant dense<0.000000e+00> : vector<64x128xf32>
    %77 = tpu.matmul %76, %70, %cst_49 {dimension_numbers = #tpu.dot_dimension_numbers<[1], [0], [0], [1], [0, 0, 1, 1], [], []>} : vector<64x16xbf16>, vector<16x128xbf16>, vector<64x128xf32> -> vector<64x128xf32>
    %78 = arith.addf %74, %77 : vector<64x128xf32>
    %c4 = arith.constant 4 : index
    %c0_50 = arith.constant 0 : index
    %c0_51 = arith.constant 0 : index
    %79 = vector.load %arg5[%c4, %c0_50, %c0_51] : memref<9x1x128xf32, #tpu.memory_space<vmem>>, vector<1x1x128xf32>
    %80 = vector.shape_cast %79 : vector<1x1x128xf32> to vector<1x128xf32>
    %81 = vector.broadcast %80 : vector<1x128xf32> to vector<8x128xf32>
    %82 = arith.mulf %4, %81 : vector<8x128xf32>
    %83 = arith.truncf %82 : vector<8x128xf32> to vector<8x128xbf16>
    %84 = vector.broadcast %80 : vector<1x128xf32> to vector<16x128xf32>
    %85 = arith.mulf %5, %84 : vector<16x128xf32>
    %86 = arith.truncf %85 : vector<16x128xf32> to vector<16x128xbf16>
    %c4_52 = arith.constant 4 : index
    %c0_53 = arith.constant 0 : index
    %c0_54 = arith.constant 0 : index
    %87 = vector.load %arg2[%c4_52, %c0_53, %c0_54] : memref<9x64x8xbf16, #tpu.memory_space<vmem>>, vector<1x64x8xbf16>
    %88 = vector.shape_cast %87 : vector<1x64x8xbf16> to vector<64x8xbf16>
    %cst_55 = arith.constant dense<0.000000e+00> : vector<64x128xf32>
    %89 = tpu.matmul %88, %83, %cst_55 {dimension_numbers = #tpu.dot_dimension_numbers<[1], [0], [0], [1], [0, 0, 1, 1], [], []>} : vector<64x8xbf16>, vector<8x128xbf16>, vector<64x128xf32> -> vector<64x128xf32>
    %90 = arith.addf %78, %89 : vector<64x128xf32>
    %c4_56 = arith.constant 4 : index
    %c0_57 = arith.constant 0 : index
    %c0_58 = arith.constant 0 : index
    %91 = vector.load %arg3[%c4_56, %c0_57, %c0_58] : memref<9x64x16xbf16, #tpu.memory_space<vmem>>, vector<1x64x16xbf16>
    %92 = vector.shape_cast %91 : vector<1x64x16xbf16> to vector<64x16xbf16>
    %cst_59 = arith.constant dense<0.000000e+00> : vector<64x128xf32>
    %93 = tpu.matmul %92, %86, %cst_59 {dimension_numbers = #tpu.dot_dimension_numbers<[1], [0], [0], [1], [0, 0, 1, 1], [], []>} : vector<64x16xbf16>, vector<16x128xbf16>, vector<64x128xf32> -> vector<64x128xf32>
    %94 = arith.addf %90, %93 : vector<64x128xf32>
    %c127_i32 = arith.constant 127 : i32
    %95 = tpu.dynamic_rotate %4 by %c127_i32 dim 1 : vector<8x128xf32>, i32 -> vector<8x128xf32>
    %c127_i32_60 = arith.constant 127 : i32
    %96 = tpu.dynamic_rotate %5 by %c127_i32_60 dim 1 : vector<16x128xf32>, i32 -> vector<16x128xf32>
    %c5 = arith.constant 5 : index
    %c0_61 = arith.constant 0 : index
    %c0_62 = arith.constant 0 : index
    %97 = vector.load %arg5[%c5, %c0_61, %c0_62] : memref<9x1x128xf32, #tpu.memory_space<vmem>>, vector<1x1x128xf32>
    %98 = vector.shape_cast %97 : vector<1x1x128xf32> to vector<1x128xf32>
    %99 = vector.broadcast %98 : vector<1x128xf32> to vector<8x128xf32>
    %100 = arith.mulf %95, %99 : vector<8x128xf32>
    %101 = arith.truncf %100 : vector<8x128xf32> to vector<8x128xbf16>
    %102 = vector.broadcast %98 : vector<1x128xf32> to vector<16x128xf32>
    %103 = arith.mulf %96, %102 : vector<16x128xf32>
    %104 = arith.truncf %103 : vector<16x128xf32> to vector<16x128xbf16>
    %c5_63 = arith.constant 5 : index
    %c0_64 = arith.constant 0 : index
    %c0_65 = arith.constant 0 : index
    %105 = vector.load %arg2[%c5_63, %c0_64, %c0_65] : memref<9x64x8xbf16, #tpu.memory_space<vmem>>, vector<1x64x8xbf16>
    %106 = vector.shape_cast %105 : vector<1x64x8xbf16> to vector<64x8xbf16>
    %cst_66 = arith.constant dense<0.000000e+00> : vector<64x128xf32>
    %107 = tpu.matmul %106, %101, %cst_66 {dimension_numbers = #tpu.dot_dimension_numbers<[1], [0], [0], [1], [0, 0, 1, 1], [], []>} : vector<64x8xbf16>, vector<8x128xbf16>, vector<64x128xf32> -> vector<64x128xf32>
    %108 = arith.addf %94, %107 : vector<64x128xf32>
    %c5_67 = arith.constant 5 : index
    %c0_68 = arith.constant 0 : index
    %c0_69 = arith.constant 0 : index
    %109 = vector.load %arg3[%c5_67, %c0_68, %c0_69] : memref<9x64x16xbf16, #tpu.memory_space<vmem>>, vector<1x64x16xbf16>
    %110 = vector.shape_cast %109 : vector<1x64x16xbf16> to vector<64x16xbf16>
    %cst_70 = arith.constant dense<0.000000e+00> : vector<64x128xf32>
    %111 = tpu.matmul %110, %104, %cst_70 {dimension_numbers = #tpu.dot_dimension_numbers<[1], [0], [0], [1], [0, 0, 1, 1], [], []>} : vector<64x16xbf16>, vector<16x128xbf16>, vector<64x128xf32> -> vector<64x128xf32>
    %112 = arith.addf %108, %111 : vector<64x128xf32>
    %c121_i32 = arith.constant 121 : i32
    %113 = tpu.dynamic_rotate %4 by %c121_i32 dim 1 : vector<8x128xf32>, i32 -> vector<8x128xf32>
    %c121_i32_71 = arith.constant 121 : i32
    %114 = tpu.dynamic_rotate %5 by %c121_i32_71 dim 1 : vector<16x128xf32>, i32 -> vector<16x128xf32>
    %c6 = arith.constant 6 : index
    %c0_72 = arith.constant 0 : index
    %c0_73 = arith.constant 0 : index
    %115 = vector.load %arg5[%c6, %c0_72, %c0_73] : memref<9x1x128xf32, #tpu.memory_space<vmem>>, vector<1x1x128xf32>
    %116 = vector.shape_cast %115 : vector<1x1x128xf32> to vector<1x128xf32>
    %117 = vector.broadcast %116 : vector<1x128xf32> to vector<8x128xf32>
    %118 = arith.mulf %113, %117 : vector<8x128xf32>
    %119 = arith.truncf %118 : vector<8x128xf32> to vector<8x128xbf16>
    %120 = vector.broadcast %116 : vector<1x128xf32> to vector<16x128xf32>
    %121 = arith.mulf %114, %120 : vector<16x128xf32>
    %122 = arith.truncf %121 : vector<16x128xf32> to vector<16x128xbf16>
    %c6_74 = arith.constant 6 : index
    %c0_75 = arith.constant 0 : index
    %c0_76 = arith.constant 0 : index
    %123 = vector.load %arg2[%c6_74, %c0_75, %c0_76] : memref<9x64x8xbf16, #tpu.memory_space<vmem>>, vector<1x64x8xbf16>
    %124 = vector.shape_cast %123 : vector<1x64x8xbf16> to vector<64x8xbf16>
    %cst_77 = arith.constant dense<0.000000e+00> : vector<64x128xf32>
    %125 = tpu.matmul %124, %119, %cst_77 {dimension_numbers = #tpu.dot_dimension_numbers<[1], [0], [0], [1], [0, 0, 1, 1], [], []>} : vector<64x8xbf16>, vector<8x128xbf16>, vector<64x128xf32> -> vector<64x128xf32>
    %126 = arith.addf %112, %125 : vector<64x128xf32>
    %c6_78 = arith.constant 6 : index
    %c0_79 = arith.constant 0 : index
    %c0_80 = arith.constant 0 : index
    %127 = vector.load %arg3[%c6_78, %c0_79, %c0_80] : memref<9x64x16xbf16, #tpu.memory_space<vmem>>, vector<1x64x16xbf16>
    %128 = vector.shape_cast %127 : vector<1x64x16xbf16> to vector<64x16xbf16>
    %cst_81 = arith.constant dense<0.000000e+00> : vector<64x128xf32>
    %129 = tpu.matmul %128, %122, %cst_81 {dimension_numbers = #tpu.dot_dimension_numbers<[1], [0], [0], [1], [0, 0, 1, 1], [], []>} : vector<64x16xbf16>, vector<16x128xbf16>, vector<64x128xf32> -> vector<64x128xf32>
    %130 = arith.addf %126, %129 : vector<64x128xf32>
    %c120_i32 = arith.constant 120 : i32
    %131 = tpu.dynamic_rotate %4 by %c120_i32 dim 1 : vector<8x128xf32>, i32 -> vector<8x128xf32>
    %c120_i32_82 = arith.constant 120 : i32
    %132 = tpu.dynamic_rotate %5 by %c120_i32_82 dim 1 : vector<16x128xf32>, i32 -> vector<16x128xf32>
    %c7 = arith.constant 7 : index
    %c0_83 = arith.constant 0 : index
    %c0_84 = arith.constant 0 : index
    %133 = vector.load %arg5[%c7, %c0_83, %c0_84] : memref<9x1x128xf32, #tpu.memory_space<vmem>>, vector<1x1x128xf32>
    %134 = vector.shape_cast %133 : vector<1x1x128xf32> to vector<1x128xf32>
    %135 = vector.broadcast %134 : vector<1x128xf32> to vector<8x128xf32>
    %136 = arith.mulf %131, %135 : vector<8x128xf32>
    %137 = arith.truncf %136 : vector<8x128xf32> to vector<8x128xbf16>
    %138 = vector.broadcast %134 : vector<1x128xf32> to vector<16x128xf32>
    %139 = arith.mulf %132, %138 : vector<16x128xf32>
    %140 = arith.truncf %139 : vector<16x128xf32> to vector<16x128xbf16>
    %c7_85 = arith.constant 7 : index
    %c0_86 = arith.constant 0 : index
    %c0_87 = arith.constant 0 : index
    %141 = vector.load %arg2[%c7_85, %c0_86, %c0_87] : memref<9x64x8xbf16, #tpu.memory_space<vmem>>, vector<1x64x8xbf16>
    %142 = vector.shape_cast %141 : vector<1x64x8xbf16> to vector<64x8xbf16>
    %cst_88 = arith.constant dense<0.000000e+00> : vector<64x128xf32>
    %143 = tpu.matmul %142, %137, %cst_88 {dimension_numbers = #tpu.dot_dimension_numbers<[1], [0], [0], [1], [0, 0, 1, 1], [], []>} : vector<64x8xbf16>, vector<8x128xbf16>, vector<64x128xf32> -> vector<64x128xf32>
    %144 = arith.addf %130, %143 : vector<64x128xf32>
    %c7_89 = arith.constant 7 : index
    %c0_90 = arith.constant 0 : index
    %c0_91 = arith.constant 0 : index
    %145 = vector.load %arg3[%c7_89, %c0_90, %c0_91] : memref<9x64x16xbf16, #tpu.memory_space<vmem>>, vector<1x64x16xbf16>
    %146 = vector.shape_cast %145 : vector<1x64x16xbf16> to vector<64x16xbf16>
    %cst_92 = arith.constant dense<0.000000e+00> : vector<64x128xf32>
    %147 = tpu.matmul %146, %140, %cst_92 {dimension_numbers = #tpu.dot_dimension_numbers<[1], [0], [0], [1], [0, 0, 1, 1], [], []>} : vector<64x16xbf16>, vector<16x128xbf16>, vector<64x128xf32> -> vector<64x128xf32>
    %148 = arith.addf %144, %147 : vector<64x128xf32>
    %c119_i32 = arith.constant 119 : i32
    %149 = tpu.dynamic_rotate %4 by %c119_i32 dim 1 : vector<8x128xf32>, i32 -> vector<8x128xf32>
    %c119_i32_93 = arith.constant 119 : i32
    %150 = tpu.dynamic_rotate %5 by %c119_i32_93 dim 1 : vector<16x128xf32>, i32 -> vector<16x128xf32>
    %c8 = arith.constant 8 : index
    %c0_94 = arith.constant 0 : index
    %c0_95 = arith.constant 0 : index
    %151 = vector.load %arg5[%c8, %c0_94, %c0_95] : memref<9x1x128xf32, #tpu.memory_space<vmem>>, vector<1x1x128xf32>
    %152 = vector.shape_cast %151 : vector<1x1x128xf32> to vector<1x128xf32>
    %153 = vector.broadcast %152 : vector<1x128xf32> to vector<8x128xf32>
    %154 = arith.mulf %149, %153 : vector<8x128xf32>
    %155 = arith.truncf %154 : vector<8x128xf32> to vector<8x128xbf16>
    %156 = vector.broadcast %152 : vector<1x128xf32> to vector<16x128xf32>
    %157 = arith.mulf %150, %156 : vector<16x128xf32>
    %158 = arith.truncf %157 : vector<16x128xf32> to vector<16x128xbf16>
    %c8_96 = arith.constant 8 : index
    %c0_97 = arith.constant 0 : index
    %c0_98 = arith.constant 0 : index
    %159 = vector.load %arg2[%c8_96, %c0_97, %c0_98] : memref<9x64x8xbf16, #tpu.memory_space<vmem>>, vector<1x64x8xbf16>
    %160 = vector.shape_cast %159 : vector<1x64x8xbf16> to vector<64x8xbf16>
    %cst_99 = arith.constant dense<0.000000e+00> : vector<64x128xf32>
    %161 = tpu.matmul %160, %155, %cst_99 {dimension_numbers = #tpu.dot_dimension_numbers<[1], [0], [0], [1], [0, 0, 1, 1], [], []>} : vector<64x8xbf16>, vector<8x128xbf16>, vector<64x128xf32> -> vector<64x128xf32>
    %162 = arith.addf %148, %161 : vector<64x128xf32>
    %c8_100 = arith.constant 8 : index
    %c0_101 = arith.constant 0 : index
    %c0_102 = arith.constant 0 : index
    %163 = vector.load %arg3[%c8_100, %c0_101, %c0_102] : memref<9x64x16xbf16, #tpu.memory_space<vmem>>, vector<1x64x16xbf16>
    %164 = vector.shape_cast %163 : vector<1x64x16xbf16> to vector<64x16xbf16>
    %cst_103 = arith.constant dense<0.000000e+00> : vector<64x128xf32>
    %165 = tpu.matmul %164, %158, %cst_103 {dimension_numbers = #tpu.dot_dimension_numbers<[1], [0], [0], [1], [0, 0, 1, 1], [], []>} : vector<64x16xbf16>, vector<16x128xbf16>, vector<64x128xf32> -> vector<64x128xf32>
    %166 = arith.addf %162, %165 : vector<64x128xf32>
    %c0_104 = arith.constant 0 : index
    %c0_105 = arith.constant 0 : index
    %167 = vector.load %arg4[%c0_104, %c0_105] : memref<64x1xf32, #tpu.memory_space<vmem>>, vector<64x1xf32>
    %168 = vector.broadcast %167 : vector<64x1xf32> to vector<64x128xf32>
    %169 = arith.addf %166, %168 : vector<64x128xf32>
    %170 = vector.extract_strided_slice %169 {offsets = [0, 0], sizes = [16, 128], strides = [1, 1]} : vector<64x128xf32> to vector<16x128xf32>
    %171 = arith.negf %170 : vector<16x128xf32>
    %172 = math.exp %171 : vector<16x128xf32>
    %cst_106 = arith.constant 1.000000e+00 : f32
    %173 = vector.broadcast %cst_106 : f32 to vector<16x128xf32>
    %174 = arith.addf %173, %172 : vector<16x128xf32>
    %175 = arith.divf %173, %174 : vector<16x128xf32>
    %176 = vector.extract_strided_slice %169 {offsets = [16, 0], sizes = [16, 128], strides = [1, 1]} : vector<64x128xf32> to vector<16x128xf32>
    %177 = arith.negf %176 : vector<16x128xf32>
    %178 = math.exp %177 : vector<16x128xf32>
    %cst_107 = arith.constant 1.000000e+00 : f32
    %179 = vector.broadcast %cst_107 : f32 to vector<16x128xf32>
    %180 = arith.addf %179, %178 : vector<16x128xf32>
    %181 = arith.divf %179, %180 : vector<16x128xf32>
    %182 = vector.extract_strided_slice %169 {offsets = [32, 0], sizes = [16, 128], strides = [1, 1]} : vector<64x128xf32> to vector<16x128xf32>
    %183 = math.tanh %182 : vector<16x128xf32>
    %184 = vector.extract_strided_slice %169 {offsets = [48, 0], sizes = [16, 128], strides = [1, 1]} : vector<64x128xf32> to vector<16x128xf32>
    %185 = arith.negf %184 : vector<16x128xf32>
    %186 = math.exp %185 : vector<16x128xf32>
    %cst_108 = arith.constant 1.000000e+00 : f32
    %187 = vector.broadcast %cst_108 : f32 to vector<16x128xf32>
    %188 = arith.addf %187, %186 : vector<16x128xf32>
    %189 = arith.divf %187, %188 : vector<16x128xf32>
    %c0_109 = arith.constant 0 : index
    %c0_110 = arith.constant 0 : index
    %190 = vector.load %arg8[%c0_109, %c0_110] : memref<16x128xf32, #tpu.memory_space<vmem>>, vector<16x128xf32>
    %191 = arith.mulf %181, %190 : vector<16x128xf32>
    %192 = arith.mulf %175, %183 : vector<16x128xf32>
    %193 = arith.addf %191, %192 : vector<16x128xf32>
    %194 = math.tanh %193 : vector<16x128xf32>
    %195 = arith.mulf %189, %194 : vector<16x128xf32>
    %c0_111 = arith.constant 0 : index
    %c0_112 = arith.constant 0 : index
    %196 = vector.load %arg8[%c0_111, %c0_112] : memref<16x128xf32, #tpu.memory_space<vmem>>, vector<16x128xf32>
    tpu.vector_store %arg8[%c0_111, %c0_112], %193 {strides = array<i32>} : memref<16x128xf32, #tpu.memory_space<vmem>>, vector<16x128xf32>,
    %c0_113 = arith.constant 0 : index
    %c0_114 = arith.constant 0 : index
    %197 = vector.load %arg7[%c0_113, %c0_114] : memref<16x128xf32, #tpu.memory_space<vmem>>, vector<16x128xf32>
    tpu.vector_store %arg7[%c0_113, %c0_114], %195 {strides = array<i32>} : memref<16x128xf32, #tpu.memory_space<vmem>>, vector<16x128xf32>,
    %c0_115 = arith.constant 0 : index
    %c0_116 = arith.constant 0 : index
    %c0_117 = arith.constant 0 : index
    %198 = vector.load %arg6[%c0_115, %c0_116, %c0_117] : memref<1x16x128xf32, #tpu.memory_space<vmem>>, vector<1x16x128xf32>
    %199 = vector.shape_cast %198 : vector<1x16x128xf32> to vector<16x128xf32>
    %200 = vector.shape_cast %195 : vector<16x128xf32> to vector<1x16x128xf32>
    tpu.vector_store %arg6[%c0_115, %c0_116, %c0_117], %200 {strides = array<i32>} : memref<1x16x128xf32, #tpu.memory_space<vmem>>, vector<1x16x128xf32>,
    return
  }
  func.func @transform_0(%arg0: i32) -> (i32, i32, i32) {
    %c0_i32 = arith.constant 0 : i32
    %c0_i32_0 = arith.constant 0 : i32
    %c0_i32_1 = arith.constant 0 : i32
    return %arg0, %c0_i32, %c0_i32_0 : i32, i32, i32
  }
  func.func @transform_1(%arg0: i32) -> (i32, i32, i32) {
    %c0_i32 = arith.constant 0 : i32
    %c0_i32_0 = arith.constant 0 : i32
    %c0_i32_1 = arith.constant 0 : i32
    %c0_i32_2 = arith.constant 0 : i32
    return %c0_i32, %c0_i32_0, %c0_i32_1 : i32, i32, i32
  }
  func.func @transform_2(%arg0: i32) -> (i32, i32, i32) {
    %c0_i32 = arith.constant 0 : i32
    %c0_i32_0 = arith.constant 0 : i32
    %c0_i32_1 = arith.constant 0 : i32
    %c0_i32_2 = arith.constant 0 : i32
    return %c0_i32, %c0_i32_0, %c0_i32_1 : i32, i32, i32
  }
  func.func @transform_3(%arg0: i32) -> (i32, i32) {
    %c0_i32 = arith.constant 0 : i32
    %c0_i32_0 = arith.constant 0 : i32
    %c0_i32_1 = arith.constant 0 : i32
    return %c0_i32, %c0_i32_0 : i32, i32
  }
  func.func @transform_4(%arg0: i32) -> (i32, i32, i32) {
    %c0_i32 = arith.constant 0 : i32
    %c0_i32_0 = arith.constant 0 : i32
    %c0_i32_1 = arith.constant 0 : i32
    %c0_i32_2 = arith.constant 0 : i32
    return %c0_i32, %c0_i32_0, %c0_i32_1 : i32, i32, i32
  }
  func.func @transform_5(%arg0: i32) -> (i32, i32, i32) {
    %c0_i32 = arith.constant 0 : i32
    %c0_i32_0 = arith.constant 0 : i32
    %c0_i32_1 = arith.constant 0 : i32
    return %arg0, %c0_i32, %c0_i32_0 : i32, i32, i32
  }
}

</mosaic_0001>

<bundles_post_ra>
// kernel: conv_lstm_forward.3
= control target key start
LH: loop header
LB: loop body
LE: loop exit
PB: predicated region body
PF: predicated region fallthrough
CT: control target
= control target key end

     0   :  { %s2730_s18 = smov 0   ;;  %s3286_s0 = inlined_call_operand.vmem [shape: f32[4,8,128], index: 0, kind: input, shape index: {}]   ;;  %s3287_s1 = inlined_call_operand.vmem [shape: bf16[9,64,8], index: 1, kind: input, shape index: {}]   ;;  %s3288_s2 = inlined_call_operand.vmem [shape: bf16[9,64,16], index: 2, kind: input, shape index: {}]   ;;  %s3289_s3 = inlined_call_operand.vmem [shape: f32[64,1], index: 3, kind: input, shape index: {}]   ;;  %s3290_s4 = inlined_call_operand.vmem [shape: f32[9,1,128], index: 4, kind: input, shape index: {}]   ;;  %s3291_s5 = inlined_call_operand.vmem [shape: f32[4,16,128], index: 5, kind: output, shape index: {}]  }
   0x1 LB: > { %s2032_s19 = sadd.s32 4294967295, %s2688_s18   ;;  %p2036_p0 = scmp.ge.s32.totalorder %s2688_s18, 1  ;;  %s2688_s18 = sphi %s2730_s18, %s15_s18  }
   0x2   : > { %p186_p1 = scmp.lt.s32.totalorder %s2688_s18, 5 }
   0x4   : > { %p187_p2 = pnand %p2036_p0, %p186_p1 }
   0x5   : > { %p213_p3 = scmp.lt.s32.totalorder (!%p187_p2), %s2032_s19, 3  ;;  %p2040_p4 = scmp.ne.s32.totalorder (!%p187_p2), %s2032_s19, 0 }
   0x6   : > { %190 = sbr.rel (%p187_p2) target bundleno = 610 (0x262), region = 40 }
   0xb   : > { %s214_s20 = scalar_select %p213_p3, %s2032_s19, 3 }
   0xc   : > { %226 = sbr.rel (%p2040_p4) target bundleno = 22 (0x16), region = 44 }
   0xd   : > { %s2037_s21 = sshll.u32 %s214_s20, 3  ;;  %s2545_s22 = sshll.u32 %s214_s20, 4 }
   0xe   : > { %s216_s25 = scalar_lea.vmem %s3286_s0, %s2037_s21  ;;  %s2744_s28 = scalar_lea.vmem %s3291_s5, %s2545_s22 }
  0x11   : > { %v2690_v0 = vmov 0.0  }
  0x12   : > { %227 = vst [vmem:[#allocation2] sm:$0xff] %v2690_v0 }
  0x13   : > { %228 = vst [vmem:[#allocation2 + $0x8] sm:$0xff] %v2690_v0 }
  0x14   : > { %229 = vst [vmem:[#allocation3 + $0x8] sm:$0xff] %v2690_v0 }
  0x15   : > { %230 = vst [vmem:[#allocation3] sm:$0xff] %v2690_v0 }
  0x16 PF: > { %v2748_v2 = vld [vmem:[%s216_s25] sm:$0xff]  ;;  %s2691_s29 = smov 9   ;;  %s2692_s30 = smov 8   ;;  %vm360_vm0 = vcmask 1043456   ;;  %v2548_v16 = vld [vmem:[%s3287_s1 + $0x10] sm:$0xff]  ;;  %vm347_vm1 = vcmask 64512  }
  0x17   : > { %234 = vrot.lane.b32.xlu1 %v2748_v2, %s2691_s29  ;;  %s2693_s6 = smov 7   ;;  %s2694_s7 = smov 1   ;;  %v2641_v5 = vld [vmem:[%s3290_s4 + $0x1] ss:$0 sm:$0xff]  ;;  %v2642_v7 = vld [vmem:[%s3290_s4] ss:$0 sm:$0xff] }
  0x18   : > { %s2695_s8 = smov 127   ;;  %s2696_s9 = smov 121   ;;  %v2546_v17 = vld [vmem:[%s3287_s1] sm:$0xff]  ;;  %v2552_v25 = vld [vmem:[%s3288_s2 + $0x10] sm:$0xff]  ;;  %vm285_vm2 = vcmask 130048   ;;  %v2549_v39 = vld [vmem:[%s3287_s1 + $0x18] sm:$0xff] }
  0x19   : > { %v2746_v1 = vld [vmem:[#allocation2] sm:$0xff]  ;;  %s2697_s10 = smov 120   ;;  %s2698_s11 = smov 119   ;;  %v2547_v41 = vld [vmem:[%s3287_s1 + $0x8] sm:$0xff]  ;;  %v2553_v52 = vld [vmem:[%s3288_s2 + $0x18] sm:$0xff] }
  0x1a   : > { %236 = vrot.lane.b32.xlu0 %v2746_v1, %s2691_s29  ;;  %395 = vrot.lane.b32.xlu2 %v2746_v1, %s2692_s30  ;;  %v2753_v3 = vld [vmem:[#allocation2 + $0x8] sm:$0xff]  ;;  %v2550_v26 = vld [vmem:[%s3288_s2] sm:$0xff] }
  0x1b   : > { %v2643_v29 = vld [vmem:[%s3290_s4 + $0x2] ss:$0 sm:$0xff]  ;;  %v2644_v37 = vld [vmem:[%s3290_s4 + $0x3] ss:$0 sm:$0xff]  ;;  %v2645_v47 = vld [vmem:[%s3290_s4 + $0x4] ss:$0 sm:$0xff] }
  0x1c   : > { %v923_v50 = vmul.f32 %v2645_v47, %v2748_v2  ;;  %v925_v51 = vmul.f32 %v2645_v47, %v2746_v1  ;;  %v2551_v53 = vld [vmem:[%s3288_s2 + $0x8] sm:$0xff]  ;;  %v926_v54 = vmul.f32 %v2645_v47, %v2753_v3  ;;  %v2558_v59 = vld [vmem:[%s3288_s2 + $0x20] sm:$0xff]  ;;  %v2572_v47 = vld [vmem:[%s3287_s1 + $0x70] sm:$0xff] }
  0x1d   : > { %v2566_v60 = vld [vmem:[%s3288_s2 + $0x40] sm:$0xff]  ;;  %v2559_v63 = vld [vmem:[%s3288_s2 + $0x28] sm:$0xff] }
  0x1e   : > { %v924_v56 = vpack.c.bf16 %v923_v50, %v923_v50  ;;  %v927_v57 = vpack.c.bf16 %v926_v54, %v925_v51  ;;  %v2554_v61 = vld [vmem:[%s3287_s1 + $0x20] sm:$0xff]  ;;  %v2567_v0 = vld [vmem:[%s3288_s2 + $0x48] sm:$0xff] }
  0x1f   : > { %393 = vrot.lane.b32.xlu1 %v2748_v2, %s2692_s30  ;;  %v2562_v62 = vld [vmem:[%s3287_s1 + $0x40] sm:$0xff] }
  0x20   : > { %v970_v58 = vsel %vm360_vm0, %v924_v56, 0 }
  0x22   : > { %238 = vrot.lane.b32.xlu0 %v2753_v3, %s2691_s29  ;;  %397 = vrot.lane.b32.xlu2 %v2753_v3, %s2692_s30 }
  0x27   : > { %570 = vrot.lane.b32.xlu1 %v2746_v1, %s2693_s6 }
  0x2a   : > { %568 = vrot.lane.b32.xlu0 %v2748_v2, %s2693_s6  ;;  %572 = vrot.lane.b32.xlu2 %v2753_v3, %s2693_s6 }
  0x2f   : > { %745 = vrot.lane.b32.xlu1 %v2746_v1, %s2694_s7 }
  0x32   : > { %743 = vrot.lane.b32.xlu0 %v2748_v2, %s2694_s7  ;;  %747 = vrot.lane.b32.xlu2 %v2753_v3, %s2694_s7 }
  0x37   : > { %1089 = vrot.lane.b32.xlu1 %v2746_v1, %s2695_s8 }
  0x3a   : > { %1087 = vrot.lane.b32.xlu0 %v2748_v2, %s2695_s8  ;;  %1091 = vrot.lane.b32.xlu2 %v2753_v3, %s2695_s8 }
  0x3f   : > { %1264 = vrot.lane.b32.xlu1 %v2746_v1, %s2696_s9 }
  0x42   : > { %1262 = vrot.lane.b32.xlu0 %v2748_v2, %s2696_s9  ;;  %1266 = vrot.lane.b32.xlu2 %v2753_v3, %s2696_s9 }
  0x47   : > { %1439 = vrot.lane.b32.xlu1 %v2746_v1, %s2697_s10 }
  0x4a   : > { %1437 = vrot.lane.b32.xlu0 %v2748_v2, %s2697_s10  ;;  %1441 = vrot.lane.b32.xlu2 %v2753_v3, %s2697_s10 }
  0x4f   : > { %1614 = vrot.lane.b32.xlu1 %v2746_v1, %s2698_s11  ;;  %v2555_v1 = vld [vmem:[%s3287_s1 + $0x28] sm:$0xff] }
  0x52   : > { %1612 = vrot.lane.b32.xlu0 %v2748_v2, %s2698_s11  ;;  %1616 = vrot.lane.b32.xlu2 %v2753_v3, %s2698_s11  ;;  %v2563_v2 = vld [vmem:[%s3287_s1 + $0x48] sm:$0xff]  ;;  %v2646_v3 = vld [vmem:[%s3290_s4 + $0x5] ss:$0 sm:$0xff] }
  0x74   : > { %v396_v4 = vpop.permute.xlu2 %395 }
  0x75   : > { %v406_v8 = vmul.f32 %v2641_v5, %v396_v4 }
  0x7c   : > { %v398_v6 = vpop.permute.xlu2 %397 }
  0x7d   : > { %v407_v9 = vmul.f32 %v2641_v5, %v398_v6 }
  0x7f   : > { %v408_v14 = vpack.c.bf16 %v407_v9, %v406_v8  ;;  %v2568_v8 = vld [vmem:[%s3288_s2 + $0x50] sm:$0xff] }
  0x84   : > { %v573_v27 = vpop.permute.xlu2 %572 }
  0x85   : > { %v582_v30 = vmul.f32 %v2643_v29, %v573_v27  ;;  %v2569_v27 = vld [vmem:[%s3288_s2 + $0x58] sm:$0xff] }
  0x89   : > { %v235_v11 = vpop.permute.xlu1 %234 }
  0x8a   : > { %v244_v12 = vmul.f32 %v2642_v7, %v235_v11 }
  0x8c   : > { %v237_v10 = vpop.permute.xlu0 %236  ;;  %v245_v13 = vpack.c.bf16 %v244_v12, %v244_v12  ;;  %v748_v38 = vpop.permute.xlu2 %747 }
  0x8d   : > { %v246_v20 = vmul.f32 %v2642_v7, %v237_v10  ;;  %v757_v42 = vmul.f32 %v2644_v37, %v748_v38  ;;  %v2579_v38 = vld [vmem:[%s3287_s1 + $0x88] sm:$0xff] }
  0x8e   : > { %v362_v15 = vsel %vm360_vm0, %v245_v13, 0 }
  0x8f   : > { %2619 = vmatpush.bf16.msra.mxu3 %v362_v15  ;;  %371 = vmatpush.bf16.msra.mxu1 %v362_v15  ;;  %v2564_v15 = vld [vmem:[%s3287_s1 + $0x50] sm:$0xff] }
  0x91   : > { %v394_v19 = vpop.permute.xlu1 %393 }
  0x92   : > { %2079 = vmatmul.msk.bf16.vlgmr.msra.gmra.mxu3 %vm347_vm1, %v2548_v16  ;;  %v404_v22 = vmul.f32 %v2641_v5, %v394_v19  ;;  %2077 = vmatmul.msk.bf16.vlgmr.msra.gmra.mxu1 %vm347_vm1, %v2546_v17  ;;  %v2647_v17 = vld [vmem:[%s3290_s4 + $0x6] ss:$0 sm:$0xff] }
  0x93   : > { %538 = vmatpush.bf16.msrb.mxu3 %v408_v14  ;;  %v2556_v14 = vld [vmem:[%s3287_s1 + $0x30] sm:$0xff] }
  0x94   : > { %v239_v18 = vpop.permute.xlu0 %238  ;;  %v405_v23 = vpack.c.bf16 %v404_v22, %v404_v22  ;;  %v1092_v10 = vpop.permute.xlu2 %1091 }
  0x95   : > { %v247_v21 = vmul.f32 %v2642_v7, %v239_v18  ;;  %v2560_v7 = vld [vmem:[%s3288_s2 + $0x30] sm:$0xff]  ;;  %v1101_v12 = vmul.f32 %v2646_v3, %v1092_v10 }
  0x96   : > { %v451_v28 = vsel %vm360_vm0, %v405_v23, 0 }
  0x97   : > { %v248_v24 = vpack.c.bf16 %v247_v21, %v246_v20 }
  0x99   : > { %305 = vmatpush.bf16.msra.mxu0 %v248_v24  ;;  %2618 = vmatpush.bf16.msra.mxu2 %v248_v24  ;;  %v571_v32 = vpop.permute.xlu1 %570 }
  0x9a   : > { %v581_v34 = vmul.f32 %v2643_v29, %v571_v32  ;;  %v2582_v32 = vld [vmem:[%s3288_s2 + $0x80] sm:$0xff] }
  0x9c   : > { %2059 = vmatmul.msk.bf16.vlgmr.msra.gmra.mxu2 %vm285_vm2, %v2552_v25  ;;  %2057 = vmatmul.msk.bf16.vlgmr.msra.gmra.mxu0 %vm285_vm2, %v2550_v26  ;;  %v569_v31 = vpop.permute.xlu0 %568  ;;  %v583_v36 = vpack.c.bf16 %v582_v30, %v581_v34  ;;  %v1267_v19 = vpop.permute.xlu2 %1266  ;;  %v2561_v26 = vld [vmem:[%s3288_s2 + $0x38] sm:$0xff]  ;;  %v2578_v34 = vld [vmem:[%s3287_s1 + $0x80] sm:$0xff] }
  0x9d   : > { %460 = vmatpush.bf16.msrb.mxu2 %v451_v28  ;;  %v579_v33 = vmul.f32 %v2643_v29, %v569_v31  ;;  %v1276_v22 = vmul.f32 %v2647_v17, %v1267_v19  ;;  %v2557_v29 = vld [vmem:[%s3287_s1 + $0x38] sm:$0xff]  ;;  %v2574_v31 = vld [vmem:[%s3288_s2 + $0x60] sm:$0xff] }
  0x9e   : > { %713 = vmatpush.bf16.msrb.mxu1 %v583_v36  ;;  %v2565_v30 = vld [vmem:[%s3287_s1 + $0x58] sm:$0xff]  ;;  %v2583_v36 = vld [vmem:[%s3288_s2 + $0x88] sm:$0xff] }
  0x9f   : > { %v580_v35 = vpack.c.bf16 %v579_v33, %v579_v33  ;;  %v2570_v33 = vld [vmem:[%s3287_s1 + $0x60] sm:$0xff] }
  0xa1   : > { %v626_v40 = vsel %vm360_vm0, %v580_v35, 0  ;;  %v746_v44 = vpop.permute.xlu1 %745  ;;  %v2575_v35 = vld [vmem:[%s3288_s2 + $0x68] sm:$0xff] }
  0xa2   : > { %635 = vmatpush.bf16.msrb.mxu0 %v626_v40  ;;  %2080 = vmatmul.msk.bf16.gmra.mxu3 %vm347_vm1, %v2549_v39  ;;  %v756_v46 = vmul.f32 %v2644_v37, %v746_v44  ;;  %v2576_v39 = vld [vmem:[%s3288_s2 + $0x70] sm:$0xff] }
  0xa3   : > { %2078 = vmatmul.msk.bf16.gmra.mxu1 %vm347_vm1, %v2547_v41  ;;  %v2584_v40 = vld [vmem:[%s3288_s2 + $0x90] sm:$0xff] }
  0xa4   : > { %v744_v43 = vpop.permute.xlu0 %743  ;;  %v758_v49 = vpack.c.bf16 %v757_v42, %v756_v46  ;;  %1057 = vmatpush.bf16.msra.mxu1 %v927_v57  ;;  %v2648_v42 = vld [vmem:[%s3290_s4 + $0x7] ss:$0 sm:$0xff]  ;;  %v1442_v50 = vpop.permute.xlu2 %1441 }
  0xa5   : > { %v754_v45 = vmul.f32 %v2644_v37, %v744_v43  ;;  %v2571_v37 = vld [vmem:[%s3287_s1 + $0x68] sm:$0xff] }
  0xa6   : > { %888 = vmatpush.bf16.msra.mxu3 %v758_v49  ;;  %979 = vmatpush.bf16.msra.mxu0 %v970_v58 }
  0xa7   : > { %v755_v48 = vpack.c.bf16 %v754_v45, %v754_v45 }
  0xa9   : > { %v801_v55 = vsel %vm360_vm0, %v755_v48, 0  ;;  %v1090_v11 = vpop.permute.xlu1 %1089  ;;  %v2580_v48 = vld [vmem:[%s3287_s1 + $0x90] sm:$0xff] }
  0xaa   : > { %810 = vmatpush.bf16.msra.mxu2 %v801_v55  ;;  %v1100_v13 = vmul.f32 %v2646_v3, %v1090_v11 }
  0xac   : > { %2060 = vmatmul.msk.bf16.gmra.mxu2 %vm285_vm2, %v2553_v52  ;;  %2058 = vmatmul.msk.bf16.gmra.mxu0 %vm285_vm2, %v2551_v53  ;;  %v1088_v4 = vpop.permute.xlu0 %1087  ;;  %v1102_v16 = vpack.c.bf16 %v1101_v12, %v1100_v13  ;;  %v1451_v52 = vmul.f32 %v2648_v42, %v1442_v50 }
  0xad   : > { %v1098_v5 = vmul.f32 %v2646_v3, %v1088_v4  ;;  %v1617_v4 = vpop.permute.xlu2 %1616 }
  0xaf   : > { %v1099_v6 = vpack.c.bf16 %v1098_v5, %v1098_v5 }
  0xb1   : > { %v1145_v9 = vsel %vm360_vm0, %v1099_v6, 0  ;;  %v1265_v20 = vpop.permute.xlu1 %1264 }
  0xb2   : > { %2134 = vmatmul.msk.bf16.vlgmr.msrb.gmra.mxu3 %vm285_vm2, %v2558_v59  ;;  %v1275_v23 = vmul.f32 %v2647_v17, %v1265_v20 }
  0xb3   : > { %2191 = vmatmul.msk.bf16.vlgmr.msrb.gmra.mxu1 %vm285_vm2, %v2566_v60  ;;  %1232 = vmatpush.bf16.msrb.mxu3 %v1102_v16 }
  0xb4   : > { %v1263_v18 = vpop.permute.xlu0 %1262  ;;  %v1277_v25 = vpack.c.bf16 %v1276_v22, %v1275_v23 }
  0xb5   : > { %v1273_v21 = vmul.f32 %v2647_v17, %v1263_v18 }
  0xb6   : > { %1407 = vmatpush.bf16.msrb.mxu1 %v1277_v25  ;;  %v2598_v25 = vld [vmem:[%s3288_s2 + $0xc0] sm:$0xff] }
  0xb7   : > { %v1274_v24 = vpack.c.bf16 %v1273_v21, %v1273_v21 }
  0xb9   : > { %v1320_v28 = vsel %vm360_vm0, %v1274_v24, 0  ;;  %v1440_v53 = vpop.permute.xlu1 %1439  ;;  %v2590_v24 = vld [vmem:[%s3288_s2 + $0xa0] sm:$0xff] }
  0xba   : > { %v1450_v56 = vmul.f32 %v2648_v42, %v1440_v53 }
  0xbc   : > { %2106 = vmatmul.msk.bf16.vlgmr.msrb.gmra.mxu2 %vm347_vm1, %v2554_v61  ;;  %2163 = vmatmul.msk.bf16.vlgmr.msrb.gmra.mxu0 %vm347_vm1, %v2562_v62  ;;  %v1438_v43 = vpop.permute.xlu0 %1437  ;;  %v1452_v57 = vpack.c.bf16 %v1451_v52, %v1450_v56  ;;  %v2577_v62 = vld [vmem:[%s3288_s2 + $0x78] sm:$0xff] }
  0xbd   : > { %1154 = vmatpush.bf16.msrb.mxu2 %v1145_v9  ;;  %1329 = vmatpush.bf16.msrb.mxu0 %v1320_v28  ;;  %v1448_v44 = vmul.f32 %v2648_v42, %v1438_v43 }
  0xbf   : > { %v1449_v45 = vpack.c.bf16 %v1448_v44, %v1448_v44 }
  0xc1   : > { %v1495_v49 = vsel %vm360_vm0, %v1449_v45, 0  ;;  %v1615_v5 = vpop.permute.xlu1 %1614 }
  0xc2   : > { %2135 = vmatmul.msk.bf16.gmra.mxu3 %vm285_vm2, %v2559_v63  ;;  %v2585_v63 = vld [vmem:[%s3288_s2 + $0x98] sm:$0xff] }
  0xc3   : > { %2192 = vmatmul.msk.bf16.gmra.mxu1 %vm285_vm2, %v2567_v0 }
  0xc4   : > { %v1613_v3 = vpop.permute.xlu0 %1612 }
  0xcc   : > { %2107 = vmatmul.msk.bf16.gmra.mxu2 %vm347_vm1, %v2555_v1  ;;  %2164 = vmatmul.msk.bf16.gmra.mxu0 %vm347_vm1, %v2563_v2  ;;  %v2649_v2 = vld [vmem:[%s3290_s4 + $0x8] ss:$0 sm:$0xff] }
  0xcd   : > { %v1623_v6 = vmul.f32 %v2649_v2, %v1613_v3 }
  0xcf   : > { %v1624_v9 = vpack.c.bf16 %v1623_v6, %v1623_v6  ;;  %v2596_v6 = vld [vmem:[%s3287_s1 + $0xd0] sm:$0xff] }
  0xd1   : > { %v1670_v16 = vsel %vm360_vm0, %v1624_v9, 0 }
  0xd2   : > { %2136 = vmatmul.msk.bf16.gmra.mxu3 %vm285_vm2, %v2560_v7  ;;  %v1626_v7 = vmul.f32 %v2649_v2, %v1617_v4 }
  0xd3   : > { %2193 = vmatmul.msk.bf16.gmra.mxu1 %vm285_vm2, %v2568_v8  ;;  %v1625_v8 = vmul.f32 %v2649_v2, %v1615_v5  ;;  %v2588_v5 = vld [vmem:[%s3287_s1 + $0xb0] sm:$0xff] }
  0xd5   : > { %v1627_v10 = vpack.c.bf16 %v1626_v7, %v1625_v8 }
  0xdc   : > { %2108 = vmatmul.msk.bf16.gmra.mxu2 %vm347_vm1, %v2556_v14  ;;  %2165 = vmatmul.msk.bf16.gmra.mxu0 %vm347_vm1, %v2564_v15  ;;  %v2573_v14 = vld [vmem:[%s3287_s1 + $0x78] sm:$0xff] }
  0xdd   : > { %v2581_v15 = vld [vmem:[%s3287_s1 + $0x98] sm:$0xff] }
  0xe2   : > { %2137 = vmatmul.msk.bf16.gmra.mxu3 %vm285_vm2, %v2561_v26 }
  0xe3   : > { %2194 = vmatmul.msk.bf16.gmra.mxu1 %vm285_vm2, %v2569_v27 }
  0xec   : > { %2109 = vmatmul.msk.bf16.gmra.mxu2 %vm347_vm1, %v2557_v29  ;;  %2166 = vmatmul.msk.bf16.gmra.mxu0 %vm347_vm1, %v2565_v30 }
  0xf2   : > { %2248 = vmatmul.msk.bf16.vlgmr.msra.gmra.mxu3 %vm285_vm2, %v2574_v31  ;;  %v2586_v31 = vld [vmem:[%s3287_s1 + $0xa0] sm:$0xff] }
  0xf3   : > { %2305 = vmatmul.msk.bf16.vlgmr.msra.gmra.mxu1 %vm285_vm2, %v2582_v32  ;;  %1582 = vmatpush.bf16.msra.mxu3 %v1452_v57  ;;  %v2594_v32 = vld [vmem:[%s3287_s1 + $0xc0] sm:$0xff] }
  0xf4   : > { %1757 = vmatpush.bf16.msra.mxu1 %v1627_v10 }
  0xfc   : > { %2220 = vmatmul.msk.bf16.vlgmr.msra.gmra.mxu2 %vm347_vm1, %v2570_v33  ;;  %2277 = vmatmul.msk.bf16.vlgmr.msra.gmra.mxu0 %vm347_vm1, %v2578_v34 }
  0xfd   : > { %1504 = vmatpush.bf16.msra.mxu2 %v1495_v49  ;;  %1679 = vmatpush.bf16.msra.mxu0 %v1670_v16  ;;  %v2595_v49 = vld [vmem:[%s3287_s1 + $0xc8] sm:$0xff] }
 0x102   : > { %2249 = vmatmul.msk.bf16.gmra.mxu3 %vm285_vm2, %v2575_v35 }
 0x103   : > { %2306 = vmatmul.msk.bf16.gmra.mxu1 %vm285_vm2, %v2583_v36 }
 0x10c   : > { %2221 = vmatmul.msk.bf16.gmra.mxu2 %vm347_vm1, %v2571_v37  ;;  %2278 = vmatmul.msk.bf16.gmra.mxu0 %vm347_vm1, %v2579_v38 }
 0x10f   : > { %v373_v41 = vpop.f32.mrf.mxu1 }
 0x112   : > { %2250 = vmatmul.msk.bf16.gmra.mxu3 %vm285_vm2, %v2576_v39  ;;  %v2591_v39 = vld [vmem:[%s3288_s2 + $0xa8] sm:$0xff] }
 0x113   : > { %2307 = vmatmul.msk.bf16.gmra.mxu1 %vm285_vm2, %v2584_v40  ;;  %v2599_v40 = vld [vmem:[%s3288_s2 + $0xc8] sm:$0xff] }
 0x115   : > { %v383_v46 = vpop.f32.mrf.mxu3 }
 0x117   : > { %v375_v55 = vpop.f32.mrf.mxu1 }
 0x119   : > { %v307_v51 = vpop.f32.mrf.mxu0 }
 0x11a   : > { %v374_v54 = vadd.f32 %v373_v41, %v307_v51 }
 0x11c   : > { %2222 = vmatmul.msk.bf16.gmra.mxu2 %vm347_vm1, %v2572_v47  ;;  %2279 = vmatmul.msk.bf16.gmra.mxu0 %vm347_vm1, %v2580_v48  ;;  %v2587_v48 = vld [vmem:[%s3287_s1 + $0xa8] sm:$0xff] }
 0x11d   : > { %v385_v60 = vpop.f32.mrf.mxu3 }
 0x11f   : > { %v317_v58 = vpop.f32.mrf.mxu2 }
 0x120   : > { %v2955_v59 = vadd.f32 %v383_v46, %v317_v58  ;;  %v378_v1 = vpop.f32.mrf.mxu1 }
 0x121   : > { %v309_v61 = vpop.f32.mrf.mxu0 }
 0x122   : > { %v376_v0 = vadd.f32 %v375_v55, %v309_v61  ;;  %2251 = vmatmul.msk.bf16.gmra.mxu3 %vm285_vm2, %v2577_v62  ;;  %v2600_v61 = vld [vmem:[%s3288_s2 + $0xd0] sm:$0xff] }
 0x123   : > { %2308 = vmatmul.msk.bf16.gmra.mxu1 %vm285_vm2, %v2585_v63 }
 0x125   : > { %v388_v13 = vpop.f32.mrf.mxu3 }
 0x127   : > { %v319_v11 = vpop.f32.mrf.mxu2 }
 0x128   : > { %v2968_v12 = vadd.f32 %v385_v60, %v319_v11  ;;  %v380_v19 = vpop.f32.mrf.mxu1  ;;  %v2592_v60 = vld [vmem:[%s3288_s2 + $0xb0] sm:$0xff] }
 0x129   : > { %v312_v17 = vpop.f32.mrf.mxu0 }
 0x12a   : > { %v379_v18 = vadd.f32 %v378_v1, %v312_v17  ;;  %v2593_v17 = vld [vmem:[%s3288_s2 + $0xb8] sm:$0xff] }
 0x12c   : > { %2223 = vmatmul.msk.bf16.gmra.mxu2 %vm347_vm1, %v2573_v14  ;;  %2280 = vmatmul.msk.bf16.gmra.mxu0 %vm347_vm1, %v2581_v15 }
 0x12d   : > { %v390_v22 = vpop.f32.mrf.mxu3 }
 0x12f   : > { %v322_v20 = vpop.f32.mrf.mxu2 }
 0x130   : > { %v2979_v21 = vadd.f32 %v388_v13, %v322_v20  ;;  %v715_v27 = vpop.f32.mrf.mxu1 }
 0x131   : > { %v314_v23 = vpop.f32.mrf.mxu0 }
 0x132   : > { %v381_v26 = vadd.f32 %v380_v19, %v314_v23  ;;  %2362 = vmatmul.msk.bf16.vlgmr.msrb.gmra.mxu3 %vm285_vm2, %v2590_v24 }
 0x133   : > { %2419 = vmatmul.msk.bf16.vlgmr.msrb.gmra.mxu1 %vm285_vm2, %v2598_v25 }
 0x135   : > { %v540_v30 = vpop.f32.mrf.mxu3 }
 0x137   : > { %v324_v28 = vpop.f32.mrf.mxu2 }
 0x138   : > { %v2989_v29 = vadd.f32 %v390_v22, %v324_v28  ;;  %v717_v34 = vpop.f32.mrf.mxu1 }
 0x139   : > { %v637_v33 = vpop.f32.mrf.mxu0 }
 0x13c   : > { %2334 = vmatmul.msk.bf16.vlgmr.msrb.gmra.mxu2 %vm347_vm1, %v2586_v31  ;;  %2391 = vmatmul.msk.bf16.vlgmr.msrb.gmra.mxu0 %vm347_vm1, %v2594_v32 }
 0x13d   : > { %v542_v37 = vpop.f32.mrf.mxu3 }
 0x13f   : > { %v462_v35 = vpop.f32.mrf.mxu2 }
 0x140   : > { %v482_v36 = vadd.f32 %v462_v35, %v374_v54  ;;  %v720_v42 = vpop.f32.mrf.mxu1 }
 0x141   : > { %v639_v38 = vpop.f32.mrf.mxu0 }
 0x142   : > { %v560_v41 = vadd.f32 %v540_v30, %v482_v36  ;;  %2363 = vmatmul.msk.bf16.gmra.mxu3 %vm285_vm2, %v2591_v39 }
 0x143   : > { %2420 = vmatmul.msk.bf16.gmra.mxu1 %vm285_vm2, %v2599_v40 }
 0x144   : > { %v657_v43 = vadd.f32 %v637_v33, %v560_v41  ;;  %v1787_v41 = vld [vmem:[%s3289_s3] sm:$0xff] }
 0x145   : > { %v545_v47 = vpop.f32.mrf.mxu3 }
 0x146   : > { %v3007_v44 = vadd.f32 %v715_v27, %v657_v43  ;;  %v2597_v27 = vld [vmem:[%s3287_s1 + $0xd8] sm:$0xff] }
 0x147   : > { %v464_v45 = vpop.f32.mrf.mxu2 }
 0x148   : > { %v483_v46 = vadd.f32 %v464_v45, %v376_v0  ;;  %v722_v52 = vpop.f32.mrf.mxu1 }
 0x149   : > { %v642_v50 = vpop.f32.mrf.mxu0 }
 0x14a   : > { %v561_v51 = vadd.f32 %v542_v37, %v483_v46  ;;  %v2606_v37 = vld [vmem:[%s3288_s2 + $0xe0] sm:$0xff] }
 0x14c   : > { %2335 = vmatmul.msk.bf16.gmra.mxu2 %vm347_vm1, %v2587_v48  ;;  %2392 = vmatmul.msk.bf16.gmra.mxu0 %vm347_vm1, %v2595_v49  ;;  %v658_v53 = vadd.f32 %v639_v38, %v561_v51  ;;  %v2614_v38 = vld [vmem:[%s3288_s2 + $0x100] sm:$0xff] }
 0x14d   : > { %v547_v57 = vpop.f32.mrf.mxu3  ;;  %v2602_v48 = vld [vmem:[%s3287_s1 + $0xe0] sm:$0xff] }
 0x14e   : > { %v3017_v54 = vadd.f32 %v717_v34, %v658_v53  ;;  %v2610_v49 = vld [vmem:[%s3287_s1 + $0x100] sm:$0xff] }
 0x14f   : > { %v467_v55 = vpop.f32.mrf.mxu2 }
 0x150   : > { %v484_v56 = vadd.f32 %v467_v55, %v379_v18  ;;  %v725_v63 = vpop.f32.mrf.mxu1  ;;  %v2601_v18 = vld [vmem:[%s3288_s2 + $0xd8] sm:$0xff] }
 0x151   : > { %v644_v58 = vpop.f32.mrf.mxu0 }
 0x152   : > { %v562_v62 = vadd.f32 %v545_v47, %v484_v56  ;;  %2364 = vmatmul.msk.bf16.gmra.mxu3 %vm285_vm2, %v2592_v60 }
 0x153   : > { %2421 = vmatmul.msk.bf16.gmra.mxu1 %vm285_vm2, %v2600_v61  ;;  %v2607_v61 = vld [vmem:[%s3288_s2 + $0xe8] sm:$0xff] }
 0x154   : > { %v659_v0 = vadd.f32 %v642_v50, %v562_v62  ;;  %v2615_v62 = vld [vmem:[%s3288_s2 + $0x108] sm:$0xff] }
 0x155   : > { %v550_v4 = vpop.f32.mrf.mxu3 }
 0x156   : > { %v3027_v1 = vadd.f32 %v720_v42, %v659_v0  ;;  %v2699_v42 = vmov 0  }
 0x157   : > { %v469_v2 = vpop.f32.mrf.mxu2  ;;  %2638 = vset.pattern.permute.xlu0 %v2699_v42  ;;  %2639 = vset.pattern.permute.xlu1 %v2699_v42 }
 0x158   : > { %v485_v3 = vadd.f32 %v469_v2, %v381_v26  ;;  %v727_v9 = vpop.f32.mrf.mxu1  ;;  %v2589_v26 = vld [vmem:[%s3287_s1 + $0xb8] sm:$0xff]  ;;  %1797 = vperm.xlu0 %2638, %v1787_v41   ;;  %2640 = vset.pattern.permute.xlu2 %v2699_v42 }
 0x159   : > { %v647_v7 = vpop.f32.mrf.mxu0  ;;  %v2609_v41 = vld [vmem:[%s3288_s2 + $0xf8] sm:$0xff] }
 0x15a   : > { %v563_v8 = vadd.f32 %v547_v57, %v485_v3  ;;  %v2617_v42 = vld [vmem:[%s3288_s2 + $0x118] sm:$0xff] }
 0x15c   : > { %2336 = vmatmul.msk.bf16.gmra.mxu2 %vm347_vm1, %v2588_v5  ;;  %2393 = vmatmul.msk.bf16.gmra.mxu0 %vm347_vm1, %v2596_v6  ;;  %v660_v10 = vadd.f32 %v644_v58, %v563_v8  ;;  %v2603_v6 = vld [vmem:[%s3287_s1 + $0xe8] sm:$0xff] }
 0x15d   : > { %v552_v15 = vpop.f32.mrf.mxu3 }
 0x15e   : > { %v3037_v11 = vadd.f32 %v722_v52, %v660_v10 }
 0x15f   : > { %v472_v13 = vpop.f32.mrf.mxu2 }
 0x160   : > { %v486_v14 = vadd.f32 %v472_v13, %v2955_v59  ;;  %v730_v20 = vpop.f32.mrf.mxu1 }
 0x161   : > { %v649_v16 = vpop.f32.mrf.mxu0 }
 0x162   : > { %v564_v19 = vadd.f32 %v550_v4, %v486_v14  ;;  %2365 = vmatmul.msk.bf16.gmra.mxu3 %vm285_vm2, %v2593_v17 }
 0x163   : > { %2422 = vmatmul.msk.bf16.gmra.mxu1 %vm285_vm2, %v2601_v18 }
 0x164   : > { %v661_v22 = vadd.f32 %v647_v7, %v564_v19  ;;  %v2611_v7 = vld [vmem:[%s3287_s1 + $0x108] sm:$0xff]  ;;  %v2608_v19 = vld [vmem:[%s3288_s2 + $0xf0] sm:$0xff] }
 0x165   : > { %v555_v25 = vpop.f32.mrf.mxu3 }
 0x166   : > { %v3048_v23 = vadd.f32 %v725_v63, %v661_v22 }
 0x167   : > { %v474_v59 = vpop.f32.mrf.mxu2 }
 0x168   : > { %v487_v24 = vadd.f32 %v474_v59, %v2968_v12  ;;  %v732_v31 = vpop.f32.mrf.mxu1 }
 0x169   : > { %v652_v28 = vpop.f32.mrf.mxu0 }
 0x16a   : > { %v565_v30 = vadd.f32 %v552_v15, %v487_v24  ;;  %v1791_v24 = vld [vmem:[%s3289_s3 + $0x20] sm:$0xff] }
 0x16c   : > { %2337 = vmatmul.msk.bf16.gmra.mxu2 %vm347_vm1, %v2589_v26  ;;  %2394 = vmatmul.msk.bf16.gmra.mxu0 %vm347_vm1, %v2597_v27  ;;  %v662_v32 = vadd.f32 %v649_v16, %v565_v30  ;;  %v2604_v30 = vld [vmem:[%s3287_s1 + $0xf0] sm:$0xff] }
 0x16d   : > { %v557_v35 = vpop.f32.mrf.mxu3 }
 0x16e   : > { %v3059_v33 = vadd.f32 %v727_v9, %v662_v32 }
 0x16f   : > { %v477_v12 = vpop.f32.mrf.mxu2 }
 0x170   : > { %v488_v34 = vadd.f32 %v477_v12, %v2979_v21  ;;  %v1059_v40 = vpop.f32.mrf.mxu1 }
 0x171   : > { %v654_v36 = vpop.f32.mrf.mxu0 }
 0x172   : > { %v566_v39 = vadd.f32 %v555_v25, %v488_v34  ;;  %2476 = vmatmul.msk.bf16.vlgmr.msra.gmra.mxu3 %vm285_vm2, %v2606_v37 }
 0x173   : > { %2533 = vmatmul.msk.bf16.vlgmr.msra.gmra.mxu1 %vm285_vm2, %v2614_v38 }
 0x174   : > { %v663_v21 = vadd.f32 %v652_v28, %v566_v39 }
 0x175   : > { %v890_v47 = vpop.f32.mrf.mxu3 }
 0x176   : > { %v3073_v43 = vadd.f32 %v730_v20, %v663_v21  ;;  %v2616_v20 = vld [vmem:[%s3288_s2 + $0x110] sm:$0xff]  ;;  %v1794_v21 = vld [vmem:[%s3289_s3 + $0x38] sm:$0xff] }
 0x177   : > { %v479_v45 = vpop.f32.mrf.mxu2  ;;  %1832 = vperm.xlu0 %2638, %v1794_v21  }
 0x178   : > { %v489_v46 = vadd.f32 %v479_v45, %v2989_v29  ;;  %v1061_v52 = vpop.f32.mrf.mxu1  ;;  %v1788_v29 = vld [vmem:[%s3289_s3 + $0x8] sm:$0xff] }
 0x179   : > { %v981_v50 = vpop.f32.mrf.mxu0  ;;  %1802 = vperm.xlu1 %2639, %v1788_v29  }
 0x17a   : > { %v567_v51 = vadd.f32 %v557_v35, %v489_v46  ;;  %v1789_v35 = vld [vmem:[%s3289_s3 + $0x10] sm:$0xff] }
 0x17b   : > { %1807 = vperm.xlu2 %2640, %v1789_v35  }
 0x17c   : > { %2448 = vmatmul.msk.bf16.vlgmr.msra.gmra.mxu2 %vm347_vm1, %v2602_v48  ;;  %2505 = vmatmul.msk.bf16.vlgmr.msra.gmra.mxu0 %vm347_vm1, %v2610_v49  ;;  %v664_v53 = vadd.f32 %v654_v36, %v567_v51  ;;  %v2605_v51 = vld [vmem:[%s3287_s1 + $0xf8] sm:$0xff] }
 0x17d   : > { %v892_v58 = vpop.f32.mrf.mxu3 }
 0x17e   : > { %v3087_v55 = vadd.f32 %v732_v31, %v664_v53  ;;  %v2612_v31 = vld [vmem:[%s3287_s1 + $0x110] sm:$0xff] }
 0x17f   : > { %v812_v56 = vpop.f32.mrf.mxu2 }
 0x180   : > { %v832_v57 = vadd.f32 %v812_v56, %v3007_v44  ;;  %v1064_v0 = vpop.f32.mrf.mxu1 }
 0x181   : > { %v983_v60 = vpop.f32.mrf.mxu0 }
 0x182   : > { %v910_v63 = vadd.f32 %v890_v47, %v832_v57  ;;  %2477 = vmatmul.msk.bf16.gmra.mxu3 %vm285_vm2, %v2607_v61  ;;  %v1793_v57 = vld [vmem:[%s3289_s3 + $0x30] sm:$0xff] }
 0x183   : > { %2534 = vmatmul.msk.bf16.gmra.mxu1 %vm285_vm2, %v2615_v62  ;;  %1827 = vperm.xlu2 %2640, %v1793_v57  }
 0x184   : > { %v1001_v2 = vadd.f32 %v981_v50, %v910_v63 }
 0x185   : > { %v895_v5 = vpop.f32.mrf.mxu3 }
 0x186   : > { %v3098_v3 = vadd.f32 %v1059_v40, %v1001_v2 }
 0x187   : > { %v814_v44 = vpop.f32.mrf.mxu2 }
 0x188   : > { %v833_v4 = vadd.f32 %v814_v44, %v3017_v54  ;;  %v1066_v10 = vpop.f32.mrf.mxu1  ;;  %v1790_v54 = vld [vmem:[%s3289_s3 + $0x18] sm:$0xff]  ;;  %v1792_v44 = vld [vmem:[%s3289_s3 + $0x28] sm:$0xff] }
 0x189   : > { %v986_v8 = vpop.f32.mrf.mxu0  ;;  %1812 = vperm.xlu1 %2639, %v1790_v54  }
 0x18a   : > { %v911_v9 = vadd.f32 %v892_v58, %v833_v4 }
 0x18b   : > { %1822 = vperm.xlu2 %2640, %v1792_v44  }
 0x18c   : > { %2449 = vmatmul.msk.bf16.gmra.mxu2 %vm347_vm1, %v2603_v6  ;;  %2506 = vmatmul.msk.bf16.gmra.mxu0 %vm347_vm1, %v2611_v7  ;;  %v1002_v13 = vadd.f32 %v983_v60, %v911_v9 }
 0x18d   : > { %v897_v17 = vpop.f32.mrf.mxu3 }
 0x18e   : > { %v3112_v14 = vadd.f32 %v1061_v52, %v1002_v13  ;;  %v2613_v52 = vld [vmem:[%s3287_s1 + $0x118] sm:$0xff] }
 0x18f   : > { %v817_v15 = vpop.f32.mrf.mxu2 }
 0x190   : > { %v834_v16 = vadd.f32 %v817_v15, %v3027_v1  ;;  %v1069_v59 = vpop.f32.mrf.mxu1 }
 0x191   : > { %v988_v18 = vpop.f32.mrf.mxu0  ;;  %1817 = vperm.xlu1 %2639, %v1791_v24  }
 0x192   : > { %v912_v22 = vadd.f32 %v895_v5, %v834_v16  ;;  %2478 = vmatmul.msk.bf16.gmra.mxu3 %vm285_vm2, %v2608_v19 }
 0x193   : > { %2535 = vmatmul.msk.bf16.gmra.mxu1 %vm285_vm2, %v2616_v20 }
 0x194   : > { %v1003_v25 = vadd.f32 %v986_v8, %v912_v22 }
 0x195   : > { %v900_v28 = vpop.f32.mrf.mxu3 }
 0x196   : > { %v3126_v1 = vadd.f32 %v1064_v0, %v1003_v25 }
 0x197   : > { %v819_v26 = vpop.f32.mrf.mxu2 }
 0x198   : > { %v835_v27 = vadd.f32 %v819_v26, %v3037_v11  ;;  %v1071_v34 = vpop.f32.mrf.mxu1 }
 0x199   : > { %v991_v32 = vpop.f32.mrf.mxu0 }
 0x19a   : > { %v913_v12 = vadd.f32 %v897_v17, %v835_v27 }
 0x19c   : > { %2450 = vmatmul.msk.bf16.gmra.mxu2 %vm347_vm1, %v2604_v30  ;;  %2507 = vmatmul.msk.bf16.gmra.mxu0 %vm347_vm1, %v2612_v31  ;;  %v1004_v11 = vadd.f32 %v988_v18, %v913_v12 }
 0x19d   : > { %v902_v39 = vpop.f32.mrf.mxu3 }
 0x19e   : > { %v3140_v36 = vadd.f32 %v1066_v10, %v1004_v11 }
 0x19f   : > { %v822_v37 = vpop.f32.mrf.mxu2 }
 0x1a0   : > { %v836_v38 = vadd.f32 %v822_v37, %v3048_v23  ;;  %v1074_v46 = vpop.f32.mrf.mxu1 }
 0x1a1   : > { %v993_v40 = vpop.f32.mrf.mxu0 }
 0x1a2   : > { %v914_v45 = vadd.f32 %v900_v28, %v836_v38  ;;  %2479 = vmatmul.msk.bf16.gmra.mxu3 %vm285_vm2, %v2609_v41 }
 0x1a3   : > { %2536 = vmatmul.msk.bf16.gmra.mxu1 %vm285_vm2, %v2617_v42 }
 0x1a4   : > { %v1005_v47 = vadd.f32 %v991_v32, %v914_v45 }
 0x1a5   : > { %v905_v50 = vpop.f32.mrf.mxu3 }
 0x1a6   : > { %v3154_v23 = vadd.f32 %v1069_v59, %v1005_v47 }
 0x1a7   : > { %v824_v48 = vpop.f32.mrf.mxu2 }
 0x1a8   : > { %v837_v49 = vadd.f32 %v824_v48, %v3059_v33  ;;  %v1076_v56 = vpop.f32.mrf.mxu1 }
 0x1a9   : > { %v996_v29 = vpop.f32.mrf.mxu0 }
 0x1aa   : > { %v915_v53 = vadd.f32 %v902_v39, %v837_v49 }
 0x1ac   : > { %2451 = vmatmul.msk.bf16.gmra.mxu2 %vm347_vm1, %v2605_v51  ;;  %2508 = vmatmul.msk.bf16.gmra.mxu0 %vm347_vm1, %v2613_v52  ;;  %v1006_v33 = vadd.f32 %v993_v40, %v915_v53 }
 0x1ad   : > { %v907_v62 = vpop.f32.mrf.mxu3 }
 0x1ae   : > { %v3168_v58 = vadd.f32 %v1071_v34, %v1006_v33 }
 0x1af   : > { %v827_v60 = vpop.f32.mrf.mxu2 }
 0x1b0   : > { %v838_v61 = vadd.f32 %v827_v60, %v3073_v43  ;;  %v1409_v2 = vpop.f32.mrf.mxu1 }
 0x1b1   : > { %v998_v63 = vpop.f32.mrf.mxu0 }
 0x1b2   : > { %v916_v0 = vadd.f32 %v905_v50, %v838_v61 }
 0x1b4   : > { %v1007_v4 = vadd.f32 %v996_v29, %v916_v0 }
 0x1b5   : > { %v1234_v8 = vpop.f32.mrf.mxu3 }
 0x1b6   : > { %v3174_v5 = vadd.f32 %v1074_v46, %v1007_v4 }
 0x1b7   : > { %v829_v6 = vpop.f32.mrf.mxu2 }
 0x1b8   : > { %v839_v7 = vadd.f32 %v829_v6, %v3087_v55  ;;  %v1411_v54 = vpop.f32.mrf.mxu1 }
 0x1b9   : > { %v1331_v9 = vpop.f32.mrf.mxu0 }
 0x1ba   : > { %v917_v10 = vadd.f32 %v907_v62, %v839_v7 }
 0x1bc   : > { %v1008_v43 = vadd.f32 %v998_v63, %v917_v10 }
 0x1bd   : > { %v1236_v17 = vpop.f32.mrf.mxu3 }
 0x1be   : > { %v3177_v13 = vadd.f32 %v1076_v56, %v1008_v43 }
 0x1bf   : > { %v1156_v15 = vpop.f32.mrf.mxu2 }
 0x1c0   : > { %v1176_v16 = vadd.f32 %v1156_v15, %v3098_v3  ;;  %v1414_v20 = vpop.f32.mrf.mxu1 }
 0x1c1   : > { %v1333_v18 = vpop.f32.mrf.mxu0 }
 0x1c2   : > { %v1254_v19 = vadd.f32 %v1234_v8, %v1176_v16 }
 0x1c4   : > { %v1351_v22 = vadd.f32 %v1331_v9, %v1254_v19 }
 0x1c5   : > { %v1239_v55 = vpop.f32.mrf.mxu3 }
 0x1c6   : > { %v1429_v59 = vadd.f32 %v1409_v2, %v1351_v22 }
 0x1c7   : > { %v1158_v24 = vpop.f32.mrf.mxu2 }
 0x1c8   : > { %v1177_v25 = vadd.f32 %v1158_v24, %v3112_v14  ;;  %v3181_v28 = vpop.f32.mrf.mxu1 }
 0x1c9   : > { %v1336_v26 = vpop.f32.mrf.mxu0 }
 0x1ca   : > { %v1255_v27 = vadd.f32 %v1236_v17, %v1177_v25  ;;  %v1798_v0 = vpop.permute.xlu0 %1797 }
 0x1cc   : > { %v1352_v30 = vadd.f32 %v1333_v18, %v1255_v27 }
 0x1cd   : > { %v1241_v12 = vpop.f32.mrf.mxu3 }
 0x1ce   : > { %v1430_v31 = vadd.f32 %v1411_v54, %v1352_v30 }
 0x1cf   : > { %v1161_v32 = vpop.f32.mrf.mxu2 }
 0x1d0   : > { %v3183_v3 = vpop.f32.mrf.mxu1  ;;  %v1178_v61 = vadd.f32 %v1161_v32, %v3126_v1 }
 0x1d1   : > { %v1338_v34 = vpop.f32.mrf.mxu0 }
 0x1d2   : > { %v1256_v2 = vadd.f32 %v1239_v55, %v1178_v61 }
 0x1d4   : > { %v1353_v15 = vadd.f32 %v1336_v26, %v1256_v2 }
 0x1d5   : > { %v1244_v11 = vpop.f32.mrf.mxu3 }
 0x1d6   : > { %v1431_v19 = vadd.f32 %v1414_v20, %v1353_v15  ;;  %v1808_v20 = vpop.permute.xlu2 %1807 }
 0x1d7   : > { %v1163_v35 = vpop.f32.mrf.mxu2 }
 0x1d8   : > { %v3187_v38 = vpop.f32.mrf.mxu1  ;;  %v1179_v10 = vadd.f32 %v1163_v35, %v3140_v36 }
 0x1d9   : > { %v3185_v37 = vpop.f32.mrf.mxu0 }
 0x1da   : > { %v1257_v1 = vadd.f32 %v1241_v12, %v1179_v10 }
 0x1dc   : > { %v1354_v36 = vadd.f32 %v1338_v34, %v1257_v1 }
 0x1dd   : > { %v3189_v14 = vpop.f32.mrf.mxu3 }
 0x1df   : > { %v1166_v39 = vpop.f32.mrf.mxu2 }
 0x1e0   : > { %v3193_v41 = vpop.f32.mrf.mxu1  ;;  %v1180_v30 = vadd.f32 %v1166_v39, %v3154_v23 }
 0x1e1   : > { %v3191_v40 = vpop.f32.mrf.mxu0 }
 0x1e5   : > { %v3195_v21 = vpop.f32.mrf.mxu3 }
 0x1e7   : > { %v1168_v42 = vpop.f32.mrf.mxu2 }
 0x1e8   : > { %v3199_v46 = vpop.f32.mrf.mxu1  ;;  %v1181_v39 = vadd.f32 %v1168_v42, %v3168_v58 }
 0x1e9   : > { %v3197_v45 = vpop.f32.mrf.mxu0 }
 0x1ea   : > { %v1259_v58 = vadd.f32 %v3189_v14, %v1181_v39  ;;  %v3234_v14 = vpop.permute.xlu2 %1827 }
 0x1eb   : > { %v1803_v18 = vpop.permute.xlu1 %1802 }
 0x1ed   : > { %v3203_v48 = vpop.f32.mrf.mxu3 }
 0x1ef   : > { %v3201_v47 = vpop.f32.mrf.mxu2 }
 0x1f0   : > { %v1759_v51 = vpop.f32.mrf.mxu1  ;;  %v1182_v10 = vadd.f32 %v3201_v47, %v3174_v5 }
 0x1f1   : > { %v3205_v49 = vpop.f32.mrf.mxu0 }
 0x1f2   : > { %v1260_v5 = vadd.f32 %v3195_v21, %v1182_v10 }
 0x1f5   : > { %v1584_v52 = vpop.f32.mrf.mxu3 }
 0x1f7   : > { %v3207_v50 = vpop.f32.mrf.mxu2 }
 0x1f8   : > { %v1761_v60 = vpop.f32.mrf.mxu1  ;;  %v1183_v47 = vadd.f32 %v3207_v50, %v3177_v13  ;;  %v1357_v50 = vadd.f32 %v3197_v45, %v1260_v5 }
 0x1f9   : > { %v1681_v29 = vpop.f32.mrf.mxu0 }
 0x1fa   : > { %v1261_v21 = vadd.f32 %v3203_v48, %v1183_v47 }
 0x1fb   : > { %v1813_v2 = vpop.permute.xlu1 %1812 }
 0x1fd   : > { %v1586_v57 = vpop.f32.mrf.mxu3 }
 0x1ff   : > { %v1506_v53 = vpop.f32.mrf.mxu2 }
 0x200   : > { %v1526_v56 = vadd.f32 %v1506_v53, %v1429_v59  ;;  %v1764_v16 = vpop.f32.mrf.mxu1  ;;  %v1432_v53 = vadd.f32 %v3181_v28, %v1354_v36 }
 0x201   : > { %v1683_v33 = vpop.f32.mrf.mxu0 }
 0x202   : > { %v1604_v62 = vadd.f32 %v1584_v52, %v1526_v56  ;;  %v1258_v52 = vadd.f32 %v1244_v11, %v1180_v30 }
 0x204   : > { %v1701_v63 = vadd.f32 %v1681_v29, %v1604_v62  ;;  %v1355_v61 = vadd.f32 %v3185_v37, %v1258_v52 }
 0x205   : > { %v1589_v8 = vpop.f32.mrf.mxu3 }
 0x206   : > { %v1779_v44 = vadd.f32 %v1759_v51, %v1701_v63  ;;  %v1433_v42 = vadd.f32 %v3183_v3, %v1355_v61 }
 0x207   : > { %v1508_v4 = vpop.f32.mrf.mxu2 }
 0x208   : > { %v1835_v6 = vadd.f32 %v1798_v0, %v1779_v44  ;;  %v1527_v7 = vadd.f32 %v1508_v4, %v1430_v31  ;;  %v1766_v12 = vpop.f32.mrf.mxu1 }
 0x209   : > { %v1686_v9 = vpop.f32.mrf.mxu0 }
 0x20a   : > { %v2537_v54 = vmul.f32 -1.442695, %v1835_v6  ;;  %v1605_v43 = vadd.f32 %v1586_v57, %v1527_v7 }
 0x20c   : > { %2650 = vpow2.f32 %v2537_v54  ;;  %v1702_v17 = vadd.f32 %v1683_v33, %v1605_v43 }
 0x20d   : > { %v1591_v55 = vpop.f32.mrf.mxu3 }
 0x20e   : > { %v1780_v22 = vadd.f32 %v1761_v60, %v1702_v17 }
 0x20f   : > { %v1511_v59 = vpop.f32.mrf.mxu2 }
 0x210   : > { %v1528_v24 = vadd.f32 %v1511_v59, %v1431_v19  ;;  %v1836_v25 = vadd.f32 %v1803_v18, %v1780_v22  ;;  %v1769_v37 = vpop.f32.mrf.mxu1  ;;  %v1818_v22 = vpop.permute.xlu1 %1817 }
 0x211   : > { %v1688_v26 = vpop.f32.mrf.mxu0 }
 0x212   : > { %v2651_v27 = vpop.eup %2650  ;;  %v1606_v31 = vadd.f32 %v1589_v8, %v1528_v24  ;;  %v2538_v32 = vmul.f32 -1.442695, %v1836_v25 }
 0x213   : > { %v3212_v35 = vadd.f32 1.0, %v2651_v27 }
 0x214   : > { %2652 = vpow2.f32 %v2538_v32  ;;  %v1703_v51 = vadd.f32 %v1686_v9, %v1606_v31 }
 0x215   : > { %2654 = vrcp.f32 %v3212_v35  ;;  %v1594_v0 = vpop.f32.mrf.mxu3  ;;  %v1862_v13 = vand.u32 2147483648, %v3212_v35  ;;  %vm1856_vm4 = vweird.f32 %v3212_v35 }
 0x216   : > { %v1781_v29 = vadd.f32 %v1764_v16, %v1703_v51  ;;  %v1356_v16 = vadd.f32 %v3191_v40, %v1259_v58 }
 0x217   : > { %v1513_v56 = vpop.f32.mrf.mxu2  ;;  %v1863_v45 = vor.u32 1.1754944e-38, %v1862_v13  ;;  %v1960_v13 = vld [vmem:[#allocation3] sm:$0xff] }
 0x218   : > { %v1837_v57 = vadd.f32 %v1808_v20, %v1781_v29  ;;  %v1529_v33 = vadd.f32 %v1513_v56, %v1432_v53  ;;  %v1434_v59 = vadd.f32 %v3187_v38, %v1356_v16  ;;  %v1771_v36 = vpop.f32.mrf.mxu1  ;;  %v1860_v38 = vand.u32 2147483647, %v3212_v35  ;;  %v1823_v56 = vpop.permute.xlu2 %1822 }
 0x219   : > { %v1691_v44 = vpop.f32.mrf.mxu0 }
 0x21a   : > { %v2653_v23 = vpop.eup %2652  ;;  %v2539_v34 = vmul.f32 -1.442695, %v1837_v57  ;;  %v1607_v60 = vadd.f32 %v1591_v55, %v1529_v33  ;;  %v1435_v57 = vadd.f32 %v3193_v41, %v1357_v50  ;;  %vm1861_vm6 = vcmp.eq.f32.partialorder %v1860_v38, 8.507059e+37 }
 0x21b   : > { %v3218_v62 = vpop.eup %2654  ;;  %v3220_v63 = vadd.f32 1.0, %v2653_v23 }
 0x21c   : > { %v1852_v11 = vmul.f32 %v3218_v62, %v3212_v35  ;;  %2656 = vpow2.f32 %v2539_v34  ;;  %v1704_v28 = vadd.f32 %v1688_v26, %v1607_v60  ;;  %vm1857_vm3 = vweird.f32 %v3218_v62 }
 0x21d   : > { %2658 = vrcp.f32 %v3220_v63  ;;  %v1596_v40 = vpop.f32.mrf.mxu3  ;;  %vm1858_vm5 = vmor %vm1856_vm4, %vm1857_vm3  ;;  %v1358_v35 = vadd.f32 %v3205_v49, %v1261_v21  ;;  %vm1871_vm9 = vweird.f32 %v3220_v63  ;;  %v1875_v58 = vand.u32 2147483647, %v3220_v63 }
 0x21e   : > { %v1782_v4 = vadd.f32 %v1766_v12, %v1704_v28  ;;  %v1853_v7 = vsub.f32 1.0, %v1852_v11 }
 0x21f   : > { %v1516_v6 = vpop.f32.mrf.mxu2  ;;  %vm1876_vm14 = vcmp.eq.f32.partialorder %v1875_v58, 8.507059e+37 }
 0x220   : > { %v1530_v8 = vadd.f32 %v1516_v6, %v1433_v42  ;;  %v1838_v9 = vadd.f32 %v1813_v2, %v1782_v4  ;;  %v1854_v19 = vmul.f32 %v3218_v62, %v1853_v7  ;;  %v1877_v42 = vand.u32 2147483648, %v3220_v63  ;;  %v1774_v10 = vpop.f32.mrf.mxu1 }
 0x221   : > { %v1693_v55 = vpop.f32.mrf.mxu0 }
 0x222   : > { %v2657_v54 = vpop.eup %2656  ;;  %v1608_v43 = vadd.f32 %v1594_v0, %v1530_v8  ;;  %v2540_v15 = vmul.f32 -1.442695, %v1838_v9  ;;  %v1855_v32 = vadd.f32 %v3218_v62, %v1854_v19  ;;  %v1959_v9 = vld [vmem:[#allocation3 + $0x8] sm:$0xff] }
 0x223   : > { %v3230_v17 = vpop.eup %2658  ;;  %v3232_v18 = vadd.f32 1.0, %v2657_v54 }
 0x224   : > { %v1867_v3 = vmul.f32 %v3230_v17, %v3220_v63  ;;  %2660 = vpow2.f32 %v2540_v15  ;;  %v1705_v1 = vadd.f32 %v1691_v44, %v1608_v43  ;;  %v1859_v29 = vsel %vm1858_vm5, %v3218_v62, %v1855_v32 }
 0x225   : > { %2662 = vrcp.f32 %v3232_v18  ;;  %v1900_v23 = vand.u32 2147483648, %v3232_v18  ;;  %v1864_v34 = vsel %vm1861_vm6, %v1863_v45, %v1859_v29  ;;  %v1898_v60 = vand.u32 2147483647, %v3232_v18  ;;  %v1599_v61 = vpop.f32.mrf.mxu3 }
 0x226   : > { %v1783_v24 = vadd.f32 %v1769_v37, %v1705_v1  ;;  %v1868_v25 = vsub.f32 1.0, %v1867_v3  ;;  %vm1872_vm7 = vweird.f32 %v3230_v17  ;;  %vm1894_vm10 = vweird.f32 %v3232_v18 }
 0x227   : > { %v1518_v27 = vpop.f32.mrf.mxu2  ;;  %vm3267_vm11 = vmor %vm1871_vm9, %vm1872_vm7  ;;  %v1901_v8 = vor.u32 1.1754944e-38, %v1900_v23  ;;  %vm1899_vm13 = vcmp.eq.f32.partialorder %v1898_v60, 8.507059e+37  ;;  %v1436_v3 = vadd.f32 %v3199_v46, %v1358_v35 }
 0x228   : > { %v1531_v30 = vadd.f32 %v1518_v27, %v1434_v59  ;;  %v1839_v31 = vadd.f32 %v1818_v22, %v1783_v24  ;;  %v1869_v52 = vmul.f32 %v3230_v17, %v1868_v25 }
 0x229   : > { %v1696_v44 = vpop.f32.mrf.mxu0 }
 0x22a   : > { %v2661_v26 = vpop.eup %2660  ;;  %v1609_v51 = vadd.f32 %v1596_v40, %v1531_v30  ;;  %2664 = vtanh.f32 %v1839_v31  ;;  %v1870_v62 = vadd.f32 %v3230_v17, %v1869_v52 }
 0x22b   : > { %v2663_v12 = vpop.eup %2662  ;;  %v3251_v20 = vadd.f32 1.0, %v2661_v26 }
 0x22c   : > { %v1890_v48 = vmul.f32 %v2663_v12, %v3232_v18  ;;  %v1706_v53 = vadd.f32 %v1693_v55, %v1609_v51  ;;  %vm1895_vm8 = vweird.f32 %v2663_v12  ;;  %v1874_v63 = vsel %vm3267_vm11, %v3230_v17, %v1870_v62 }
 0x22d   : > { %2666 = vrcp.f32 %v3251_v20  ;;  %vm1896_vm12 = vmor %vm1894_vm10, %vm1895_vm8  ;;  %v1878_v18 = vor.u32 1.1754944e-38, %v1877_v42  ;;  %v1915_v47 = vand.u32 2147483648, %v3251_v20  ;;  %v1913_v22 = vand.u32 2147483647, %v3251_v20  ;;  %v1601_v31 = vpop.f32.mrf.mxu3 }
 0x22e   : > { %v1891_v33 = vsub.f32 1.0, %v1890_v48  ;;  %v1784_v39 = vadd.f32 %v1771_v36, %v1706_v53  ;;  %vm1909_vm0 = vweird.f32 %v3251_v20  ;;  %v1833_v48 = vpop.permute.xlu0 %1832 }
 0x22f   : > { %v1521_v0 = vpop.f32.mrf.mxu2  ;;  %v1879_v40 = vsel %vm1876_vm14, %v1878_v18, %v1874_v63  ;;  %v1916_v36 = vor.u32 1.1754944e-38, %v1915_v47  ;;  %vm1914_vm2 = vcmp.eq.f32.partialorder %v1913_v22, 8.507059e+37 }
 0x230   : > { %v2665_v2 = vpop.eup %2664  ;;  %v1892_v11 = vmul.f32 %v2663_v12, %v1891_v33  ;;  %v1840_v41 = vadd.f32 %v1823_v56, %v1784_v39  ;;  %v1532_v28 = vadd.f32 %v1521_v0, %v1435_v57 }
 0x231   : > { %v1963_v49 = vmul.f32 %v2665_v2, %v1864_v34  ;;  %v1698_v50 = vpop.f32.mrf.mxu0 }
 0x232   : > { %v1893_v4 = vadd.f32 %v2663_v12, %v1892_v11  ;;  %2668 = vtanh.f32 %v1840_v41  ;;  %v1610_v6 = vadd.f32 %v1599_v61, %v1532_v28 }
 0x233   : > { %v2667_v7 = vpop.eup %2666 }
 0x234   : > { %v1905_v54 = vmul.f32 %v2667_v7, %v3251_v20  ;;  %v1897_v43 = vsel %vm1896_vm12, %v2663_v12, %v1893_v4  ;;  %v1707_v15 = vadd.f32 %v1696_v44, %v1610_v6  ;;  %vm1910_vm15 = vweird.f32 %v2667_v7 }
 0x235   : > { %v1902_v16 = vsel %vm1899_vm13, %v1901_v8, %v1897_v43  ;;  %vm1911_vm1 = vmor %vm1909_vm0, %vm1910_vm15 }
 0x236   : > { %v1906_v1 = vsub.f32 1.0, %v1905_v54  ;;  %v1961_v19 = vmul.f32 %v1959_v9, %v1902_v16  ;;  %v1785_v5 = vadd.f32 %v1774_v10, %v1707_v15 }
 0x237   : > { %v1523_v59 = vpop.f32.mrf.mxu2 }
 0x238   : > { %v2669_v24 = vpop.eup %2668  ;;  %v1907_v25 = vmul.f32 %v2667_v7, %v1906_v1  ;;  %v1965_v55 = vadd.f32 %v1963_v49, %v1961_v19  ;;  %v1841_v17 = vadd.f32 %v3234_v14, %v1785_v5  ;;  %v1533_v27 = vadd.f32 %v1523_v59, %v1436_v3  ;;  %v1776_v14 = vpop.f32.mrf.mxu1 }
 0x239   : > { %v1964_v30 = vmul.f32 %v2669_v24, %v1879_v40 }
 0x23a   : > { %1971 = vst [vmem:[#allocation3 + $0x8] sm:$0xff] %v1965_v55  ;;  %v1908_v46 = vadd.f32 %v2667_v7, %v1907_v25  ;;  %v2541_v32 = vmul.f32 -1.442695, %v1841_v17  ;;  %v1611_v21 = vadd.f32 %v1601_v31, %v1533_v27 }
 0x23c   : > { %v1912_v26 = vsel %vm1911_vm1, %v2667_v7, %v1908_v46  ;;  %2670 = vpow2.f32 %v2541_v32  ;;  %v1708_v51 = vadd.f32 %v1698_v50, %v1611_v21 }
 0x23d   : > { %v1917_v38 = vsel %vm1914_vm2, %v1916_v36, %v1912_v26 }
 0x23e   : > { %v1962_v12 = vmul.f32 %v1960_v13, %v1917_v38  ;;  %v1786_v52 = vadd.f32 %v1776_v14, %v1708_v51 }
 0x240   : > { %v1966_v29 = vadd.f32 %v1964_v30, %v1962_v12  ;;  %v1842_v20 = vadd.f32 %v1833_v48, %v1786_v52 }
 0x242   : > { %v2671_v53 = vpop.eup %2670  ;;  %1972 = vst [vmem:[#allocation3] sm:$0xff] %v1966_v29  ;;  %v2542_v45 = vmul.f32 -1.442695, %v1842_v20 }
 0x243   : > { %v1927_v56 = vadd.f32 1.0, %v2671_v53 }
 0x244   : > { %2672 = vpow2.f32 %v2542_v45 }
 0x245   : > { %2674 = vrcp.f32 %v1927_v56  ;;  %v1940_v34 = vand.u32 2147483648, %v1927_v56  ;;  %v1938_v61 = vand.u32 2147483647, %v1927_v56  ;;  %vm1934_vm4 = vweird.f32 %v1927_v56 }
 0x247   : > { %v1941_v2 = vor.u32 1.1754944e-38, %v1940_v34  ;;  %vm1939_vm6 = vcmp.eq.f32.partialorder %v1938_v61, 8.507059e+37 }
 0x24a   : > { %v2673_v57 = vpop.eup %2672 }
 0x24b   : > { %v2675_v35 = vpop.eup %2674  ;;  %v1928_v33 = vadd.f32 1.0, %v2673_v57 }
 0x24c   : > { %v1930_v23 = vmul.f32 %v2675_v35, %v1927_v56  ;;  %vm1935_vm3 = vweird.f32 %v2675_v35 }
 0x24d   : > { %2676 = vrcp.f32 %v1928_v33  ;;  %vm1936_vm5 = vmor %vm1934_vm4, %vm1935_vm3  ;;  %v1955_v42 = vand.u32 2147483648, %v1928_v33  ;;  %v1953_v37 = vand.u32 2147483647, %v1928_v33  ;;  %vm1949_vm8 = vweird.f32 %v1928_v33 }
 0x24e   : > { %v1931_v39 = vsub.f32 1.0, %v1930_v23  ;;  %2678 = vtanh.f32 %v1965_v55 }
 0x24f   : > { %2680 = vtanh.f32 %v1966_v29  ;;  %v1956_v7 = vor.u32 1.1754944e-38, %v1955_v42  ;;  %vm1954_vm10 = vcmp.eq.f32.partialorder %v1953_v37, 8.507059e+37 }
 0x250   : > { %v1932_v60 = vmul.f32 %v2675_v35, %v1931_v39 }
 0x252   : > { %v1933_v62 = vadd.f32 %v2675_v35, %v1932_v60 }
 0x253   : > { %v2677_v0 = vpop.eup %2676 }
 0x254   : > { %v1937_v11 = vsel %vm1936_vm5, %v2675_v35, %v1933_v62  ;;  %v1945_v41 = vmul.f32 %v2677_v0, %v1928_v33  ;;  %v2679_v28 = vpop.eup %2678  ;;  %vm1950_vm7 = vweird.f32 %v2677_v0 }
 0x255   : > { %v1942_v49 = vsel %vm1939_vm6, %v1941_v2, %v1937_v11  ;;  %vm1951_vm9 = vmor %vm1949_vm8, %vm1950_vm7  ;;  %v2681_v9 = vpop.eup %2680 }
 0x256   : > { %v1969_v44 = vmul.f32 %v2679_v28, %v1942_v49  ;;  %v1946_v58 = vsub.f32 1.0, %v1945_v41 }
 0x258   : > { %1973 = vst [vmem:[#allocation2] sm:$0xff] %v1969_v44  ;;  %v1947_v4 = vmul.f32 %v2677_v0, %v1946_v58 }
 0x259   : > { %1975 = vst [vmem:[%s2744_s28] sm:$0xff] %v1969_v44 }
 0x25a   : > { %v1948_v6 = vadd.f32 %v2677_v0, %v1947_v4 }
 0x25c   : > { %v1952_v8 = vsel %vm1951_vm9, %v2677_v0, %v1948_v6 }
 0x25d   : > { %v1957_v10 = vsel %vm1954_vm10, %v1956_v7, %v1952_v8 }
 0x25e   : > { %v1970_v54 = vmul.f32 %v2681_v9, %v1957_v10 }
 0x260   : > { %1974 = vst [vmem:[#allocation2 + $0x8] sm:$0xff] %v1970_v54 }
 0x261   : > { %1976 = vst [vmem:[%s2744_s28 + $0x8] sm:$0xff] %v1970_v54 }
 0x262 PF: > { %s15_s18 = sadd.s32 1, %s2688_s18  }
 0x263   : > { %p12_p5 = scmp.ge.s32.totalorder %s15_s18, 6  }
 0x265   :  { %14 = sbr.rel (!%p12_p5) target bundleno = 1 (0x1), region = 98 }

// kernel: conv_lstm_forward.2
= control target key start
LH: loop header
LB: loop body
LE: loop exit
PB: predicated region body
PF: predicated region fallthrough
CT: control target
= control target key end

     0   :  { %s3937_s18 = smov 0   ;;  %s5506_s0 = inlined_call_operand.vmem [shape: f32[4,4,512], index: 0, kind: input, shape index: {}]   ;;  %s5507_s1 = inlined_call_operand.vmem [shape: bf16[9,32,4], index: 1, kind: input, shape index: {}]   ;;  %s5508_s2 = inlined_call_operand.vmem [shape: bf16[9,32,8], index: 2, kind: input, shape index: {}]   ;;  %s5509_s3 = inlined_call_operand.vmem [shape: f32[32,1], index: 3, kind: input, shape index: {}]   ;;  %s5510_s4 = inlined_call_operand.vmem [shape: f32[9,1,512], index: 4, kind: input, shape index: {}]   ;;  %s5511_s5 = inlined_call_operand.vmem [shape: f32[4,8,512], index: 5, kind: output, shape index: {}]  }
   0x1 LB: > { %s3378_s19 = sadd.s32 4294967295, %s3895_s18   ;;  %p3382_p0 = scmp.ge.s32.totalorder %s3895_s18, 1  ;;  %s3895_s18 = sphi %s3937_s18, %s15_s18  }
   0x2   : > { %p187_p1 = scmp.lt.s32.totalorder %s3895_s18, 5 }
   0x4   : > { %p188_p2 = pnand %p3382_p0, %p187_p1 }
   0x5   : > { %p215_p3 = scmp.lt.s32.totalorder (!%p188_p2), %s3378_s19, 3  ;;  %p3387_p4 = scmp.ne.s32.totalorder (!%p188_p2), %s3378_s19, 0 }
   0x6   : > { %191 = sbr.rel (%p188_p2) target bundleno = 922 (0x39a), region = 40 }
   0xb   : > { %s216_s20 = scalar_select %p215_p3, %s3378_s19, 3 }
   0xc   : > { %229 = sbr.rel (%p3387_p4) target bundleno = 26 (0x1a), region = 44 }
   0xd   : > { %s3762_s21 = sshll.u32 %s216_s20, 4  ;;  %s3763_s22 = sshll.u32 %s216_s20, 5 }
   0xe   : > { %s219_s25 = scalar_lea.vmem %s5506_s0, %s3762_s21  ;;  %s3951_s28 = scalar_lea.vmem %s5511_s5, %s3763_s22 }
  0x11   : > { %v3897_v0 = vmov 0.0  }
  0x12   : > { %230 = vst [vmem:[#allocation2 + $0x10] sm:$0xff] %v3897_v0 }
  0x13   : > { %231 = vst [vmem:[#allocation2] sm:$0xff] %v3897_v0 }
  0x14   : > { %232 = vst [vmem:[#allocation2 + $0x18] sm:$0xff] %v3897_v0 }
  0x15   : > { %233 = vst [vmem:[#allocation2 + $0x8] sm:$0xff] %v3897_v0 }
  0x16   : > { %234 = vst [vmem:[#allocation3] sm:$0xff] %v3897_v0 }
  0x17   : > { %235 = vst [vmem:[#allocation3 + $0x18] sm:$0xff] %v3897_v0 }
  0x18   : > { %236 = vst [vmem:[#allocation3 + $0x8] sm:$0xff] %v3897_v0 }
  0x19   : > { %237 = vst [vmem:[#allocation3 + $0x10] sm:$0xff] %v3897_v0 }
  0x1a PF: > { %v3955_v2 = vld [vmem:[#allocation2] sm:$0xff]  ;;  %s3898_s29 = smov 17   ;;  %v3961_v4 = vld [vmem:[%s219_s25] sm:$0xff]  ;;  %v3967_v6 = vld [vmem:[#allocation2 + $0x10] sm:$0xff]  ;;  %s3899_s30 = smov 16   ;;  %v265_v20 = vlaneseq  ;;  %vm441_vm1 = vcmask 1041408  }
  0x1b   : > { %274 = vrot.lane.b32.xlu0 %v3955_v2, %s3898_s29  ;;  %v3959_v3 = vld [vmem:[%s219_s25 + $0x8] sm:$0xff]  ;;  %246 = vst [vmem:[#allocation1] ss:$2 sm:$0xff] %v3961_v4  ;;  %v3965_v5 = vld [vmem:[#allocation2 + $0x18] sm:$0xff]  ;;  %s3900_s6 = smov 15   ;;  %vm335_vm3 = vcmask 1043456  }
  0x1c   : > { %v3953_v1 = vld [vmem:[#allocation2 + $0x8] sm:$0xff]  ;;  %248 = vst [vmem:[#allocation1 + $0x10] ss:$2 sm:$0xff] %v3959_v3  ;;  %v3983_v22 = vand.u32 127, %v265_v20  ;;  %v284_v23 = vld [vmem:[%s5510_s4] sm:$0xf] }
  0x1d   : > { %278 = vrot.lane.b32.xlu1 %v3953_v1, %s3898_s29  ;;  %v288_v27 = vperm.slane %v284_v23, 2  ;;  %v286_v30 = vperm.slane %v284_v23, 0  ;;  %v287_v31 = vperm.slane %v284_v23, 1  ;;  %v289_v32 = vperm.slane %v284_v23, 3  ;;  %v3999_v36 = vld [vmem:[%s5510_s4 + $0x4] sm:$0xf] }
  0x1e   : > { %vm267_vm0 = vcmp.lt.s32.totalorder %v3983_v22, 17  ;;  %vm549_vm2 = vcmp.lt.s32.totalorder %v3983_v22, 16  ;;  %v570_v45 = vperm.slane %v3999_v36, 1  ;;  %v3766_v57 = vld [vmem:[%s5508_s2] sm:$0xff]  ;;  %vm328_vm4 = vcmask 64512   ;;  %s3901_s13 = smov 1  }
  0x1f   : > { %vm434_vm5 = vcmask 31744   ;;  %vm862_vm6 = vcmp.lt.s32.totalorder %v3983_v22, 15  ;;  %vm1175_vm7 = vcmp.lt.s32.totalorder %v3983_v22, 1  ;;  %s3903_s23 = smov 113   ;;  %vm1782_vm8 = vcmp.lt.s32.totalorder %v3983_v22, 127  ;;  %s3904_s10 = smov 112  }
  0x20   : > { %vm2095_vm9 = vcmp.lt.s32.totalorder %v3983_v22, 113  ;;  %s3905_s22 = smov 111   ;;  %vm2408_vm10 = vcmp.lt.s32.totalorder %v3983_v22, 112  ;;  %vm2721_vm11 = vcmp.lt.s32.totalorder %v3983_v22, 111 }
  0x22   : > { %v249_v8 = vld.sshfl [vmem:[#allocation1] sm:$0xff pattern:$0x75316420]  ;;  %v250_v9 = vld.sshfl [vmem:[#allocation1 + $0x8] sm:$0xff pattern:$0x75316420] }
  0x23   : > { %276 = vrot.lane.b32.xlu0 %v3965_v5, %s3898_s29  ;;  %v252_v7 = vld.sshfl [vmem:[#allocation1 + $0x18] sm:$0xff pattern:$0x75316420]  ;;  %259 = vrot.lane.b32.xlu2 %v250_v9, %s3898_s29  ;;  %530 = vst [vmem:[#allocation1] ss:$2 sm:$0xff] %v3961_v4 }
  0x24   : > { %v251_v10 = vld.sshfl [vmem:[#allocation1 + $0x10] sm:$0xff pattern:$0x75316420] }
  0x25   : > { %272 = vrot.lane.b32.xlu1 %v3967_v6, %s3898_s29  ;;  %532 = vst [vmem:[#allocation1 + $0x10] ss:$2 sm:$0xff] %v3959_v3 }
  0x2a   : > { %v534_v11 = vld.sshfl [vmem:[#allocation1 + $0x8] sm:$0xff pattern:$0x75316420]  ;;  %v533_v14 = vld.sshfl [vmem:[#allocation1] sm:$0xff pattern:$0x75316420] }
  0x2b   : > { %263 = vrot.lane.b32.xlu0 %v252_v7, %s3898_s29  ;;  %261 = vrot.lane.b32.xlu2 %v251_v10, %s3898_s29  ;;  %843 = vst [vmem:[#allocation1] ss:$2 sm:$0xff] %v3961_v4 }
  0x2c   : > { %v535_v12 = vld.sshfl [vmem:[#allocation1 + $0x10] sm:$0xff pattern:$0x75316420]  ;;  %v536_v13 = vld.sshfl [vmem:[#allocation1 + $0x18] sm:$0xff pattern:$0x75316420] }
  0x2d   : > { %257 = vrot.lane.b32.xlu1 %v249_v8, %s3898_s29  ;;  %845 = vst [vmem:[#allocation1 + $0x10] ss:$2 sm:$0xff] %v3959_v3 }
  0x32   : > { %v847_v15 = vld.sshfl [vmem:[#allocation1 + $0x8] sm:$0xff pattern:$0x75316420]  ;;  %v846_v16 = vld.sshfl [vmem:[#allocation1] sm:$0xff pattern:$0x75316420] }
  0x33   : > { %545 = vrot.lane.b32.xlu0 %v535_v12, %s3899_s30  ;;  %543 = vrot.lane.b32.xlu2 %v534_v11, %s3899_s30  ;;  %1156 = vst [vmem:[#allocation1] ss:$2 sm:$0xff] %v3961_v4 }
  0x34   : > { %v849_v17 = vld.sshfl [vmem:[#allocation1 + $0x18] sm:$0xff pattern:$0x75316420]  ;;  %v848_v19 = vld.sshfl [vmem:[#allocation1 + $0x10] sm:$0xff pattern:$0x75316420] }
  0x35   : > { %547 = vrot.lane.b32.xlu1 %v536_v13, %s3899_s30  ;;  %1158 = vst [vmem:[#allocation1 + $0x10] ss:$2 sm:$0xff] %v3959_v3 }
  0x3a   : > { %v1160_v10 = vld.sshfl [vmem:[#allocation1 + $0x8] sm:$0xff pattern:$0x75316420] }
  0x3b   : > { %556 = vrot.lane.b32.xlu0 %v3955_v2, %s3899_s30  ;;  %541 = vrot.lane.b32.xlu2 %v533_v14, %s3899_s30  ;;  %v571_v14 = vperm.slane %v3999_v36, 2 }
  0x3d   : > { %558 = vrot.lane.b32.xlu1 %v3965_v5, %s3899_s30 }
  0x43   : > { %554 = vrot.lane.b32.xlu0 %v3967_v6, %s3899_s30  ;;  %560 = vrot.lane.b32.xlu2 %v3953_v1, %s3899_s30 }
  0x45   : > { %856 = vrot.lane.b32.xlu1 %v847_v15, %s3900_s6  ;;  %v1161_v15 = vld.sshfl [vmem:[#allocation1 + $0x10] sm:$0xff pattern:$0x75316420] }
  0x4b   : > { %860 = vrot.lane.b32.xlu0 %v849_v17, %s3900_s6  ;;  %858 = vrot.lane.b32.xlu2 %v848_v19, %s3900_s6  ;;  %v569_v17 = vperm.slane %v3999_v36, 0 }
  0x4d   : > { %854 = vrot.lane.b32.xlu1 %v846_v16, %s3900_s6  ;;  %v4038_v16 = vld [vmem:[%s5510_s4 + $0x10] sm:$0xf] }
  0x4e   : > { %v1472_v19 = vperm.slane %v4038_v16, 0  ;;  %v1473_v20 = vperm.slane %v4038_v16, 1 }
  0x53   : > { %871 = vrot.lane.b32.xlu0 %v3965_v5, %s3900_s6  ;;  %869 = vrot.lane.b32.xlu2 %v3955_v2, %s3900_s6 }
  0x55   : > { %873 = vrot.lane.b32.xlu1 %v3953_v1, %s3900_s6 }
  0x5b   : > { %867 = vrot.lane.b32.xlu2 %v3967_v6, %s3900_s6  ;;  %1169 = vrot.lane.b32.xlu0 %v1160_v10, %s3901_s13  ;;  %v1475_v10 = vperm.slane %v4038_v16, 3 }
  0x5d   : > { %1171 = vrot.lane.b32.xlu1 %v1161_v15, %s3901_s13 }
  0x65   : > { %1182 = vrot.lane.b32.xlu1 %v3955_v2, %s3901_s13 }
  0x6d   : > { %1180 = vrot.lane.b32.xlu1 %v3967_v6, %s3901_s13 }
  0x7d   : > { %v260_v18 = vpop.permute.xlu2 %259 }
  0x85   : > { %v262_v21 = vpop.permute.xlu2 %261 }
  0x86   : > { %v269_v26 = vsel %vm267_vm0, %v260_v18, %v262_v21 }
  0x87   : > { %v296_v29 = vmul.f32 %v288_v27, %v269_v26  ;;  %v1476_v26 = vrot.slane %v1473_v20, 4 }
  0x89   : > { %v300_v35 = vpack.c.bf16 %v296_v29, %v296_v29 }
  0x8b   : > { %v449_v51 = vsel %vm441_vm1, %v300_v35, 0 }
  0x8d   : > { %v275_v25 = vpop.permute.xlu0 %274  ;;  %v3992_v28 = vpop.permute.xlu2 %543 }
  0x8f   : > { %v279_v24 = vpop.permute.xlu1 %278 }
  0x95   : > { %v277_v33 = vpop.permute.xlu0 %276  ;;  %v542_v46 = vpop.permute.xlu2 %541 }
  0x96   : > { %v280_v37 = vsel %vm267_vm0, %v277_v33, %v279_v24  ;;  %v281_v38 = vsel %vm267_vm0, %v275_v25, %v277_v33  ;;  %v552_v52 = vsel %vm549_vm2, %v542_v46, %v3992_v28  ;;  %v1159_v33 = vld.sshfl [vmem:[#allocation1] sm:$0xff pattern:$0x75316420] }
  0x97   : > { %v273_v34 = vpop.permute.xlu1 %272  ;;  %v304_v43 = vmul.f32 %v288_v27, %v281_v38  ;;  %v305_v44 = vmul.f32 %v289_v32, %v280_v37  ;;  %v578_v58 = vmul.f32 %v570_v45, %v552_v52  ;;  %1167 = vrot.lane.b32.xlu0 %v1159_v33, %s3901_s13 }
  0x98   : > { %v282_v39 = vsel %vm267_vm0, %v273_v34, %v275_v25  ;;  %v283_v40 = vsel %vm267_vm0, %v279_v24, %v273_v34  ;;  %v572_v25 = vperm.slane %v3999_v36, 3  ;;  %v1478_v34 = vsel %vm335_vm3, %v1472_v19, %v1476_v26 }
  0x99   : > { %v302_v41 = vmul.f32 %v286_v30, %v283_v40  ;;  %v303_v42 = vmul.f32 %v287_v31, %v282_v39  ;;  %v308_v49 = vpack.c.bf16 %v304_v43, %v304_v43  ;;  %v309_v50 = vpack.c.bf16 %v305_v44, %v305_v44 }
  0x9a   : > { %v582_v0 = vpack.c.bf16 %v578_v58, %v578_v58  ;;  %v1482_v39 = vmul.f32 %v1478_v34, %v3961_v4 }
  0x9b   : > { %v306_v47 = vpack.c.bf16 %v302_v41, %v302_v41  ;;  %v307_v48 = vpack.c.bf16 %v303_v42, %v303_v42  ;;  %v343_v55 = vsel %vm335_vm3, %v308_v49, 0  ;;  %v346_v56 = vsel %vm335_vm3, %v309_v50, 0 }
  0x9c   : > { %393 = vmatpush.bf16.msra.mxu2 %v343_v55  ;;  %412 = vmatpush.bf16.msra.mxu3 %v346_v56  ;;  %1486 = vst [vmem:[#allocation1] ss:$2 sm:$0xff] %v1482_v39 }
  0x9d   : > { %v337_v53 = vsel %vm335_vm3, %v306_v47, 0  ;;  %v340_v54 = vsel %vm335_vm3, %v307_v48, 0  ;;  %v264_v59 = vpop.permute.xlu0 %263 }
  0x9e   : > { %355 = vmatpush.bf16.msra.mxu0 %v337_v53  ;;  %374 = vmatpush.bf16.msra.mxu1 %v340_v54  ;;  %v268_v61 = vsel %vm267_vm0, %v262_v21, %v264_v59 }
  0x9f   : > { %v258_v60 = vpop.permute.xlu1 %257  ;;  %v297_v7 = vmul.f32 %v289_v32, %v268_v61  ;;  %3400 = vmatmul.msk.bf16.vlgmr.msra.gmra.mxu2 %vm328_vm4, %v3766_v57  ;;  %3402 = vmatmul.msk.bf16.vlgmr.msra.gmra.mxu3 %vm328_vm4, %v3766_v57  ;;  %v3764_v61 = vld [vmem:[%s5507_s1] sm:$0xff] }
  0xa0   : > { %499 = vmatpush.bf16.msrb.mxu2 %v449_v51  ;;  %v270_v62 = vsel %vm267_vm0, %v258_v60, %v260_v18  ;;  %v271_v63 = vsel %vm267_vm0, %v264_v59, %v258_v60  ;;  %v618_v18 = vsel %vm441_vm1, %v582_v0, 0  ;;  %1186 = vrot.lane.b32.xlu0 %v3953_v1, %s3901_s13  ;;  %v561_v51 = vpop.permute.xlu2 %560 }
  0xa1   : > { %v294_v8 = vmul.f32 %v286_v30, %v271_v63  ;;  %v295_v9 = vmul.f32 %v287_v31, %v270_v62  ;;  %3396 = vmatmul.msk.bf16.vlgmr.msra.gmra.mxu0 %vm328_vm4, %v3766_v57  ;;  %3398 = vmatmul.msk.bf16.vlgmr.msra.gmra.mxu1 %vm328_vm4, %v3766_v57  ;;  %v301_v13 = vpack.c.bf16 %v297_v7, %v297_v7 }
  0xa3   : > { %v298_v11 = vpack.c.bf16 %v294_v8, %v294_v8  ;;  %v299_v12 = vpack.c.bf16 %v295_v9, %v295_v9  ;;  %v452_v24 = vsel %vm441_vm1, %v301_v13, 0  ;;  %v4075_v47 = vld.sshfl [vmem:[#allocation1] sm:$0xff pattern:$0x75316420]  ;;  %v1474_v9 = vperm.slane %v4038_v16, 2 }
  0xa4   : > { %518 = vmatpush.bf16.msrb.mxu3 %v452_v24  ;;  %v4077_v48 = vld.sshfl [vmem:[#allocation1 + $0x8] sm:$0xff pattern:$0x75316420]  ;;  %v1162_v8 = vld.sshfl [vmem:[#allocation1 + $0x18] sm:$0xff pattern:$0x75316420] }
  0xa5   : > { %v443_v21 = vsel %vm441_vm1, %v298_v11, 0  ;;  %v446_v23 = vsel %vm441_vm1, %v299_v12, 0  ;;  %v546_v27 = vpop.permute.xlu0 %545  ;;  %1763 = vst [vmem:[#allocation1] ss:$2 sm:$0xff] %v3961_v4  ;;  %1173 = vrot.lane.b32.xlu2 %v1162_v8, %s3901_s13  ;;  %v1477_v13 = vrot.slane %v1475_v10, 4 }
  0xa6   : > { %461 = vmatpush.bf16.msrb.mxu0 %v443_v21  ;;  %480 = vmatpush.bf16.msrb.mxu1 %v446_v23  ;;  %v551_v30 = vsel %vm549_vm2, %v3992_v28, %v546_v27  ;;  %v3767_v28 = vld [vmem:[%s5508_s2 + $0x8] sm:$0xff] }
  0xa7   : > { %v548_v29 = vpop.permute.xlu1 %547  ;;  %v579_v35 = vmul.f32 %v571_v14, %v551_v30  ;;  %v3461_v24 = vld [vmem:[%s5510_s4 + $0x8] sm:$0xf] }
  0xa8   : > { %v550_v31 = vsel %vm549_vm2, %v546_v27, %v548_v29  ;;  %v553_v32 = vsel %vm549_vm2, %v548_v29, %v542_v46  ;;  %v882_v26 = vperm.slane %v3461_v24, 0  ;;  %v884_v30 = vperm.slane %v3461_v24, 2 }
  0xa9   : > { %v577_v37 = vmul.f32 %v569_v17, %v553_v32  ;;  %v580_v38 = vmul.f32 %v572_v25, %v550_v31  ;;  %v583_v40 = vpack.c.bf16 %v579_v35, %v579_v35  ;;  %v885_v32 = vperm.slane %v3461_v24, 3 }
  0xaa   : > { %652 = vmatpush.bf16.msra.mxu1 %v618_v18 }
  0xab   : > { %v581_v41 = vpack.c.bf16 %v577_v37, %v577_v37  ;;  %v584_v42 = vpack.c.bf16 %v580_v38, %v580_v38  ;;  %v621_v43 = vsel %vm441_vm1, %v583_v40, 0  ;;  %v3768_v37 = vld [vmem:[%s5507_s1 + $0x10] sm:$0xff]  ;;  %v859_v38 = vpop.permute.xlu2 %858 }
  0xac   : > { %671 = vmatpush.bf16.msra.mxu2 %v621_v43 }
  0xad   : > { %v615_v44 = vsel %vm441_vm1, %v581_v41, 0  ;;  %v624_v46 = vsel %vm441_vm1, %v584_v42, 0  ;;  %v557_v49 = vpop.permute.xlu0 %556  ;;  %1184 = vrot.lane.b32.xlu2 %v3965_v5, %s3901_s13  ;;  %s3902_s13 = smov 127  }
  0xae   : > { %633 = vmatpush.bf16.msra.mxu0 %v615_v44  ;;  %690 = vmatpush.bf16.msra.mxu3 %v624_v46 }
  0xaf   : > { %3401 = vmatmul.msk.bf16.gmra.mxu2 %vm328_vm4, %v3767_v28  ;;  %3403 = vmatmul.msk.bf16.gmra.mxu3 %vm328_vm4, %v3767_v28  ;;  %v559_v50 = vpop.permute.xlu1 %558 }
  0xb0   : > { %v563_v52 = vsel %vm549_vm2, %v557_v49, %v559_v50  ;;  %v562_v53 = vsel %vm549_vm2, %v559_v50, %v561_v51 }
  0xb1   : > { %3397 = vmatmul.msk.bf16.gmra.mxu0 %vm328_vm4, %v3767_v28  ;;  %3399 = vmatmul.msk.bf16.gmra.mxu1 %vm328_vm4, %v3767_v28  ;;  %v587_v55 = vmul.f32 %v571_v14, %v563_v52  ;;  %v588_v58 = vmul.f32 %v572_v25, %v562_v53  ;;  %v1479_v14 = vsel %vm335_vm3, %v1474_v9, %v1477_v13  ;;  %v883_v25 = vperm.slane %v3461_v24, 1  ;;  %v3769_v53 = vld [vmem:[%s5507_s1 + $0x18] sm:$0xff] }
  0xb2   : > { %v1483_v15 = vmul.f32 %v1479_v14, %v3959_v3 }
  0xb3   : > { %v591_v63 = vpack.c.bf16 %v587_v55, %v587_v55  ;;  %v592_v7 = vpack.c.bf16 %v588_v58, %v588_v58 }
  0xb4   : > { %1488 = vst [vmem:[#allocation1 + $0x10] ss:$2 sm:$0xff] %v1483_v15 }
  0xb5   : > { %v555_v54 = vpop.permute.xlu0 %554  ;;  %v749_v12 = vsel %vm335_vm3, %v592_v7, 0 }
  0xb6   : > { %v564_v56 = vsel %vm549_vm2, %v555_v54, %v557_v49  ;;  %v565_v57 = vsel %vm549_vm2, %v561_v51, %v555_v54  ;;  %v870_v54 = vpop.permute.xlu2 %869 }
  0xb7   : > { %v586_v59 = vmul.f32 %v570_v45, %v564_v56  ;;  %v585_v60 = vmul.f32 %v569_v17, %v565_v57  ;;  %v746_v45 = vsel %vm335_vm3, %v591_v63, 0  ;;  %v3765_v17 = vld [vmem:[%s5507_s1 + $0x8] sm:$0xff]  ;;  %v857_v23 = vpop.permute.xlu1 %856 }
  0xb8   : > { %v864_v39 = vsel %vm862_vm6, %v857_v23, %v859_v38 }
  0xb9   : > { %v590_v62 = vpack.c.bf16 %v586_v59, %v586_v59  ;;  %v589_v0 = vpack.c.bf16 %v585_v60, %v585_v60  ;;  %v892_v28 = vmul.f32 %v884_v30, %v864_v39  ;;  %v3770_v59 = vld [vmem:[%s5508_s2 + $0x10] sm:$0xff] }
  0xbb   : > { %v743_v36 = vsel %vm335_vm3, %v590_v62, 0  ;;  %v740_v11 = vsel %vm335_vm3, %v589_v0, 0  ;;  %v4121_v18 = vld.sshfl [vmem:[#allocation1 + $0x10] sm:$0xff pattern:$0x75316420]  ;;  %v896_v44 = vpack.c.bf16 %v892_v28, %v892_v28 }
  0xbc   : > { %v4123_v21 = vld.sshfl [vmem:[#allocation1 + $0x18] sm:$0xff pattern:$0x75316420] }
  0xbd   : > { %1765 = vst [vmem:[#allocation1 + $0x10] ss:$2 sm:$0xff] %v3959_v3  ;;  %v861_v27 = vpop.permute.xlu0 %860  ;;  %v934_v51 = vsel %vm441_vm1, %v896_v44, 0 }
  0xbe   : > { %v863_v41 = vsel %vm862_vm6, %v859_v38, %v861_v27  ;;  %v868_v57 = vpop.permute.xlu2 %867 }
  0xbf   : > { %3416 = vmatmul.msk.bf16.vlgmr.msrb.gmra.mxu2 %vm434_vm5, %v3764_v61  ;;  %3418 = vmatmul.msk.bf16.vlgmr.msrb.gmra.mxu3 %vm434_vm5, %v3764_v61  ;;  %v855_v29 = vpop.permute.xlu1 %854  ;;  %v893_v43 = vmul.f32 %v885_v32, %v863_v41  ;;  %v877_v58 = vsel %vm862_vm6, %v868_v57, %v870_v54 }
  0xc0   : > { %796 = vmatpush.bf16.msrb.mxu2 %v746_v45  ;;  %815 = vmatpush.bf16.msrb.mxu3 %v749_v12  ;;  %v865_v31 = vsel %vm862_vm6, %v855_v29, %v857_v23  ;;  %v866_v33 = vsel %vm862_vm6, %v861_v27, %v855_v29  ;;  %v3771_v23 = vld [vmem:[%s5508_s2 + $0x18] sm:$0xff] }
  0xc1   : > { %3412 = vmatmul.msk.bf16.vlgmr.msrb.gmra.mxu0 %vm434_vm5, %v3764_v61  ;;  %3414 = vmatmul.msk.bf16.vlgmr.msrb.gmra.mxu1 %vm434_vm5, %v3764_v61  ;;  %v891_v34 = vmul.f32 %v883_v25, %v865_v31  ;;  %v890_v35 = vmul.f32 %v882_v26, %v866_v33  ;;  %v897_v46 = vpack.c.bf16 %v893_v43, %v893_v43 }
  0xc2   : > { %777 = vmatpush.bf16.msrb.mxu1 %v743_v36  ;;  %758 = vmatpush.bf16.msrb.mxu0 %v740_v11  ;;  %v899_v61 = vmul.f32 %v883_v25, %v877_v58  ;;  %v3772_v25 = vld [vmem:[%s5507_s1 + $0x20] sm:$0xff] }
  0xc3   : > { %v895_v40 = vpack.c.bf16 %v891_v34, %v891_v34  ;;  %v894_v42 = vpack.c.bf16 %v890_v35, %v890_v35  ;;  %v937_v52 = vsel %vm441_vm1, %v897_v46, 0 }
  0xc4   : > { %v903_v8 = vpack.c.bf16 %v899_v61, %v899_v61 }
  0xc5   : > { %v931_v49 = vsel %vm441_vm1, %v895_v40, 0  ;;  %v928_v50 = vsel %vm441_vm1, %v894_v42, 0  ;;  %v872_v55 = vpop.permute.xlu0 %871 }
  0xc6   : > { %v876_v56 = vsel %vm862_vm6, %v870_v54, %v872_v55  ;;  %v1056_v13 = vsel %vm335_vm3, %v903_v8, 0 }
  0xc7   : > { %v900_v60 = vmul.f32 %v884_v30, %v876_v56  ;;  %v874_v62 = vpop.permute.xlu1 %873 }
  0xc8   : > { %v875_v63 = vsel %vm862_vm6, %v872_v55, %v874_v62  ;;  %v878_v0 = vsel %vm862_vm6, %v874_v62, %v868_v57 }
  0xc9   : > { %v898_v7 = vmul.f32 %v882_v26, %v878_v0  ;;  %v901_v36 = vmul.f32 %v885_v32, %v875_v63  ;;  %v904_v45 = vpack.c.bf16 %v900_v60, %v900_v60  ;;  %v4191_v26 = vld [vmem:[%s5510_s4 + $0xc] sm:$0xf]  ;;  %v1769_v60 = vld.sshfl [vmem:[#allocation1 + $0x18] sm:$0xff pattern:$0x75316420] }
  0xca   : > { %v1197_v32 = vperm.slane %v4191_v26, 2  ;;  %v1196_v34 = vperm.slane %v4191_v26, 1  ;;  %v1198_v38 = vperm.slane %v4191_v26, 3  ;;  %1780 = vrot.lane.b32.xlu1 %v1769_v60, %s3902_s13  ;;  %v3773_v63 = vld [vmem:[%s5507_s1 + $0x28] sm:$0xff] }
  0xcb   : > { %v902_v11 = vpack.c.bf16 %v898_v7, %v898_v7  ;;  %v905_v12 = vpack.c.bf16 %v901_v36, %v901_v36  ;;  %v1059_v14 = vsel %vm335_vm3, %v904_v45, 0  ;;  %v1768_v36 = vld.sshfl [vmem:[#allocation1 + $0x10] sm:$0xff pattern:$0x75316420] }
  0xcc   : > { %1778 = vrot.lane.b32.xlu0 %v1768_v36, %s3902_s13  ;;  %2078 = vst [vmem:[#allocation1 + $0x10] ss:$2 sm:$0xff] %v3959_v3  ;;  %v3775_v36 = vld [vmem:[%s5508_s2 + $0x28] sm:$0xff] }
  0xcd   : > { %v1053_v15 = vsel %vm335_vm3, %v902_v11, 0  ;;  %v1170_v24 = vpop.permute.xlu0 %1169 }
  0xcf   : > { %3417 = vmatmul.msk.bf16.gmra.mxu2 %vm434_vm5, %v3765_v17  ;;  %3419 = vmatmul.msk.bf16.gmra.mxu3 %vm434_vm5, %v3765_v17  ;;  %v1172_v27 = vpop.permute.xlu1 %1171 }
  0xd0   : > { %v1177_v33 = vsel %vm1175_vm7, %v1170_v24, %v1172_v27 }
  0xd1   : > { %3413 = vmatmul.msk.bf16.gmra.mxu0 %vm434_vm5, %v3765_v17  ;;  %3415 = vmatmul.msk.bf16.gmra.mxu1 %vm434_vm5, %v3765_v17  ;;  %v1062_v17 = vsel %vm335_vm3, %v905_v12, 0  ;;  %v1205_v40 = vmul.f32 %v1197_v32, %v1177_v33 }
  0xd2   : > { %1791 = vrot.lane.b32.xlu1 %v3965_v5, %s3902_s13 }
  0xd3   : > { %v1209_v46 = vpack.c.bf16 %v1205_v40, %v1205_v40 }
  0xd4   : > { %1787 = vrot.lane.b32.xlu0 %v3967_v6, %s3902_s13 }
  0xd5   : > { %v1247_v57 = vsel %vm441_vm1, %v1209_v46, 0 }
  0xdc   : > { %1789 = vrot.lane.b32.xlu0 %v3955_v2, %s3902_s13 }
  0xdf   : > { %3437 = vmatmul.msk.bf16.vlgmr.msra.gmra.mxu2 %vm434_vm5, %v3768_v37  ;;  %3439 = vmatmul.msk.bf16.vlgmr.msra.gmra.mxu3 %vm434_vm5, %v3768_v37 }
  0xe0   : > { %984 = vmatpush.bf16.msra.mxu2 %v934_v51  ;;  %1003 = vmatpush.bf16.msra.mxu3 %v937_v52 }
  0xe1   : > { %3433 = vmatmul.msk.bf16.vlgmr.msra.gmra.mxu0 %vm434_vm5, %v3768_v37  ;;  %3435 = vmatmul.msk.bf16.vlgmr.msra.gmra.mxu1 %vm434_vm5, %v3768_v37  ;;  %v1195_v37 = vperm.slane %v4191_v26, 0 }
  0xe2   : > { %965 = vmatpush.bf16.msra.mxu1 %v931_v49  ;;  %946 = vmatpush.bf16.msra.mxu0 %v928_v50 }
  0xef   : > { %3438 = vmatmul.msk.bf16.gmra.mxu2 %vm434_vm5, %v3769_v53  ;;  %3440 = vmatmul.msk.bf16.gmra.mxu3 %vm434_vm5, %v3769_v53 }
  0xf1   : > { %3434 = vmatmul.msk.bf16.gmra.mxu0 %vm434_vm5, %v3769_v53  ;;  %3436 = vmatmul.msk.bf16.gmra.mxu1 %vm434_vm5, %v3769_v53 }
  0xff   : > { %3457 = vmatmul.msk.bf16.vlgmr.msrb.gmra.mxu2 %vm328_vm4, %v3770_v59  ;;  %3459 = vmatmul.msk.bf16.vlgmr.msrb.gmra.mxu3 %vm328_vm4, %v3770_v59  ;;  %v1174_v39 = vpop.permute.xlu2 %1173 }
 0x100   : > { %1109 = vmatpush.bf16.msrb.mxu2 %v1059_v14  ;;  %1128 = vmatpush.bf16.msrb.mxu3 %v1062_v17  ;;  %v1176_v42 = vsel %vm1175_vm7, %v1172_v27, %v1174_v39  ;;  %v1766_v14 = vld.sshfl [vmem:[#allocation1] sm:$0xff pattern:$0x75316420] }
 0x101   : > { %3453 = vmatmul.msk.bf16.vlgmr.msrb.gmra.mxu0 %vm328_vm4, %v3770_v59  ;;  %3455 = vmatmul.msk.bf16.vlgmr.msrb.gmra.mxu1 %vm328_vm4, %v3770_v59  ;;  %v1206_v44 = vmul.f32 %v1198_v38, %v1176_v42 }
 0x102   : > { %1090 = vmatpush.bf16.msrb.mxu1 %v1056_v13  ;;  %1071 = vmatpush.bf16.msrb.mxu0 %v1053_v15  ;;  %v1183_v13 = vpop.permute.xlu1 %1182 }
 0x103   : > { %v1210_v51 = vpack.c.bf16 %v1206_v44, %v1206_v44  ;;  %1774 = vrot.lane.b32.xlu2 %v1766_v14, %s3902_s13 }
 0x105   : > { %v1250_v59 = vsel %vm441_vm1, %v1210_v51, 0 }
 0x107   : > { %v1185_v33 = vpop.permute.xlu2 %1184 }
 0x109   : > { %v1168_v29 = vpop.permute.xlu0 %1167 }
 0x10a   : > { %v1178_v35 = vsel %vm1175_vm7, %v1168_v29, %v1170_v24  ;;  %v1179_v28 = vsel %vm1175_vm7, %v1174_v39, %v1168_v29  ;;  %v1181_v6 = vpop.permute.xlu1 %1180 }
 0x10b   : > { %v1204_v41 = vmul.f32 %v1196_v34, %v1178_v35  ;;  %v1203_v43 = vmul.f32 %v1195_v37, %v1179_v28  ;;  %v1189_v35 = vsel %vm1175_vm7, %v1183_v13, %v1185_v33  ;;  %v1190_v39 = vsel %vm1175_vm7, %v1181_v6, %v1183_v13  ;;  %v1767_v28 = vld.sshfl [vmem:[#allocation1 + $0x8] sm:$0xff pattern:$0x75316420] }
 0x10c   : > { %1776 = vrot.lane.b32.xlu2 %v1767_v28, %s3902_s13  ;;  %2076 = vst [vmem:[#allocation1] ss:$2 sm:$0xff] %v3961_v4 }
 0x10d   : > { %v1208_v49 = vpack.c.bf16 %v1204_v41, %v1204_v41  ;;  %v1207_v50 = vpack.c.bf16 %v1203_v43, %v1203_v43 }
 0x10f   : > { %3458 = vmatmul.msk.bf16.gmra.mxu2 %vm328_vm4, %v3771_v23  ;;  %3460 = vmatmul.msk.bf16.gmra.mxu3 %vm328_vm4, %v3771_v23  ;;  %v1244_v56 = vsel %vm441_vm1, %v1208_v49, 0  ;;  %v1241_v58 = vsel %vm441_vm1, %v1207_v50, 0 }
 0x111   : > { %3454 = vmatmul.msk.bf16.gmra.mxu0 %vm328_vm4, %v3771_v23  ;;  %3456 = vmatmul.msk.bf16.gmra.mxu1 %vm328_vm4, %v3771_v23  ;;  %v3774_v23 = vld [vmem:[%s5508_s2 + $0x20] sm:$0xff] }
 0x112   : > { %v1187_v40 = vpop.permute.xlu0 %1186 }
 0x113   : > { %v1188_v2 = vsel %vm1175_vm7, %v1185_v33, %v1187_v40  ;;  %v1191_v41 = vsel %vm1175_vm7, %v1187_v40, %v1181_v6 }
 0x114   : > { %v1214_v42 = vmul.f32 %v1198_v38, %v1188_v2  ;;  %1793 = vrot.lane.b32.xlu2 %v3953_v1, %s3902_s13 }
 0x11e   : > { %v4193_v30 = vpop.f32.mrf.mxu0  ;;  %v4195_v31 = vpop.f32.mrf.mxu1 }
 0x11f   : > { %3478 = vmatmul.msk.bf16.vlgmr.msra.gmra.mxu2 %vm434_vm5, %v3772_v25  ;;  %3480 = vmatmul.msk.bf16.vlgmr.msra.gmra.mxu3 %vm434_vm5, %v3772_v25 }
 0x120   : > { %1297 = vmatpush.bf16.msra.mxu2 %v1247_v57  ;;  %1316 = vmatpush.bf16.msra.mxu3 %v1250_v59 }
 0x121   : > { %3474 = vmatmul.msk.bf16.vlgmr.msra.gmra.mxu0 %vm434_vm5, %v3772_v25  ;;  %3476 = vmatmul.msk.bf16.vlgmr.msra.gmra.mxu1 %vm434_vm5, %v3772_v25 }
 0x122   : > { %v4221_v52 = vpop.f32.mrf.mxu2  ;;  %v4223_v53 = vpop.f32.mrf.mxu3  ;;  %1278 = vmatpush.bf16.msra.mxu1 %v1244_v56  ;;  %1259 = vmatpush.bf16.msra.mxu0 %v1241_v58 }
 0x126   : > { %v4225_v54 = vpop.f32.mrf.mxu0  ;;  %v4227_v55 = vpop.f32.mrf.mxu1 }
 0x12a   : > { %v4234_v61 = vpop.f32.mrf.mxu2  ;;  %v4236_v62 = vpop.f32.mrf.mxu3 }
 0x12e   : > { %v4241_v0 = vpop.f32.mrf.mxu0  ;;  %v4243_v7 = vpop.f32.mrf.mxu1 }
 0x12f   : > { %3479 = vmatmul.msk.bf16.gmra.mxu2 %vm434_vm5, %v3773_v63  ;;  %3481 = vmatmul.msk.bf16.gmra.mxu3 %vm434_vm5, %v3773_v63 }
 0x131   : > { %3475 = vmatmul.msk.bf16.gmra.mxu0 %vm434_vm5, %v3773_v63  ;;  %3477 = vmatmul.msk.bf16.gmra.mxu1 %vm434_vm5, %v3773_v63 }
 0x132   : > { %v4253_v45 = vpop.f32.mrf.mxu2  ;;  %v4255_v8 = vpop.f32.mrf.mxu3 }
 0x136   : > { %v4257_v11 = vpop.f32.mrf.mxu0  ;;  %v4259_v12 = vpop.f32.mrf.mxu1 }
 0x13a   : > { %v4264_v15 = vpop.f32.mrf.mxu2  ;;  %v4266_v17 = vpop.f32.mrf.mxu3 }
 0x13e   : > { %v463_v24 = vpop.f32.mrf.mxu0  ;;  %v482_v25 = vpop.f32.mrf.mxu1 }
 0x13f   : > { %v4272_v27 = vadd.f32 %v463_v24, %v4193_v30  ;;  %v4275_v29 = vadd.f32 %v482_v25, %v4195_v31  ;;  %v1213_v30 = vmul.f32 %v1197_v32, %v1189_v35  ;;  %v1212_v31 = vmul.f32 %v1196_v34, %v1190_v39  ;;  %3498 = vmatmul.msk.bf16.vlgmr.msrb.gmra.mxu2 %vm328_vm4, %v3774_v23 }
 0x140   : > { %3500 = vmatmul.msk.bf16.vlgmr.msrb.gmra.mxu3 %vm328_vm4, %v3774_v23  ;;  %v1211_v32 = vmul.f32 %v1195_v37, %v1191_v41  ;;  %v1218_v34 = vpack.c.bf16 %v1214_v42, %v1214_v42 }
 0x141   : > { %3494 = vmatmul.msk.bf16.vlgmr.msrb.gmra.mxu0 %vm328_vm4, %v3774_v23  ;;  %3496 = vmatmul.msk.bf16.vlgmr.msrb.gmra.mxu1 %vm328_vm4, %v3774_v23  ;;  %v1217_v43 = vpack.c.bf16 %v1213_v30, %v1213_v30  ;;  %v1216_v44 = vpack.c.bf16 %v1212_v31, %v1212_v31  ;;  %v3776_v30 = vld [vmem:[%s5507_s1 + $0x30] sm:$0xff] }
 0x142   : > { %v501_v46 = vpop.f32.mrf.mxu2  ;;  %v520_v49 = vpop.f32.mrf.mxu3  ;;  %v1215_v50 = vpack.c.bf16 %v1211_v32, %v1211_v32  ;;  %v1375_v63 = vsel %vm335_vm3, %v1218_v34, 0  ;;  %v1499_v32 = vpack.c.bf16 %v4121_v18, %v4121_v18  ;;  %v1500_v34 = vpack.c.bf16 %v4123_v21, %v4123_v21  ;;  %v3777_v18 = vld [vmem:[%s5507_s1 + $0x38] sm:$0xff] }
 0x143   : > { %v502_v51 = vadd.f32 %v501_v46, %v4221_v52  ;;  %v521_v56 = vadd.f32 %v520_v49, %v4223_v53  ;;  %v1369_v58 = vsel %vm335_vm3, %v1216_v44, 0  ;;  %v1372_v59 = vsel %vm335_vm3, %v1217_v43, 0  ;;  %1441 = vmatpush.bf16.msrb.mxu3 %v1375_v63  ;;  %v2082_v46 = vld.sshfl [vmem:[#allocation1 + $0x18] sm:$0xff pattern:$0x75316420] }
 0x144   : > { %1403 = vmatpush.bf16.msrb.mxu1 %v1369_v58  ;;  %1422 = vmatpush.bf16.msrb.mxu2 %v1372_v59  ;;  %v1366_v60 = vsel %vm335_vm3, %v1215_v50, 0  ;;  %v2080_v49 = vld.sshfl [vmem:[#allocation1 + $0x8] sm:$0xff pattern:$0x75316420]  ;;  %v1541_v50 = vsel %vm441_vm1, %v1499_v32, 0 }
 0x145   : > { %1384 = vmatpush.bf16.msrb.mxu0 %v1366_v60  ;;  %2093 = vrot.lane.b32.xlu0 %v2082_v46, %s3903_s23 }
 0x146   : > { %v465_v57 = vpop.f32.mrf.mxu0  ;;  %v484_v38 = vpop.f32.mrf.mxu1 }
 0x147   : > { %v466_v26 = vadd.f32 %v465_v57, %v4225_v54  ;;  %v485_v37 = vadd.f32 %v484_v38, %v4227_v55 }
 0x14a   : > { %v503_v52 = vpop.f32.mrf.mxu2  ;;  %v522_v53 = vpop.f32.mrf.mxu3 }
 0x14b   : > { %v504_v54 = vadd.f32 %v503_v52, %v4234_v61  ;;  %v523_v55 = vadd.f32 %v522_v53, %v4236_v62 }
 0x14d   : > { %2104 = vrot.lane.b32.xlu0 %v3965_v5, %s3903_s23 }
 0x14e   : > { %v468_v13 = vpop.f32.mrf.mxu0  ;;  %v487_v14 = vpop.f32.mrf.mxu1 }
 0x14f   : > { %v469_v23 = vadd.f32 %v468_v13, %v4241_v0  ;;  %v488_v24 = vadd.f32 %v487_v14, %v4243_v7  ;;  %3499 = vmatmul.msk.bf16.gmra.mxu2 %vm328_vm4, %v3775_v36 }
 0x150   : > { %3501 = vmatmul.msk.bf16.gmra.mxu3 %vm328_vm4, %v3775_v36 }
 0x151   : > { %3495 = vmatmul.msk.bf16.gmra.mxu0 %vm328_vm4, %v3775_v36  ;;  %3497 = vmatmul.msk.bf16.gmra.mxu1 %vm328_vm4, %v3775_v36 }
 0x152   : > { %v506_v25 = vpop.f32.mrf.mxu2  ;;  %v525_v33 = vpop.f32.mrf.mxu3 }
 0x153   : > { %v4323_v61 = vadd.f32 %v506_v25, %v4253_v45  ;;  %v4326_v62 = vadd.f32 %v525_v33, %v4255_v8 }
 0x156   : > { %v470_v6 = vpop.f32.mrf.mxu0  ;;  %v489_v0 = vpop.f32.mrf.mxu1 }
 0x157   : > { %v4329_v7 = vadd.f32 %v470_v6, %v4257_v11  ;;  %v4332_v35 = vadd.f32 %v489_v0, %v4259_v12 }
 0x15a   : > { %v508_v39 = vpop.f32.mrf.mxu2  ;;  %v527_v40 = vpop.f32.mrf.mxu3 }
 0x15b   : > { %v4338_v45 = vadd.f32 %v508_v39, %v4264_v15  ;;  %v4341_v8 = vadd.f32 %v527_v40, %v4266_v17  ;;  %v2079_v15 = vld.sshfl [vmem:[#allocation1] sm:$0xff pattern:$0x75316420] }
 0x15c   : > { %2087 = vrot.lane.b32.xlu1 %v2079_v15, %s3903_s23  ;;  %2389 = vst [vmem:[#allocation1] ss:$2 sm:$0xff] %v3961_v4  ;;  %v4428_v15 = vld [vmem:[#allocation2 + $0x8] sm:$0xff] }
 0x15e   : > { %v635_v31 = vpop.f32.mrf.mxu0  ;;  %v654_v2 = vpop.f32.mrf.mxu1 }
 0x15f   : > { %v4344_v11 = vadd.f32 %v635_v31, %v4272_v27  ;;  %v4347_v12 = vadd.f32 %v654_v2, %v4275_v29  ;;  %3519 = vmatmul.msk.bf16.vlgmr.msra.gmra.mxu2 %vm434_vm5, %v3776_v30  ;;  %v2081_v31 = vld.sshfl [vmem:[#allocation1 + $0x10] sm:$0xff pattern:$0x75316420] }
 0x160   : > { %3521 = vmatmul.msk.bf16.vlgmr.msra.gmra.mxu3 %vm434_vm5, %v3776_v30  ;;  %1591 = vmatpush.bf16.msra.mxu2 %v1541_v50  ;;  %2391 = vst [vmem:[#allocation1 + $0x10] ss:$2 sm:$0xff] %v3959_v3 }
 0x161   : > { %3515 = vmatmul.msk.bf16.vlgmr.msra.gmra.mxu0 %vm434_vm5, %v3776_v30  ;;  %3517 = vmatmul.msk.bf16.vlgmr.msra.gmra.mxu1 %vm434_vm5, %v3776_v30 }
 0x162   : > { %v673_v17 = vpop.f32.mrf.mxu2  ;;  %v692_v41 = vpop.f32.mrf.mxu3  ;;  %2091 = vrot.lane.b32.xlu2 %v2081_v31, %s3903_s23 }
 0x163   : > { %v704_v42 = vadd.f32 %v673_v17, %v502_v51  ;;  %v705_v27 = vadd.f32 %v692_v41, %v521_v56  ;;  %v1544_v51 = vsel %vm441_vm1, %v1500_v34, 0  ;;  %v1508_v17 = vmul.f32 %v4428_v15, %v1475_v10  ;;  %v4442_v34 = vld [vmem:[#allocation2 + $0x10] sm:$0xff]  ;;  %v2392_v31 = vld.sshfl [vmem:[#allocation1] sm:$0xff pattern:$0x75316420] }
 0x164   : > { %1610 = vmatpush.bf16.msra.mxu3 %v1544_v51  ;;  %2089 = vrot.lane.b32.xlu1 %v2080_v49, %s3903_s23  ;;  %v1505_v46 = vmul.f32 %v4442_v34, %v1472_v19  ;;  %v4447_v49 = vld [vmem:[#allocation2] sm:$0xff] }
 0x165   : > { %v1506_v50 = vmul.f32 %v4447_v49, %v1473_v20  ;;  %2400 = vrot.lane.b32.xlu0 %v2392_v31, %s3904_s10 }
 0x166   : > { %v637_v28 = vpop.f32.mrf.mxu0  ;;  %v656_v43 = vpop.f32.mrf.mxu1 }
 0x167   : > { %v706_v29 = vadd.f32 %v637_v28, %v466_v26  ;;  %v707_v44 = vadd.f32 %v656_v43, %v485_v37  ;;  %v1497_v26 = vpack.c.bf16 %v4075_v47, %v4075_v47  ;;  %v1498_v37 = vpack.c.bf16 %v4077_v48, %v4077_v48 }
 0x169   : > { %v1535_v52 = vsel %vm441_vm1, %v1497_v26, 0  ;;  %v1538_v53 = vsel %vm441_vm1, %v1498_v37, 0 }
 0x16a   : > { %v675_v56 = vpop.f32.mrf.mxu2  ;;  %v694_v57 = vpop.f32.mrf.mxu3  ;;  %1553 = vmatpush.bf16.msra.mxu0 %v1535_v52  ;;  %1572 = vmatpush.bf16.msra.mxu1 %v1538_v53 }
 0x16b   : > { %v708_v21 = vadd.f32 %v675_v56, %v504_v54  ;;  %v709_v38 = vadd.f32 %v694_v57, %v523_v55  ;;  %2100 = vrot.lane.b32.xlu2 %v4442_v34, %s3903_s23  ;;  %v1509_v57 = vpack.c.bf16 %v1505_v46, %v1505_v46 }
 0x16c   : > { %2106 = vrot.lane.b32.xlu1 %v3953_v1, %s3903_s23  ;;  %v3778_v1 = vld [vmem:[%s5508_s2 + $0x30] sm:$0xff] }
 0x16d   : > { %v1660_v16 = vsel %vm335_vm3, %v1509_v57, 0 }
 0x16e   : > { %v640_v58 = vpop.f32.mrf.mxu0  ;;  %v659_v59 = vpop.f32.mrf.mxu1 }
 0x16f   : > { %v4370_v60 = vadd.f32 %v640_v58, %v469_v23  ;;  %v4372_v63 = vadd.f32 %v659_v59, %v488_v24  ;;  %3520 = vmatmul.msk.bf16.gmra.mxu2 %vm434_vm5, %v3777_v18 }
 0x170   : > { %3522 = vmatmul.msk.bf16.gmra.mxu3 %vm434_vm5, %v3777_v18 }
 0x171   : > { %3516 = vmatmul.msk.bf16.gmra.mxu0 %vm434_vm5, %v3777_v18  ;;  %3518 = vmatmul.msk.bf16.gmra.mxu1 %vm434_vm5, %v3777_v18  ;;  %v1510_v18 = vpack.c.bf16 %v1506_v50, %v1506_v50 }
 0x172   : > { %v678_v47 = vpop.f32.mrf.mxu2  ;;  %v697_v48 = vpop.f32.mrf.mxu3 }
 0x173   : > { %v4385_v36 = vadd.f32 %v678_v47, %v4323_v61  ;;  %v4388_v54 = vadd.f32 %v697_v48, %v4326_v62  ;;  %v1663_v19 = vsel %vm335_vm3, %v1510_v18, 0  ;;  %2102 = vrot.lane.b32.xlu2 %v4447_v49, %s3903_s23  ;;  %v3780_v47 = vld [vmem:[%s5507_s1 + $0x40] sm:$0xff] }
 0x176   : > { %v642_v55 = vpop.f32.mrf.mxu0  ;;  %v661_v13 = vpop.f32.mrf.mxu1 }
 0x177   : > { %v4391_v14 = vadd.f32 %v642_v55, %v4329_v7  ;;  %v4394_v23 = vadd.f32 %v661_v13, %v4332_v35  ;;  %v4493_v13 = vld [vmem:[%s5510_s4 + $0x14] sm:$0xf] }
 0x17a   : > { %v680_v24 = vpop.f32.mrf.mxu2  ;;  %v699_v25 = vpop.f32.mrf.mxu3 }
 0x17b   : > { %v4400_v33 = vadd.f32 %v680_v24, %v4338_v45  ;;  %v4403_v61 = vadd.f32 %v699_v25, %v4341_v8  ;;  %v1805_v24 = vperm.slane %v4493_v13, 3  ;;  %v1781_v25 = vpop.permute.xlu1 %1780 }
 0x17e   : > { %v760_v62 = vpop.f32.mrf.mxu0  ;;  %v779_v6 = vpop.f32.mrf.mxu1 }
 0x17f   : > { %v4406_v0 = vadd.f32 %v760_v62, %v4344_v11  ;;  %v4409_v7 = vadd.f32 %v779_v6, %v4347_v12  ;;  %3539 = vmatmul.msk.bf16.vlgmr.msrb.gmra.mxu2 %vm328_vm4, %v3778_v1  ;;  %v1507_v12 = vmul.f32 %v1474_v9, %v3965_v5  ;;  %v1803_v6 = vperm.slane %v4493_v13, 1 }
 0x180   : > { %3541 = vmatmul.msk.bf16.vlgmr.msrb.gmra.mxu3 %vm328_vm4, %v3778_v1 }
 0x181   : > { %3535 = vmatmul.msk.bf16.vlgmr.msrb.gmra.mxu0 %vm328_vm4, %v3778_v1  ;;  %3537 = vmatmul.msk.bf16.vlgmr.msrb.gmra.mxu1 %vm328_vm4, %v3778_v1  ;;  %v1511_v41 = vpack.c.bf16 %v1507_v12, %v1507_v12  ;;  %v1802_v1 = vperm.slane %v4493_v13, 0 }
 0x182   : > { %v798_v35 = vpop.f32.mrf.mxu2  ;;  %v817_v39 = vpop.f32.mrf.mxu3  ;;  %1678 = vmatpush.bf16.msrb.mxu0 %v1660_v16  ;;  %1697 = vmatpush.bf16.msrb.mxu1 %v1663_v19 }
 0x183   : > { %v4415_v40 = vadd.f32 %v798_v35, %v704_v42  ;;  %v4417_v30 = vadd.f32 %v817_v39, %v705_v27  ;;  %v1512_v42 = vpack.c.bf16 %v1508_v17, %v1508_v17  ;;  %v1666_v27 = vsel %vm335_vm3, %v1511_v41, 0  ;;  %v1779_v39 = vpop.permute.xlu0 %1778  ;;  %v1792_v31 = vpop.permute.xlu1 %1791 }
 0x184   : > { %1716 = vmatpush.bf16.msrb.mxu2 %v1666_v27 }
 0x185   : > { %v1669_v28 = vsel %vm335_vm3, %v1512_v42, 0 }
 0x186   : > { %v762_v45 = vpop.f32.mrf.mxu0  ;;  %v781_v8 = vpop.f32.mrf.mxu1  ;;  %1735 = vmatpush.bf16.msrb.mxu3 %v1669_v28 }
 0x187   : > { %v4419_v2 = vadd.f32 %v762_v45, %v706_v29  ;;  %v4421_v11 = vadd.f32 %v781_v8, %v707_v44  ;;  %v3779_v44 = vld [vmem:[%s5508_s2 + $0x38] sm:$0xff]  ;;  %v1783_v45 = vsel %vm1782_vm8, %v1779_v39, %v1781_v25 }
 0x18a   : > { %v800_v43 = vpop.f32.mrf.mxu2  ;;  %v819_v29 = vpop.f32.mrf.mxu3 }
 0x18b   : > { %v4438_v5 = vadd.f32 %v800_v43, %v708_v21  ;;  %v4440_v9 = vadd.f32 %v819_v29, %v709_v38 }
 0x18e   : > { %v765_v32 = vpop.f32.mrf.mxu0  ;;  %v784_v10 = vpop.f32.mrf.mxu1 }
 0x18f   : > { %v4453_v51 = vadd.f32 %v765_v32, %v4370_v60  ;;  %v4456_v56 = vadd.f32 %v784_v10, %v4372_v63  ;;  %3540 = vmatmul.msk.bf16.gmra.mxu2 %vm328_vm4, %v3779_v44  ;;  %v1775_v63 = vpop.permute.xlu2 %1774 }
 0x190   : > { %3542 = vmatmul.msk.bf16.gmra.mxu3 %vm328_vm4, %v3779_v44 }
 0x191   : > { %3536 = vmatmul.msk.bf16.gmra.mxu0 %vm328_vm4, %v3779_v44  ;;  %3538 = vmatmul.msk.bf16.gmra.mxu1 %vm328_vm4, %v3779_v44 }
 0x192   : > { %v803_v20 = vpop.f32.mrf.mxu2  ;;  %v822_v21 = vpop.f32.mrf.mxu3 }
 0x193   : > { %v4467_v38 = vadd.f32 %v803_v20, %v4385_v36  ;;  %v4470_v58 = vadd.f32 %v822_v21, %v4388_v54 }
 0x196   : > { %v767_v59 = vpop.f32.mrf.mxu0  ;;  %v786_v26 = vpop.f32.mrf.mxu1 }
 0x197   : > { %v4473_v37 = vadd.f32 %v767_v59, %v4391_v14  ;;  %v4476_v60 = vadd.f32 %v786_v26, %v4394_v23 }
 0x19a   : > { %v805_v52 = vpop.f32.mrf.mxu2  ;;  %v824_v53 = vpop.f32.mrf.mxu3 }
 0x19b   : > { %v4484_v48 = vadd.f32 %v805_v52, %v4400_v33  ;;  %v4487_v36 = vadd.f32 %v824_v53, %v4403_v61  ;;  %v1777_v33 = vpop.permute.xlu2 %1776  ;;  %v1786_v61 = vsel %vm1782_vm8, %v1781_v25, %v1775_v63  ;;  %v2394_v52 = vld.sshfl [vmem:[#allocation1 + $0x10] sm:$0xff pattern:$0x75316420] }
 0x19c   : > { %v1785_v62 = vsel %vm1782_vm8, %v1775_v63, %v1777_v33  ;;  %v1784_v8 = vsel %vm1782_vm8, %v1777_v33, %v1779_v39  ;;  %2404 = vrot.lane.b32.xlu1 %v2394_v52, %s3904_s10  ;;  %v1788_v33 = vpop.permute.xlu0 %1787 }
 0x19d   : > { %v1810_v35 = vmul.f32 %v1802_v1, %v1785_v62  ;;  %v1811_v41 = vmul.f32 %v1803_v6, %v1784_v8 }
 0x19e   : > { %v948_v54 = vpop.f32.mrf.mxu0  ;;  %v967_v55 = vpop.f32.mrf.mxu1 }
 0x19f   : > { %v4496_v14 = vadd.f32 %v948_v54, %v4406_v0  ;;  %v4499_v23 = vadd.f32 %v967_v55, %v4409_v7  ;;  %v1804_v0 = vperm.slane %v4493_v13, 2  ;;  %v1813_v7 = vmul.f32 %v1805_v24, %v1786_v61  ;;  %3560 = vmatmul.msk.bf16.vlgmr.msra.gmra.mxu2 %vm434_vm5, %v3780_v47 }
 0x1a0   : > { %3562 = vmatmul.msk.bf16.vlgmr.msra.gmra.mxu3 %vm434_vm5, %v3780_v47  ;;  %v1814_v17 = vpack.c.bf16 %v1810_v35, %v1810_v35  ;;  %v1815_v43 = vpack.c.bf16 %v1811_v41, %v1811_v41 }
 0x1a1   : > { %3556 = vmatmul.msk.bf16.vlgmr.msra.gmra.mxu0 %vm434_vm5, %v3780_v47  ;;  %3558 = vmatmul.msk.bf16.vlgmr.msra.gmra.mxu1 %vm434_vm5, %v3780_v47  ;;  %v1817_v12 = vpack.c.bf16 %v1813_v7, %v1813_v7  ;;  %v1812_v42 = vmul.f32 %v1804_v0, %v1783_v45 }
 0x1a2   : > { %v986_v27 = vpop.f32.mrf.mxu2  ;;  %v1005_v28 = vpop.f32.mrf.mxu3  ;;  %v1848_v50 = vsel %vm441_vm1, %v1814_v17, 0 }
 0x1a3   : > { %v1816_v29 = vpack.c.bf16 %v1812_v42, %v1812_v42  ;;  %v4527_v44 = vadd.f32 %v986_v27, %v4415_v40  ;;  %v4530_v32 = vadd.f32 %v1005_v28, %v4417_v30  ;;  %v1857_v57 = vsel %vm441_vm1, %v1817_v12, 0  ;;  %1866 = vmatpush.bf16.msra.mxu0 %v1848_v50  ;;  %v2393_v30 = vld.sshfl [vmem:[#allocation1 + $0x8] sm:$0xff pattern:$0x75316420]  ;;  %v1794_v8 = vpop.permute.xlu2 %1793 }
 0x1a4   : > { %1923 = vmatpush.bf16.msra.mxu3 %v1857_v57  ;;  %v1851_v40 = vsel %vm441_vm1, %v1815_v43, 0  ;;  %2702 = vst [vmem:[#allocation1] ss:$2 sm:$0xff] %v3961_v4  ;;  %2402 = vrot.lane.b32.xlu0 %v2393_v30, %s3904_s10  ;;  %v1790_v45 = vpop.permute.xlu0 %1789  ;;  %v1795_v12 = vsel %vm1782_vm8, %v1792_v31, %v1794_v8  ;;  %v2395_v42 = vld.sshfl [vmem:[#allocation1 + $0x18] sm:$0xff pattern:$0x75316420] }
 0x1a5   : > { %v1854_v19 = vsel %vm441_vm1, %v1816_v29, 0  ;;  %1885 = vmatpush.bf16.msra.mxu1 %v1851_v40  ;;  %2413 = vrot.lane.b32.xlu1 %v4442_v34, %s3904_s10  ;;  %v1796_v17 = vsel %vm1782_vm8, %v1790_v45, %v1792_v31  ;;  %v1820_v41 = vmul.f32 %v1804_v0, %v1795_v12  ;;  %2704 = vst [vmem:[#allocation1 + $0x10] ss:$2 sm:$0xff] %v3959_v3 }
 0x1a6   : > { %v950_v10 = vpop.f32.mrf.mxu0  ;;  %v969_v46 = vpop.f32.mrf.mxu1  ;;  %1904 = vmatpush.bf16.msra.mxu2 %v1854_v19  ;;  %2406 = vrot.lane.b32.xlu2 %v2395_v42, %s3904_s10 }
 0x1a7   : > { %v4535_v18 = vadd.f32 %v950_v10, %v4419_v2  ;;  %v4538_v16 = vadd.f32 %v969_v46, %v4421_v11  ;;  %v3781_v2 = vld [vmem:[%s5507_s1 + $0x48] sm:$0xff] }
 0x1aa   : > { %v988_v20 = vpop.f32.mrf.mxu2  ;;  %v1007_v21 = vpop.f32.mrf.mxu3 }
 0x1ab   : > { %v4548_v11 = vadd.f32 %v988_v20, %v4438_v5  ;;  %v4551_v59 = vadd.f32 %v1007_v21, %v4440_v9 }
 0x1ac   : > { %2419 = vrot.lane.b32.xlu0 %v4428_v15, %s3904_s10 }
 0x1ad   : > { %2415 = vrot.lane.b32.xlu1 %v4447_v49, %s3904_s10 }
 0x1ae   : > { %v953_v26 = vpop.f32.mrf.mxu0  ;;  %v972_v63 = vpop.f32.mrf.mxu1 }
 0x1af   : > { %v4554_v53 = vadd.f32 %v953_v26, %v4453_v51  ;;  %v4557_v4 = vadd.f32 %v972_v63, %v4456_v56  ;;  %3561 = vmatmul.msk.bf16.gmra.mxu2 %vm434_vm5, %v3781_v2 }
 0x1b0   : > { %3563 = vmatmul.msk.bf16.gmra.mxu3 %vm434_vm5, %v3781_v2 }
 0x1b1   : > { %3557 = vmatmul.msk.bf16.gmra.mxu0 %vm434_vm5, %v3781_v2  ;;  %3559 = vmatmul.msk.bf16.gmra.mxu1 %vm434_vm5, %v3781_v2 }
 0x1b2   : > { %v991_v5 = vpop.f32.mrf.mxu2  ;;  %v1010_v9 = vpop.f32.mrf.mxu3 }
 0x1b3   : > { %v4567_v51 = vadd.f32 %v991_v5, %v4467_v38  ;;  %v4570_v56 = vadd.f32 %v1010_v9, %v4470_v58  ;;  %v3782_v38 = vld [vmem:[%s5508_s2 + $0x40] sm:$0xff] }
 0x1b6   : > { %v955_v47 = vpop.f32.mrf.mxu0  ;;  %v974_v54 = vpop.f32.mrf.mxu1 }
 0x1b7   : > { %v4573_v55 = vadd.f32 %v955_v47, %v4473_v37  ;;  %v4576_v25 = vadd.f32 %v974_v54, %v4476_v60 }
 0x1ba   : > { %v993_v61 = vpop.f32.mrf.mxu2  ;;  %v1012_v62 = vpop.f32.mrf.mxu3 }
 0x1bb   : > { %v4584_v58 = vadd.f32 %v993_v61, %v4484_v48  ;;  %v4587_v7 = vadd.f32 %v1012_v62, %v4487_v36  ;;  %v1797_v48 = vsel %vm1782_vm8, %v1788_v33, %v1790_v45  ;;  %v1798_v36 = vsel %vm1782_vm8, %v1794_v8, %v1788_v33  ;;  %v2094_v8 = vpop.permute.xlu0 %2093 }
 0x1bc   : > { %v2092_v12 = vpop.permute.xlu2 %2091 }
 0x1be   : > { %v1073_v37 = vpop.f32.mrf.mxu0  ;;  %v1092_v35 = vpop.f32.mrf.mxu1 }
 0x1bf   : > { %v4590_v60 = vadd.f32 %v1073_v37, %v4496_v14  ;;  %v4593_v39 = vadd.f32 %v1092_v35, %v4499_v23  ;;  %v1818_v14 = vmul.f32 %v1802_v1, %v1797_v48  ;;  %v1821_v23 = vmul.f32 %v1805_v24, %v1798_v36  ;;  %3580 = vmatmul.msk.bf16.vlgmr.msrb.gmra.mxu2 %vm328_vm4, %v3782_v38 }
 0x1c0   : > { %3582 = vmatmul.msk.bf16.vlgmr.msrb.gmra.mxu3 %vm328_vm4, %v3782_v38  ;;  %v1819_v1 = vmul.f32 %v1803_v6, %v1796_v17  ;;  %v1824_v24 = vpack.c.bf16 %v1820_v41, %v1820_v41  ;;  %v2096_v17 = vsel %vm2095_vm9, %v2092_v12, %v2094_v8 }
 0x1c1   : > { %3576 = vmatmul.msk.bf16.vlgmr.msrb.gmra.mxu0 %vm328_vm4, %v3782_v38  ;;  %3578 = vmatmul.msk.bf16.vlgmr.msrb.gmra.mxu1 %vm328_vm4, %v3782_v38  ;;  %v1822_v27 = vpack.c.bf16 %v1818_v14, %v1818_v14  ;;  %v1825_v28 = vpack.c.bf16 %v1821_v23, %v1821_v23  ;;  %v3784_v38 = vld [vmem:[%s5507_s1 + $0x50] sm:$0xff] }
 0x1c2   : > { %v1111_v43 = vpop.f32.mrf.mxu2  ;;  %v1823_v10 = vpack.c.bf16 %v1819_v1, %v1819_v1  ;;  %v1979_v19 = vsel %vm335_vm3, %v1824_v24, 0 }
 0x1c3   : > { %v1130_v29 = vpop.f32.mrf.mxu3  ;;  %v4620_v46 = vadd.f32 %v1111_v43, %v4527_v44  ;;  %v1973_v40 = vsel %vm335_vm3, %v1822_v27, 0  ;;  %v1982_v13 = vsel %vm335_vm3, %v1825_v28, 0  ;;  %2029 = vmatpush.bf16.msrb.mxu2 %v1979_v19 }
 0x1c4   : > { %v4623_v50 = vadd.f32 %v1130_v29, %v4530_v32  ;;  %1991 = vmatpush.bf16.msrb.mxu0 %v1973_v40  ;;  %2048 = vmatpush.bf16.msrb.mxu3 %v1982_v13  ;;  %v1976_v44 = vsel %vm335_vm3, %v1823_v10, 0  ;;  %v4635_v32 = vld [vmem:[#allocation2 + $0x18] sm:$0xff] }
 0x1c5   : > { %2010 = vmatpush.bf16.msrb.mxu1 %v1976_v44  ;;  %2417 = vrot.lane.b32.xlu2 %v4635_v32, %s3904_s10 }
 0x1c6   : > { %v1075_v0 = vpop.f32.mrf.mxu0  ;;  %v1094_v57 = vpop.f32.mrf.mxu1 }
 0x1c7   : > { %v4628_v6 = vadd.f32 %v1075_v0, %v4535_v18  ;;  %v4631_v3 = vadd.f32 %v1094_v57, %v4538_v16  ;;  %v3783_v18 = vld [vmem:[%s5508_s2 + $0x48] sm:$0xff] }
 0x1ca   : > { %v1113_v30 = vpop.f32.mrf.mxu2 }
 0x1cb   : > { %v1132_v20 = vpop.f32.mrf.mxu3  ;;  %v4643_v16 = vadd.f32 %v1113_v30, %v4548_v11 }
 0x1cc   : > { %v4646_v21 = vadd.f32 %v1132_v20, %v4551_v59 }
 0x1ce   : > { %v1078_v2 = vpop.f32.mrf.mxu0  ;;  %v1097_v26 = vpop.f32.mrf.mxu1 }
 0x1cf   : > { %v4649_v63 = vadd.f32 %v1078_v2, %v4554_v53  ;;  %v4652_v52 = vadd.f32 %v1097_v26, %v4557_v4  ;;  %3581 = vmatmul.msk.bf16.gmra.mxu2 %vm328_vm4, %v3783_v18  ;;  %v2088_v33 = vpop.permute.xlu1 %2087 }
 0x1d0   : > { %3583 = vmatmul.msk.bf16.gmra.mxu3 %vm328_vm4, %v3783_v18  ;;  %v2099_v36 = vsel %vm2095_vm9, %v2094_v8, %v2088_v33  ;;  %v2101_v8 = vpop.permute.xlu2 %2100 }
 0x1d1   : > { %3577 = vmatmul.msk.bf16.gmra.mxu0 %vm328_vm4, %v3783_v18  ;;  %3579 = vmatmul.msk.bf16.gmra.mxu1 %vm328_vm4, %v3783_v18 }
 0x1d2   : > { %v1116_v11 = vpop.f32.mrf.mxu2 }
 0x1d3   : > { %v1135_v5 = vpop.f32.mrf.mxu3  ;;  %v4659_v59 = vadd.f32 %v1116_v11, %v4567_v51 }
 0x1d4   : > { %v4662_v9 = vadd.f32 %v1135_v5, %v4570_v56 }
 0x1d6   : > { %v1080_v53 = vpop.f32.mrf.mxu0  ;;  %v1099_v47 = vpop.f32.mrf.mxu1 }
 0x1d7   : > { %v4665_v4 = vadd.f32 %v1080_v53, %v4573_v55  ;;  %v4668_v54 = vadd.f32 %v1099_v47, %v4576_v25  ;;  %v4683_v55 = vld [vmem:[%s5510_s4 + $0x18] sm:$0xf]  ;;  %v2090_v48 = vpop.permute.xlu1 %2089  ;;  %v2707_v47 = vld.sshfl [vmem:[#allocation1 + $0x10] sm:$0xff pattern:$0x75316420] }
 0x1d8   : > { %v2098_v31 = vsel %vm2095_vm9, %v2088_v33, %v2090_v48  ;;  %v2116_v14 = vperm.slane %v4683_v55, 1  ;;  %v2097_v41 = vsel %vm2095_vm9, %v2090_v48, %v2092_v12  ;;  %2717 = vrot.lane.b32.xlu0 %v2707_v47, %s3905_s22  ;;  %v2705_v48 = vld.sshfl [vmem:[#allocation1] sm:$0xff pattern:$0x75316420] }
 0x1d9   : > { %2713 = vrot.lane.b32.xlu2 %v2705_v48, %s3905_s22 }
 0x1da   : > { %v1118_v61 = vpop.f32.mrf.mxu2  ;;  %v2124_v28 = vmul.f32 %v2116_v14, %v2097_v41 }
 0x1db   : > { %v1137_v62 = vpop.f32.mrf.mxu3  ;;  %v4674_v51 = vadd.f32 %v1118_v61, %v4584_v58  ;;  %v2118_v58 = vperm.slane %v4683_v55, 3 }
 0x1dc   : > { %v4677_v56 = vadd.f32 %v1137_v62, %v4587_v7  ;;  %v2115_v7 = vperm.slane %v4683_v55, 0  ;;  %v2128_v29 = vpack.c.bf16 %v2124_v28, %v2124_v28 }
 0x1de   : > { %v1261_v37 = vpop.f32.mrf.mxu0  ;;  %v1280_v35 = vpop.f32.mrf.mxu1  ;;  %v2123_v23 = vmul.f32 %v2115_v7, %v2098_v31 }
 0x1df   : > { %v4686_v25 = vadd.f32 %v1261_v37, %v4590_v60  ;;  %v4689_v45 = vadd.f32 %v1280_v35, %v4593_v39  ;;  %v2117_v60 = vperm.slane %v4683_v55, 2  ;;  %v2126_v39 = vmul.f32 %v2118_v58, %v2099_v36  ;;  %3601 = vmatmul.msk.bf16.vlgmr.msra.gmra.mxu2 %vm434_vm5, %v3784_v38  ;;  %v2107_v12 = vpop.permute.xlu1 %2106 }
 0x1e0   : > { %3603 = vmatmul.msk.bf16.vlgmr.msra.gmra.mxu3 %vm434_vm5, %v3784_v38  ;;  %v2127_v27 = vpack.c.bf16 %v2123_v23, %v2123_v23  ;;  %2726 = vrot.lane.b32.xlu0 %v4442_v34, %s3905_s22  ;;  %v2103_v23 = vpop.permute.xlu2 %2102 }
 0x1e1   : > { %3597 = vmatmul.msk.bf16.vlgmr.msra.gmra.mxu0 %vm434_vm5, %v3784_v38  ;;  %3599 = vmatmul.msk.bf16.vlgmr.msra.gmra.mxu1 %vm434_vm5, %v3784_v38  ;;  %v2130_v42 = vpack.c.bf16 %v2126_v39, %v2126_v39  ;;  %v2125_v1 = vmul.f32 %v2117_v60, %v2096_v17  ;;  %v2105_v17 = vpop.permute.xlu0 %2104 }
 0x1e2   : > { %v1299_v24 = vpop.f32.mrf.mxu2  ;;  %v2161_v44 = vsel %vm441_vm1, %v2127_v27, 0  ;;  %v2109_v41 = vsel %vm2095_vm9, %v2103_v23, %v2105_v17  ;;  %v2706_v27 = vld.sshfl [vmem:[#allocation1 + $0x8] sm:$0xff pattern:$0x75316420] }
 0x1e3   : > { %v1318_v43 = vpop.f32.mrf.mxu3  ;;  %v2129_v10 = vpack.c.bf16 %v2125_v1, %v2125_v1  ;;  %v4716_v0 = vadd.f32 %v1299_v24, %v4620_v46  ;;  %v2170_v19 = vsel %vm441_vm1, %v2130_v42, 0  ;;  %2179 = vmatpush.bf16.msra.mxu0 %v2161_v44  ;;  %v2164_v46 = vsel %vm441_vm1, %v2128_v29, 0  ;;  %2715 = vrot.lane.b32.xlu2 %v2706_v27, %s3905_s22 }
 0x1e4   : > { %v4719_v57 = vadd.f32 %v1318_v43, %v4623_v50  ;;  %2236 = vmatpush.bf16.msra.mxu3 %v2170_v19  ;;  %v2708_v50 = vld.sshfl [vmem:[#allocation1 + $0x18] sm:$0xff pattern:$0x75316420]  ;;  %2198 = vmatpush.bf16.msra.mxu1 %v2164_v46 }
 0x1e5   : > { %v2167_v18 = vsel %vm441_vm1, %v2129_v10, 0  ;;  %2719 = vrot.lane.b32.xlu1 %v2708_v50, %s3905_s22 }
 0x1e6   : > { %v1263_v40 = vpop.f32.mrf.mxu0  ;;  %v1282_v13 = vpop.f32.mrf.mxu1  ;;  %2217 = vmatpush.bf16.msra.mxu2 %v2167_v18 }
 0x1e7   : > { %v4724_v30 = vadd.f32 %v1263_v40, %v4628_v6  ;;  %v4727_v20 = vadd.f32 %v1282_v13, %v4631_v3  ;;  %v3785_v6 = vld [vmem:[%s5507_s1 + $0x58] sm:$0xff] }
 0x1e8   : > { %2728 = vrot.lane.b32.xlu0 %v4447_v49, %s3905_s22  ;;  %v2108_v49 = vsel %vm2095_vm9, %v2105_v17, %v2107_v12 }
 0x1e9   : > { %v2133_v42 = vmul.f32 %v2117_v60, %v2108_v49 }
 0x1ea   : > { %v1301_v2 = vpop.f32.mrf.mxu2 }
 0x1eb   : > { %v1320_v26 = vpop.f32.mrf.mxu3  ;;  %v4736_v3 = vadd.f32 %v1301_v2, %v4643_v16  ;;  %2732 = vrot.lane.b32.xlu2 %v4428_v15, %s3905_s22 }
 0x1ec   : > { %v4739_v11 = vadd.f32 %v1320_v26, %v4646_v21 }
 0x1ed   : > { %2730 = vrot.lane.b32.xlu1 %v4635_v32, %s3905_s22 }
 0x1ee   : > { %v1266_v5 = vpop.f32.mrf.mxu0  ;;  %v1285_v53 = vpop.f32.mrf.mxu1 }
 0x1ef   : > { %v4742_v33 = vadd.f32 %v1266_v5, %v4649_v63  ;;  %v4745_v61 = vadd.f32 %v1285_v53, %v4652_v52  ;;  %3602 = vmatmul.msk.bf16.gmra.mxu2 %vm434_vm5, %v3785_v6 }
 0x1f0   : > { %3604 = vmatmul.msk.bf16.gmra.mxu3 %vm434_vm5, %v3785_v6 }
 0x1f1   : > { %3598 = vmatmul.msk.bf16.gmra.mxu0 %vm434_vm5, %v3785_v6  ;;  %3600 = vmatmul.msk.bf16.gmra.mxu1 %vm434_vm5, %v3785_v6 }
 0x1f2   : > { %v1304_v16 = vpop.f32.mrf.mxu2 }
 0x1f3   : > { %v1323_v21 = vpop.f32.mrf.mxu3  ;;  %v4755_v63 = vadd.f32 %v1304_v16, %v4659_v59 }
 0x1f4   : > { %v4758_v52 = vadd.f32 %v1323_v21, %v4662_v9  ;;  %v3786_v9 = vld [vmem:[%s5508_s2 + $0x50] sm:$0xff]  ;;  %v2401_v21 = vpop.permute.xlu0 %2400 }
 0x1f6   : > { %v1268_v62 = vpop.f32.mrf.mxu0  ;;  %v1287_v38 = vpop.f32.mrf.mxu1 }
 0x1f7   : > { %v4761_v37 = vadd.f32 %v1268_v62, %v4665_v4  ;;  %v4764_v35 = vadd.f32 %v1287_v38, %v4668_v54 }
 0x1fa   : > { %v1306_v32 = vpop.f32.mrf.mxu2 }
 0x1fb   : > { %v1325_v59 = vpop.f32.mrf.mxu3  ;;  %v4773_v36 = vadd.f32 %v1306_v32, %v4674_v51  ;;  %v2110_v51 = vsel %vm2095_vm9, %v2101_v8, %v2103_v23 }
 0x1fc   : > { %v4776_v4 = vadd.f32 %v1325_v59, %v4677_v56  ;;  %v2111_v56 = vsel %vm2095_vm9, %v2107_v12, %v2101_v8  ;;  %v3788_v8 = vld [vmem:[%s5507_s1 + $0x60] sm:$0xff] }
 0x1fe   : > { %v1386_v54 = vpop.f32.mrf.mxu0  ;;  %v1405_v31 = vpop.f32.mrf.mxu1 }
 0x1ff   : > { %v4779_v39 = vadd.f32 %v1386_v54, %v4686_v25  ;;  %v4782_v34 = vadd.f32 %v1405_v31, %v4689_v45  ;;  %v2131_v25 = vmul.f32 %v2115_v7, %v2110_v51  ;;  %v2134_v45 = vmul.f32 %v2118_v58, %v2111_v56  ;;  %3621 = vmatmul.msk.bf16.vlgmr.msrb.gmra.mxu2 %vm328_vm4, %v3786_v9 }
 0x200   : > { %3623 = vmatmul.msk.bf16.vlgmr.msrb.gmra.mxu3 %vm328_vm4, %v3786_v9  ;;  %v2132_v7 = vmul.f32 %v2116_v14, %v2109_v41  ;;  %v2137_v58 = vpack.c.bf16 %v2133_v42, %v2133_v42 }
 0x201   : > { %3617 = vmatmul.msk.bf16.vlgmr.msrb.gmra.mxu0 %vm328_vm4, %v3786_v9  ;;  %3619 = vmatmul.msk.bf16.vlgmr.msrb.gmra.mxu1 %vm328_vm4, %v3786_v9  ;;  %v2135_v28 = vpack.c.bf16 %v2131_v25, %v2131_v25  ;;  %v2138_v1 = vpack.c.bf16 %v2134_v45, %v2134_v45 }
 0x202   : > { %v1424_v24 = vpop.f32.mrf.mxu2  ;;  %v2136_v29 = vpack.c.bf16 %v2132_v7, %v2132_v7  ;;  %v2292_v46 = vsel %vm335_vm3, %v2137_v58, 0 }
 0x203   : > { %v1443_v43 = vpop.f32.mrf.mxu3  ;;  %v4808_v10 = vadd.f32 %v1424_v24, %v4716_v0  ;;  %v2286_v44 = vsel %vm335_vm3, %v2135_v28, 0  ;;  %v2295_v19 = vsel %vm335_vm3, %v2138_v1, 0  ;;  %2342 = vmatpush.bf16.msrb.mxu2 %v2292_v46 }
 0x204   : > { %v4811_v40 = vadd.f32 %v1443_v43, %v4719_v57  ;;  %2304 = vmatpush.bf16.msrb.mxu0 %v2286_v44  ;;  %2361 = vmatpush.bf16.msrb.mxu3 %v2295_v19  ;;  %v2289_v0 = vsel %vm335_vm3, %v2136_v29, 0 }
 0x205   : > { %2323 = vmatpush.bf16.msrb.mxu1 %v2289_v0 }
 0x206   : > { %v1388_v13 = vpop.f32.mrf.mxu0  ;;  %v1407_v60 = vpop.f32.mrf.mxu1 }
 0x207   : > { %v4816_v55 = vadd.f32 %v1388_v13, %v4724_v30  ;;  %v4819_v14 = vadd.f32 %v1407_v60, %v4727_v20  ;;  %v3787_v30 = vld [vmem:[%s5508_s2 + $0x58] sm:$0xff] }
 0x20a   : > { %v1426_v57 = vpop.f32.mrf.mxu2 }
 0x20b   : > { %v1445_v18 = vpop.f32.mrf.mxu3  ;;  %v4829_v20 = vadd.f32 %v1426_v57, %v4736_v3  ;;  %v3789_v57 = vld [vmem:[%s5507_s1 + $0x68] sm:$0xff] }
 0x20c   : > { %v4832_v50 = vadd.f32 %v1445_v18, %v4739_v11 }
 0x20e   : > { %v1391_v2 = vpop.f32.mrf.mxu0  ;;  %v1410_v26 = vpop.f32.mrf.mxu1 }
 0x20f   : > { %v4835_v6 = vadd.f32 %v1391_v2, %v4742_v33  ;;  %v4838_v5 = vadd.f32 %v1410_v26, %v4745_v61  ;;  %3622 = vmatmul.msk.bf16.gmra.mxu2 %vm328_vm4, %v3787_v30  ;;  %v2405_v56 = vpop.permute.xlu1 %2404 }
 0x210   : > { %3624 = vmatmul.msk.bf16.gmra.mxu3 %vm328_vm4, %v3787_v30 }
 0x211   : > { %3618 = vmatmul.msk.bf16.gmra.mxu0 %vm328_vm4, %v3787_v30  ;;  %3620 = vmatmul.msk.bf16.gmra.mxu1 %vm328_vm4, %v3787_v30 }
 0x212   : > { %v1429_v15 = vpop.f32.mrf.mxu2 }
 0x213   : > { %v1448_v3 = vpop.f32.mrf.mxu3  ;;  %v4845_v11 = vadd.f32 %v1429_v15, %v4755_v63 }
 0x214   : > { %v4848_v53 = vadd.f32 %v1448_v3, %v4758_v52 }
 0x216   : > { %v1393_v47 = vpop.f32.mrf.mxu0  ;;  %v1412_v33 = vpop.f32.mrf.mxu1 }
 0x217   : > { %v4851_v61 = vadd.f32 %v1393_v47, %v4761_v37  ;;  %v4854_v16 = vadd.f32 %v1412_v33, %v4764_v35  ;;  %v4869_v37 = vld [vmem:[%s5510_s4 + $0x1c] sm:$0xf]  ;;  %v2403_v54 = vpop.permute.xlu0 %2402 }
 0x218   : > { %v2431_v9 = vperm.slane %v4869_v37, 3  ;;  %v2411_v23 = vsel %vm2408_vm10, %v2401_v21, %v2403_v54  ;;  %v2429_v12 = vperm.slane %v4869_v37, 1  ;;  %v2410_v25 = vsel %vm2408_vm10, %v2403_v54, %v2405_v56 }
 0x21a   : > { %v1431_v62 = vpop.f32.mrf.mxu2  ;;  %v2437_v41 = vmul.f32 %v2429_v12, %v2410_v25 }
 0x21b   : > { %v1450_v38 = vpop.f32.mrf.mxu3  ;;  %v4860_v63 = vadd.f32 %v1431_v62, %v4773_v36  ;;  %v2407_v36 = vpop.permute.xlu2 %2406 }
 0x21c   : > { %v4863_v52 = vadd.f32 %v1450_v38, %v4776_v4  ;;  %v2428_v4 = vperm.slane %v4869_v37, 0  ;;  %v2412_v31 = vsel %vm2408_vm10, %v2407_v36, %v2401_v21  ;;  %v2409_v17 = vsel %vm2408_vm10, %v2405_v56, %v2407_v36  ;;  %v2414_v21 = vpop.permute.xlu1 %2413 }
 0x21d   : > { %v2441_v1 = vpack.c.bf16 %v2437_v41, %v2437_v41 }
 0x21e   : > { %v1555_v48 = vpop.f32.mrf.mxu0  ;;  %v1574_v32 = vpop.f32.mrf.mxu1  ;;  %v2436_v51 = vmul.f32 %v2428_v4, %v2411_v23 }
 0x21f   : > { %v4872_v35 = vadd.f32 %v1555_v48, %v4779_v39  ;;  %v4875_v59 = vadd.f32 %v1574_v32, %v4782_v34  ;;  %v2430_v39 = vperm.slane %v4869_v37, 2  ;;  %v2439_v34 = vmul.f32 %v2431_v9, %v2412_v31  ;;  %3642 = vmatmul.msk.bf16.vlgmr.msra.gmra.mxu2 %vm434_vm5, %v3788_v8  ;;  %v2420_v54 = vpop.permute.xlu0 %2419 }
 0x220   : > { %3644 = vmatmul.msk.bf16.vlgmr.msra.gmra.mxu3 %vm434_vm5, %v3788_v8  ;;  %v2440_v49 = vpack.c.bf16 %v2436_v51, %v2436_v51 }
 0x221   : > { %3638 = vmatmul.msk.bf16.vlgmr.msra.gmra.mxu0 %vm434_vm5, %v3788_v8  ;;  %3640 = vmatmul.msk.bf16.vlgmr.msra.gmra.mxu1 %vm434_vm5, %v3788_v8  ;;  %v2443_v45 = vpack.c.bf16 %v2439_v34, %v2439_v34  ;;  %v2438_v42 = vmul.f32 %v2430_v39, %v2409_v17  ;;  %v3790_v8 = vld [vmem:[%s5508_s2 + $0x60] sm:$0xff] }
 0x222   : > { %v1593_v27 = vpop.f32.mrf.mxu2  ;;  %v2474_v13 = vsel %vm441_vm1, %v2440_v49, 0 }
 0x223   : > { %v1612_v28 = vpop.f32.mrf.mxu3  ;;  %v2442_v7 = vpack.c.bf16 %v2438_v42, %v2438_v42  ;;  %v4902_v58 = vadd.f32 %v1593_v27, %v4808_v10  ;;  %v2483_v60 = vsel %vm441_vm1, %v2443_v45, 0  ;;  %2492 = vmatpush.bf16.msra.mxu0 %v2474_v13  ;;  %v2477_v10 = vsel %vm441_vm1, %v2441_v1, 0  ;;  %v2418_v23 = vpop.permute.xlu2 %2417 }
 0x224   : > { %v4905_v24 = vadd.f32 %v1612_v28, %v4811_v40  ;;  %2549 = vmatpush.bf16.msra.mxu3 %v2483_v60  ;;  %2511 = vmatpush.bf16.msra.mxu1 %v2477_v10  ;;  %v2416_v36 = vpop.permute.xlu1 %2415 }
 0x225   : > { %v2480_v0 = vsel %vm441_vm1, %v2442_v7, 0  ;;  %v2423_v31 = vsel %vm2408_vm10, %v2414_v21, %v2416_v36  ;;  %v2422_v34 = vsel %vm2408_vm10, %v2416_v36, %v2418_v23 }
 0x226   : > { %v1557_v43 = vpop.f32.mrf.mxu0  ;;  %v1576_v29 = vpop.f32.mrf.mxu1  ;;  %2530 = vmatpush.bf16.msra.mxu2 %v2480_v0 }
 0x227   : > { %v4910_v44 = vadd.f32 %v1557_v43, %v4816_v55  ;;  %v4913_v19 = vadd.f32 %v1576_v29, %v4819_v14  ;;  %v3791_v29 = vld [vmem:[%s5508_s2 + $0x68] sm:$0xff] }
 0x22a   : > { %v1595_v40 = vpop.f32.mrf.mxu2 }
 0x22b   : > { %v1614_v46 = vpop.f32.mrf.mxu3  ;;  %v4921_v55 = vadd.f32 %v1595_v40, %v4829_v20 }
 0x22c   : > { %v4924_v14 = vadd.f32 %v1614_v46, %v4832_v50 }
 0x22e   : > { %v1560_v18 = vpop.f32.mrf.mxu0  ;;  %v1579_v30 = vpop.f32.mrf.mxu1 }
 0x22f   : > { %v4927_v2 = vadd.f32 %v1560_v18, %v4835_v6  ;;  %v4930_v26 = vadd.f32 %v1579_v30, %v4838_v5  ;;  %3643 = vmatmul.msk.bf16.gmra.mxu2 %vm434_vm5, %v3789_v57 }
 0x230   : > { %3645 = vmatmul.msk.bf16.gmra.mxu3 %vm434_vm5, %v3789_v57 }
 0x231   : > { %3639 = vmatmul.msk.bf16.gmra.mxu0 %vm434_vm5, %v3789_v57  ;;  %3641 = vmatmul.msk.bf16.gmra.mxu1 %vm434_vm5, %v3789_v57 }
 0x232   : > { %v1598_v20 = vpop.f32.mrf.mxu2 }
 0x233   : > { %v1617_v15 = vpop.f32.mrf.mxu3  ;;  %v4937_v50 = vadd.f32 %v1598_v20, %v4845_v11 }
 0x234   : > { %v4940_v3 = vadd.f32 %v1617_v15, %v4848_v53 }
 0x236   : > { %v1562_v6 = vpop.f32.mrf.mxu0  ;;  %v1581_v47 = vpop.f32.mrf.mxu1 }
 0x237   : > { %v4943_v5 = vadd.f32 %v1562_v6, %v4851_v61  ;;  %v4946_v33 = vadd.f32 %v1581_v47, %v4854_v16  ;;  %v3792_v6 = vld [vmem:[%s5507_s1 + $0x70] sm:$0xff] }
 0x23a   : > { %v1600_v62 = vpop.f32.mrf.mxu2 }
 0x23b   : > { %v1619_v38 = vpop.f32.mrf.mxu3  ;;  %v4952_v11 = vadd.f32 %v1600_v62, %v4860_v63  ;;  %v2424_v63 = vsel %vm2408_vm10, %v2420_v54, %v2414_v21 }
 0x23c   : > { %v4955_v53 = vadd.f32 %v1619_v38, %v4863_v52  ;;  %v2444_v52 = vmul.f32 %v2428_v4, %v2423_v31  ;;  %v2445_v4 = vmul.f32 %v2429_v12, %v2422_v34 }
 0x23e   : > { %v1680_v48 = vpop.f32.mrf.mxu0  ;;  %v1699_v32 = vpop.f32.mrf.mxu1  ;;  %v2448_v56 = vpack.c.bf16 %v2444_v52, %v2444_v52  ;;  %v2449_v49 = vpack.c.bf16 %v2445_v4, %v2445_v4 }
 0x23f   : > { %v4958_v61 = vadd.f32 %v1680_v48, %v4872_v35  ;;  %v4961_v16 = vadd.f32 %v1699_v32, %v4875_v59  ;;  %v2447_v35 = vmul.f32 %v2431_v9, %v2424_v63  ;;  %v2421_v59 = vsel %vm2408_vm10, %v2418_v23, %v2420_v54  ;;  %3662 = vmatmul.msk.bf16.vlgmr.msrb.gmra.mxu2 %vm328_vm4, %v3790_v8 }
 0x240   : > { %3664 = vmatmul.msk.bf16.vlgmr.msrb.gmra.mxu3 %vm328_vm4, %v3790_v8  ;;  %v2446_v51 = vmul.f32 %v2430_v39, %v2421_v59  ;;  %v2599_v1 = vsel %vm335_vm3, %v2448_v56, 0  ;;  %v2602_v12 = vsel %vm335_vm3, %v2449_v49, 0 }
 0x241   : > { %3658 = vmatmul.msk.bf16.vlgmr.msrb.gmra.mxu0 %vm328_vm4, %v3790_v8  ;;  %3660 = vmatmul.msk.bf16.vlgmr.msrb.gmra.mxu1 %vm328_vm4, %v3790_v8  ;;  %v2451_v17 = vpack.c.bf16 %v2447_v35, %v2447_v35 }
 0x242   : > { %v2450_v25 = vpack.c.bf16 %v2446_v51, %v2446_v51  ;;  %v1718_v9 = vpop.f32.mrf.mxu2  ;;  %2617 = vmatpush.bf16.msrb.mxu0 %v2599_v1  ;;  %2636 = vmatpush.bf16.msrb.mxu1 %v2602_v12 }
 0x243   : > { %v1737_v45 = vpop.f32.mrf.mxu3  ;;  %v4984_v41 = vadd.f32 %v1718_v9, %v4902_v58  ;;  %v2608_v39 = vsel %vm335_vm3, %v2451_v17, 0 }
 0x244   : > { %v4987_v42 = vadd.f32 %v1737_v45, %v4905_v24  ;;  %2674 = vmatpush.bf16.msrb.mxu3 %v2608_v39  ;;  %v2605_v58 = vsel %vm335_vm3, %v2450_v25, 0 }
 0x245   : > { %2655 = vmatpush.bf16.msrb.mxu2 %v2605_v58 }
 0x246   : > { %v1682_v27 = vpop.f32.mrf.mxu0  ;;  %v1701_v28 = vpop.f32.mrf.mxu1 }
 0x247   : > { %v4992_v7 = vadd.f32 %v1682_v27, %v4910_v44  ;;  %v4995_v37 = vadd.f32 %v1701_v28, %v4913_v19 }
 0x24a   : > { %v1720_v24 = vpop.f32.mrf.mxu2  ;;  %v2718_v31 = vpop.permute.xlu0 %2717 }
 0x24b   : > { %v1739_v43 = vpop.f32.mrf.mxu3  ;;  %v5003_v13 = vadd.f32 %v1720_v24, %v4921_v55  ;;  %v3793_v24 = vld [vmem:[%s5507_s1 + $0x78] sm:$0xff] }
 0x24c   : > { %v5006_v60 = vadd.f32 %v1739_v43, %v4924_v14 }
 0x24e   : > { %v1685_v44 = vpop.f32.mrf.mxu0  ;;  %v1704_v19 = vpop.f32.mrf.mxu1 }
 0x24f   : > { %v5009_v10 = vadd.f32 %v1685_v44, %v4927_v2  ;;  %v5012_v0 = vadd.f32 %v1704_v19, %v4930_v26  ;;  %3663 = vmatmul.msk.bf16.gmra.mxu2 %vm328_vm4, %v3791_v29  ;;  %v2714_v26 = vpop.permute.xlu2 %2713 }
 0x250   : > { %3665 = vmatmul.msk.bf16.gmra.mxu3 %vm328_vm4, %v3791_v29 }
 0x251   : > { %3659 = vmatmul.msk.bf16.gmra.mxu0 %vm328_vm4, %v3791_v29  ;;  %3661 = vmatmul.msk.bf16.gmra.mxu1 %vm328_vm4, %v3791_v29 }
 0x252   : > { %v1723_v40 = vpop.f32.mrf.mxu2 }
 0x253   : > { %v1742_v46 = vpop.f32.mrf.mxu3  ;;  %v5019_v57 = vadd.f32 %v1723_v40, %v4937_v50 }
 0x254   : > { %v5022_v55 = vadd.f32 %v1742_v46, %v4940_v3 }
 0x256   : > { %v1687_v14 = vpop.f32.mrf.mxu0  ;;  %v1706_v18 = vpop.f32.mrf.mxu1 }
 0x257   : > { %v5025_v30 = vadd.f32 %v1687_v14, %v4943_v5  ;;  %v5028_v2 = vadd.f32 %v1706_v18, %v4946_v33  ;;  %v5043_v5 = vld [vmem:[%s5510_s4 + $0x20] sm:$0xf]  ;;  %v2720_v8 = vpop.permute.xlu1 %2719 }
 0x258   : > { %v2744_v38 = vperm.slane %v5043_v5, 3  ;;  %v2725_v48 = vsel %vm2721_vm11, %v2720_v8, %v2714_v26  ;;  %v2742_v36 = vperm.slane %v5043_v5, 1  ;;  %v2722_v63 = vsel %vm2721_vm11, %v2718_v31, %v2720_v8 }
 0x25a   : > { %v1725_v20 = vpop.f32.mrf.mxu2 }
 0x25b   : > { %v1744_v15 = vpop.f32.mrf.mxu3  ;;  %v5034_v50 = vadd.f32 %v1725_v20, %v4952_v11  ;;  %v2741_v11 = vperm.slane %v5043_v5, 0 }
 0x25c   : > { %v5037_v3 = vadd.f32 %v1744_v15, %v4955_v53  ;;  %v2716_v53 = vpop.permute.xlu2 %2715 }
 0x25d   : > { %v2724_v32 = vsel %vm2721_vm11, %v2714_v26, %v2716_v53  ;;  %v2723_v23 = vsel %vm2721_vm11, %v2716_v53, %v2718_v31  ;;  %v2727_v26 = vpop.permute.xlu0 %2726 }
 0x25e   : > { %v1868_v47 = vpop.f32.mrf.mxu0  ;;  %v1887_v21 = vpop.f32.mrf.mxu1  ;;  %v2749_v54 = vmul.f32 %v2741_v11, %v2724_v32  ;;  %v2750_v59 = vmul.f32 %v2742_v36, %v2723_v23 }
 0x25f   : > { %v5046_v33 = vadd.f32 %v1868_v47, %v4958_v61  ;;  %v5049_v62 = vadd.f32 %v1887_v21, %v4961_v16  ;;  %v2743_v61 = vperm.slane %v5043_v5, 2  ;;  %v2752_v16 = vmul.f32 %v2744_v38, %v2725_v48  ;;  %3683 = vmatmul.msk.bf16.vlgmr.msra.gmra.mxu2 %vm434_vm5, %v3792_v6  ;;  %v2731_v32 = vpop.permute.xlu1 %2730 }
 0x260   : > { %3685 = vmatmul.msk.bf16.vlgmr.msra.gmra.mxu3 %vm434_vm5, %v3792_v6  ;;  %v2753_v35 = vpack.c.bf16 %v2749_v54, %v2749_v54  ;;  %v2754_v17 = vpack.c.bf16 %v2750_v59, %v2750_v59 }
 0x261   : > { %3679 = vmatmul.msk.bf16.vlgmr.msra.gmra.mxu0 %vm434_vm5, %v3792_v6  ;;  %3681 = vmatmul.msk.bf16.vlgmr.msra.gmra.mxu1 %vm434_vm5, %v3792_v6  ;;  %v2756_v52 = vpack.c.bf16 %v2752_v16, %v2752_v16  ;;  %v2751_v34 = vmul.f32 %v2743_v61, %v2722_v63  ;;  %v3794_v6 = vld [vmem:[%s5508_s2 + $0x70] sm:$0xff] }
 0x262   : > { %v1906_v51 = vpop.f32.mrf.mxu2  ;;  %v2787_v27 = vsel %vm441_vm1, %v2753_v35, 0 }
 0x263   : > { %v1925_v56 = vpop.f32.mrf.mxu3  ;;  %v2755_v4 = vpack.c.bf16 %v2751_v34, %v2751_v34  ;;  %v5076_v25 = vadd.f32 %v1906_v51, %v4984_v41  ;;  %v2796_v28 = vsel %vm441_vm1, %v2756_v52, 0  ;;  %2805 = vmatpush.bf16.msra.mxu0 %v2787_v27  ;;  %v2790_v41 = vsel %vm441_vm1, %v2754_v17, 0 }
 0x264   : > { %v5079_v9 = vadd.f32 %v1925_v56, %v4987_v42  ;;  %2862 = vmatpush.bf16.msra.mxu3 %v2796_v28  ;;  %2824 = vmatpush.bf16.msra.mxu1 %v2790_v41  ;;  %v2733_v53 = vpop.permute.xlu2 %2732 }
 0x265   : > { %v2793_v12 = vsel %vm441_vm1, %v2755_v4, 0  ;;  %v2729_v8 = vpop.permute.xlu0 %2728 }
 0x266   : > { %v1870_v45 = vpop.f32.mrf.mxu0  ;;  %v1889_v49 = vpop.f32.mrf.mxu1  ;;  %2843 = vmatpush.bf16.msra.mxu2 %v2793_v12  ;;  %v2736_v48 = vsel %vm2721_vm11, %v2727_v26, %v2729_v8  ;;  %v2735_v16 = vsel %vm2721_vm11, %v2729_v8, %v2731_v32 }
 0x267   : > { %v5084_v1 = vadd.f32 %v1870_v45, %v4992_v7  ;;  %v5087_v39 = vadd.f32 %v1889_v49, %v4995_v37  ;;  %v3795_v45 = vld [vmem:[%s5508_s2 + $0x78] sm:$0xff] }
 0x26a   : > { %v1908_v42 = vpop.f32.mrf.mxu2 }
 0x26b   : > { %v1927_v58 = vpop.f32.mrf.mxu3  ;;  %v5095_v7 = vadd.f32 %v1908_v42, %v5003_v13 }
 0x26c   : > { %v5098_v37 = vadd.f32 %v1927_v58, %v5006_v60 }
 0x26e   : > { %v1873_v43 = vpop.f32.mrf.mxu0  ;;  %v1892_v29 = vpop.f32.mrf.mxu1 }
 0x26f   : > { %v5101_v44 = vadd.f32 %v1873_v43, %v5009_v10  ;;  %v5104_v19 = vadd.f32 %v1892_v29, %v5012_v0  ;;  %3684 = vmatmul.msk.bf16.gmra.mxu2 %vm434_vm5, %v3793_v24 }
 0x270   : > { %3686 = vmatmul.msk.bf16.gmra.mxu3 %vm434_vm5, %v3793_v24 }
 0x271   : > { %3680 = vmatmul.msk.bf16.gmra.mxu0 %vm434_vm5, %v3793_v24  ;;  %3682 = vmatmul.msk.bf16.gmra.mxu1 %vm434_vm5, %v3793_v24 }
 0x272   : > { %v1911_v13 = vpop.f32.mrf.mxu2 }
 0x273   : > { %v1930_v40 = vpop.f32.mrf.mxu3  ;;  %v5111_v60 = vadd.f32 %v1911_v13, %v5019_v57  ;;  %v3796_v13 = vld [vmem:[%s5507_s1 + $0x80] sm:$0xff] }
 0x274   : > { %v5114_v46 = vadd.f32 %v1930_v40, %v5022_v55 }
 0x276   : > { %v1875_v10 = vpop.f32.mrf.mxu0  ;;  %v1894_v14 = vpop.f32.mrf.mxu1 }
 0x277   : > { %v5117_v0 = vadd.f32 %v1875_v10, %v5025_v30  ;;  %v5120_v18 = vadd.f32 %v1894_v14, %v5028_v2 }
 0x27a   : > { %v1913_v20 = vpop.f32.mrf.mxu2 }
 0x27b   : > { %v1932_v15 = vpop.f32.mrf.mxu3  ;;  %v5126_v57 = vadd.f32 %v1913_v20, %v5034_v50  ;;  %v2737_v50 = vsel %vm2721_vm11, %v2733_v53, %v2727_v26 }
 0x27c   : > { %v5129_v55 = vadd.f32 %v1932_v15, %v5037_v3  ;;  %v2757_v3 = vmul.f32 %v2741_v11, %v2736_v48  ;;  %v2758_v11 = vmul.f32 %v2742_v36, %v2735_v16 }
 0x27e   : > { %v1993_v47 = vpop.f32.mrf.mxu0  ;;  %v2012_v21 = vpop.f32.mrf.mxu1  ;;  %v2761_v31 = vpack.c.bf16 %v2757_v3, %v2757_v3  ;;  %v2762_v35 = vpack.c.bf16 %v2758_v11, %v2758_v11  ;;  %v3015_v3 = vld [vmem:[%s5509_s3] sm:$0xff] }
 0x27f   : > { %v5132_v30 = vadd.f32 %v1993_v47, %v5046_v33  ;;  %v5135_v2 = vadd.f32 %v2012_v21, %v5049_v62  ;;  %v2760_v33 = vmul.f32 %v2744_v38, %v2737_v50  ;;  %v2734_v62 = vsel %vm2721_vm11, %v2731_v32, %v2733_v53  ;;  %3703 = vmatmul.msk.bf16.vlgmr.msrb.gmra.mxu2 %vm328_vm4, %v3794_v6 }
 0x280   : > { %3705 = vmatmul.msk.bf16.vlgmr.msrb.gmra.mxu3 %vm328_vm4, %v3794_v6  ;;  %v2759_v54 = vmul.f32 %v2743_v61, %v2734_v62  ;;  %v2912_v22 = vsel %vm335_vm3, %v2761_v31, 0  ;;  %v2915_v5 = vsel %vm335_vm3, %v2762_v35, 0  ;;  %v3906_v32 = vmov 0  }
 0x281   : > { %3699 = vmatmul.msk.bf16.vlgmr.msrb.gmra.mxu0 %vm328_vm4, %v3794_v6  ;;  %3701 = vmatmul.msk.bf16.vlgmr.msrb.gmra.mxu1 %vm328_vm4, %v3794_v6  ;;  %v2764_v63 = vpack.c.bf16 %v2760_v33, %v2760_v33 }
 0x282   : > { %v2763_v23 = vpack.c.bf16 %v2759_v54, %v2759_v54  ;;  %v2031_v38 = vpop.f32.mrf.mxu2  ;;  %2930 = vmatpush.bf16.msrb.mxu0 %v2912_v22  ;;  %2949 = vmatpush.bf16.msrb.mxu1 %v2915_v5 }
 0x283   : > { %v2050_v52 = vpop.f32.mrf.mxu3  ;;  %v2062_v59 = vadd.f32 %v2031_v38, %v5076_v25  ;;  %v2921_v17 = vsel %vm335_vm3, %v2764_v63, 0  ;;  %3818 = vset.pattern.permute.xlu1 %v3906_v32  ;;  %3820 = vset.pattern.permute.xlu0 %v3906_v32 }
 0x284   : > { %v2063_v34 = vadd.f32 %v2050_v52, %v5079_v9  ;;  %2987 = vmatpush.bf16.msrb.mxu3 %v2921_v17  ;;  %v2918_v36 = vsel %vm335_vm3, %v2763_v23, 0  ;;  %3021 = vperm.xlu1 %3818, %v3015_v3  }
 0x285   : > { %2968 = vmatpush.bf16.msrb.mxu2 %v2918_v36  ;;  %3819 = vset.pattern.permute.xlu2 %v3906_v32 }
 0x286   : > { %v1995_v51 = vpop.f32.mrf.mxu0  ;;  %v2014_v56 = vpop.f32.mrf.mxu1 }
 0x287   : > { %v2064_v61 = vadd.f32 %v1995_v51, %v5084_v1  ;;  %v2065_v4 = vadd.f32 %v2014_v56, %v5087_v39 }
 0x28a   : > { %v2033_v25 = vpop.f32.mrf.mxu2 }
 0x28b   : > { %v2052_v9 = vpop.f32.mrf.mxu3  ;;  %v2066_v49 = vadd.f32 %v2033_v25, %v5095_v7 }
 0x28c   : > { %v2067_v27 = vadd.f32 %v2052_v9, %v5098_v37 }
 0x28e   : > { %v1998_v28 = vpop.f32.mrf.mxu0  ;;  %v2017_v1 = vpop.f32.mrf.mxu1 }
 0x28f   : > { %v2068_v39 = vadd.f32 %v1998_v28, %v5101_v44  ;;  %v2069_v41 = vadd.f32 %v2017_v1, %v5104_v19  ;;  %3704 = vmatmul.msk.bf16.gmra.mxu2 %vm328_vm4, %v3795_v45  ;;  %v3018_v28 = vld [vmem:[%s5509_s3 + $0x18] sm:$0xff] }
 0x290   : > { %3706 = vmatmul.msk.bf16.gmra.mxu3 %vm328_vm4, %v3795_v45  ;;  %3036 = vperm.xlu0 %3820, %v3018_v28  }
 0x291   : > { %3700 = vmatmul.msk.bf16.gmra.mxu0 %vm328_vm4, %v3795_v45  ;;  %3702 = vmatmul.msk.bf16.gmra.mxu1 %vm328_vm4, %v3795_v45 }
 0x292   : > { %v2036_v12 = vpop.f32.mrf.mxu2 }
 0x293   : > { %v2055_v42 = vpop.f32.mrf.mxu3  ;;  %v2070_v58 = vadd.f32 %v2036_v12, %v5111_v60 }
 0x294   : > { %v2071_v24 = vadd.f32 %v2055_v42, %v5114_v46  ;;  %v3799_v42 = vld [vmem:[%s5508_s2 + $0x88] sm:$0xff] }
 0x296   : > { %v2000_v7 = vpop.f32.mrf.mxu0  ;;  %v2019_v37 = vpop.f32.mrf.mxu1 }
 0x297   : > { %v2072_v43 = vadd.f32 %v2000_v7, %v5117_v0  ;;  %v2073_v29 = vadd.f32 %v2019_v37, %v5120_v18 }
 0x29a   : > { %v2038_v44 = vpop.f32.mrf.mxu2 }
 0x29b   : > { %v2057_v19 = vpop.f32.mrf.mxu3  ;;  %v2074_v40 = vadd.f32 %v2038_v44, %v5126_v57 }
 0x29c   : > { %v2075_v10 = vadd.f32 %v2057_v19, %v5129_v55 }
 0x29e   : > { %v2181_v14 = vpop.f32.mrf.mxu0  ;;  %v2200_v60 = vpop.f32.mrf.mxu1 }
 0x29f   : > { %v2248_v46 = vadd.f32 %v2181_v14, %v5132_v30  ;;  %v2249_v26 = vadd.f32 %v2200_v60, %v5135_v2  ;;  %3724 = vmatmul.msk.bf16.vlgmr.msra.gmra.mxu2 %vm434_vm5, %v3796_v13  ;;  %v3797_v2 = vld [vmem:[%s5507_s1 + $0x88] sm:$0xff] }
 0x2a0   : > { %3726 = vmatmul.msk.bf16.vlgmr.msra.gmra.mxu3 %vm434_vm5, %v3796_v13 }
 0x2a1   : > { %3720 = vmatmul.msk.bf16.vlgmr.msra.gmra.mxu0 %vm434_vm5, %v3796_v13  ;;  %3722 = vmatmul.msk.bf16.vlgmr.msra.gmra.mxu1 %vm434_vm5, %v3796_v13 }
 0x2a2   : > { %v2219_v0 = vpop.f32.mrf.mxu2 }
 0x2a3   : > { %v2238_v18 = vpop.f32.mrf.mxu3  ;;  %v2250_v20 = vadd.f32 %v2219_v0, %v2062_v59 }
 0x2a4   : > { %v2251_v15 = vadd.f32 %v2238_v18, %v2063_v34  ;;  %v3798_v34 = vld [vmem:[%s5508_s2 + $0x80] sm:$0xff] }
 0x2a6   : > { %v2183_v6 = vpop.f32.mrf.mxu0  ;;  %v2202_v57 = vpop.f32.mrf.mxu1 }
 0x2a7   : > { %v2252_v55 = vadd.f32 %v2183_v6, %v2064_v61  ;;  %v2253_v47 = vadd.f32 %v2202_v57, %v2065_v4  ;;  %v3017_v61 = vld [vmem:[%s5509_s3 + $0x10] sm:$0xff] }
 0x2a8   : > { %3031 = vperm.xlu1 %3818, %v3017_v61  }
 0x2aa   : > { %v2221_v21 = vpop.f32.mrf.mxu2 }
 0x2ab   : > { %v2240_v30 = vpop.f32.mrf.mxu3  ;;  %v2254_v8 = vadd.f32 %v2221_v21, %v2066_v49 }
 0x2ac   : > { %v2255_v53 = vadd.f32 %v2240_v30, %v2067_v27 }
 0x2ae   : > { %v2186_v48 = vpop.f32.mrf.mxu0  ;;  %v2205_v50 = vpop.f32.mrf.mxu1 }
 0x2af   : > { %v2256_v33 = vadd.f32 %v2186_v48, %v2068_v39  ;;  %v2257_v62 = vadd.f32 %v2205_v50, %v2069_v41  ;;  %3725 = vmatmul.msk.bf16.gmra.mxu2 %vm434_vm5, %v3797_v2 }
 0x2b0   : > { %3727 = vmatmul.msk.bf16.gmra.mxu3 %vm434_vm5, %v3797_v2 }
 0x2b1   : > { %3721 = vmatmul.msk.bf16.gmra.mxu0 %vm434_vm5, %v3797_v2  ;;  %3723 = vmatmul.msk.bf16.gmra.mxu1 %vm434_vm5, %v3797_v2 }
 0x2b2   : > { %v2224_v16 = vpop.f32.mrf.mxu2 }
 0x2b3   : > { %v2243_v54 = vpop.f32.mrf.mxu3  ;;  %v2258_v31 = vadd.f32 %v2224_v16, %v2070_v58 }
 0x2b4   : > { %v2259_v63 = vadd.f32 %v2243_v54, %v2071_v24 }
 0x2b6   : > { %v2188_v11 = vpop.f32.mrf.mxu0  ;;  %v2207_v23 = vpop.f32.mrf.mxu1 }
 0x2b7   : > { %v2260_v38 = vadd.f32 %v2188_v11, %v2072_v43  ;;  %v2261_v52 = vadd.f32 %v2207_v23, %v2073_v29  ;;  %v3016_v43 = vld [vmem:[%s5509_s3 + $0x8] sm:$0xff] }
 0x2b8   : > { %3026 = vperm.xlu2 %3819, %v3016_v43  }
 0x2ba   : > { %v2226_v35 = vpop.f32.mrf.mxu2 }
 0x2bb   : > { %v2245_v59 = vpop.f32.mrf.mxu3  ;;  %v2262_v51 = vadd.f32 %v2226_v35, %v2074_v40 }
 0x2bc   : > { %v2263_v56 = vadd.f32 %v2245_v59, %v2075_v10 }
 0x2be   : > { %v2306_v22 = vpop.f32.mrf.mxu0  ;;  %v2325_v17 = vpop.f32.mrf.mxu1 }
 0x2bf   : > { %v2373_v4 = vadd.f32 %v2306_v22, %v2248_v46  ;;  %v2374_v5 = vadd.f32 %v2325_v17, %v2249_v26  ;;  %3744 = vmatmul.msk.bf16.vlgmr.msrb.gmra.mxu2 %vm328_vm4, %v3798_v34 }
 0x2c0   : > { %3746 = vmatmul.msk.bf16.vlgmr.msrb.gmra.mxu3 %vm328_vm4, %v3798_v34 }
 0x2c1   : > { %3740 = vmatmul.msk.bf16.vlgmr.msrb.gmra.mxu0 %vm328_vm4, %v3798_v34  ;;  %3742 = vmatmul.msk.bf16.vlgmr.msrb.gmra.mxu1 %vm328_vm4, %v3798_v34 }
 0x2c2   : > { %v2344_v36 = vpop.f32.mrf.mxu2 }
 0x2c3   : > { %v2363_v25 = vpop.f32.mrf.mxu3  ;;  %v2375_v9 = vadd.f32 %v2344_v36, %v2250_v20 }
 0x2c4   : > { %v2376_v45 = vadd.f32 %v2363_v25, %v2251_v15 }
 0x2c6   : > { %v2308_v49 = vpop.f32.mrf.mxu0  ;;  %v2327_v27 = vpop.f32.mrf.mxu1 }
 0x2c7   : > { %v2377_v1 = vadd.f32 %v2308_v49, %v2252_v55  ;;  %v2378_v39 = vadd.f32 %v2327_v27, %v2253_v47 }
 0x2ca   : > { %v2346_v41 = vpop.f32.mrf.mxu2 }
 0x2cb   : > { %v2365_v12 = vpop.f32.mrf.mxu3  ;;  %v2379_v58 = vadd.f32 %v2346_v41, %v2254_v8 }
 0x2cc   : > { %v2380_v24 = vadd.f32 %v2365_v12, %v2255_v53 }
 0x2ce   : > { %v2311_v7 = vpop.f32.mrf.mxu0  ;;  %v2330_v37 = vpop.f32.mrf.mxu1 }
 0x2cf   : > { %v2381_v29 = vadd.f32 %v2311_v7, %v2256_v33  ;;  %v2382_v44 = vadd.f32 %v2330_v37, %v2257_v62  ;;  %3745 = vmatmul.msk.bf16.gmra.mxu2 %vm328_vm4, %v3799_v42 }
 0x2d0   : > { %3747 = vmatmul.msk.bf16.gmra.mxu3 %vm328_vm4, %v3799_v42 }
 0x2d1   : > { %3741 = vmatmul.msk.bf16.gmra.mxu0 %vm328_vm4, %v3799_v42  ;;  %3743 = vmatmul.msk.bf16.gmra.mxu1 %vm328_vm4, %v3799_v42 }
 0x2d2   : > { %v2349_v19 = vpop.f32.mrf.mxu2 }
 0x2d3   : > { %v2368_v13 = vpop.f32.mrf.mxu3  ;;  %v2383_v40 = vadd.f32 %v2349_v19, %v2258_v31 }
 0x2d4   : > { %v2384_v10 = vadd.f32 %v2368_v13, %v2259_v63 }
 0x2d6   : > { %v2313_v14 = vpop.f32.mrf.mxu0  ;;  %v2332_v60 = vpop.f32.mrf.mxu1 }
 0x2d7   : > { %v2385_v46 = vadd.f32 %v2313_v14, %v2260_v38  ;;  %v2386_v26 = vadd.f32 %v2332_v60, %v2261_v52 }
 0x2da   : > { %v2351_v0 = vpop.f32.mrf.mxu2 }
 0x2db   : > { %v2370_v18 = vpop.f32.mrf.mxu3  ;;  %v2387_v20 = vadd.f32 %v2351_v0, %v2262_v51 }
 0x2dc   : > { %v2388_v15 = vadd.f32 %v2370_v18, %v2263_v56 }
 0x2de   : > { %v2494_v6 = vpop.f32.mrf.mxu0  ;;  %v2513_v57 = vpop.f32.mrf.mxu1 }
 0x2df   : > { %v2561_v55 = vadd.f32 %v2494_v6, %v2373_v4  ;;  %v2562_v47 = vadd.f32 %v2513_v57, %v2374_v5 }
 0x2e2   : > { %v2532_v21 = vpop.f32.mrf.mxu2 }
 0x2e3   : > { %v2551_v30 = vpop.f32.mrf.mxu3  ;;  %v2563_v2 = vadd.f32 %v2532_v21, %v2375_v9 }
 0x2e4   : > { %v2564_v8 = vadd.f32 %v2551_v30, %v2376_v45 }
 0x2e6   : > { %v2496_v53 = vpop.f32.mrf.mxu0  ;;  %v2515_v48 = vpop.f32.mrf.mxu1 }
 0x2e7   : > { %v5224_v50 = vadd.f32 %v2496_v53, %v2377_v1  ;;  %v5226_v32 = vadd.f32 %v2515_v48, %v2378_v39 }
 0x2ea   : > { %v2534_v3 = vpop.f32.mrf.mxu2 }
 0x2eb   : > { %v2553_v33 = vpop.f32.mrf.mxu3  ;;  %v5228_v62 = vadd.f32 %v2534_v3, %v2379_v58 }
 0x2ec   : > { %v5230_v16 = vadd.f32 %v2553_v33, %v2380_v24 }
 0x2ee   : > { %v2518_v54 = vpop.f32.mrf.mxu1  ;;  %v2499_v31 = vpop.f32.mrf.mxu0 }
 0x2ef   : > { %v2570_v63 = vadd.f32 %v2518_v54, %v2382_v44  ;;  %v2569_v11 = vadd.f32 %v2499_v31, %v2381_v29 }
 0x2f2   : > { %v2537_v23 = vpop.f32.mrf.mxu2 }
 0x2f3   : > { %v2556_v38 = vpop.f32.mrf.mxu3  ;;  %v2571_v52 = vadd.f32 %v2537_v23, %v2383_v40 }
 0x2f4   : > { %v2572_v35 = vadd.f32 %v2556_v38, %v2384_v10 }
 0x2f6   : > { %v2501_v59 = vpop.f32.mrf.mxu0  ;;  %v2520_v34 = vpop.f32.mrf.mxu1 }
 0x2f7   : > { %v2573_v51 = vadd.f32 %v2501_v59, %v2385_v46  ;;  %v2574_v56 = vadd.f32 %v2520_v34, %v2386_v26  ;;  %v3022_v3 = vpop.permute.xlu1 %3021 }
 0x2fa   : > { %v2539_v22 = vpop.f32.mrf.mxu2 }
 0x2fb   : > { %v2558_v17 = vpop.f32.mrf.mxu3  ;;  %v2575_v61 = vadd.f32 %v2539_v22, %v2387_v20 }
 0x2fc   : > { %v2576_v4 = vadd.f32 %v2558_v17, %v2388_v15 }
 0x2fe   : > { %v2619_v5 = vpop.f32.mrf.mxu0  ;;  %v2638_v36 = vpop.f32.mrf.mxu1 }
 0x2ff   : > { %v2686_v25 = vadd.f32 %v2619_v5, %v2561_v55  ;;  %v2687_v9 = vadd.f32 %v2638_v36, %v2562_v47 }
 0x302   : > { %v2657_v45 = vpop.f32.mrf.mxu2 }
 0x303   : > { %v2676_v49 = vpop.f32.mrf.mxu3  ;;  %v2688_v27 = vadd.f32 %v2657_v45, %v2563_v2 }
 0x304   : > { %v2689_v28 = vadd.f32 %v2676_v49, %v2564_v8 }
 0x306   : > { %v2621_v1 = vpop.f32.mrf.mxu0  ;;  %v2640_v39 = vpop.f32.mrf.mxu1 }
 0x307   : > { %v2690_v34 = vadd.f32 %v2621_v1, %v5224_v50 }
 0x30a   : > { %v5232_v41 = vpop.f32.mrf.mxu2 }
 0x30b   : > { %v5234_v12 = vpop.f32.mrf.mxu3 }
 0x30e   : > { %v2624_v42 = vpop.f32.mrf.mxu0  ;;  %v2643_v58 = vpop.f32.mrf.mxu1 }
 0x30f   : > { %v5236_v24 = vadd.f32 %v2624_v42, %v2569_v11  ;;  %v5238_v7 = vadd.f32 %v2643_v58, %v2570_v63 }
 0x312   : > { %v2662_v37 = vpop.f32.mrf.mxu2 }
 0x313   : > { %v2681_v43 = vpop.f32.mrf.mxu3  ;;  %v5240_v29 = vadd.f32 %v2662_v37, %v2571_v52 }
 0x314   : > { %v5242_v44 = vadd.f32 %v2681_v43, %v2572_v35 }
 0x316   : > { %v2626_v19 = vpop.f32.mrf.mxu0  ;;  %v2645_v13 = vpop.f32.mrf.mxu1 }
 0x317   : > { %v5244_v40 = vadd.f32 %v2626_v19, %v2573_v51  ;;  %v5246_v10 = vadd.f32 %v2645_v13, %v2574_v56  ;;  %v2691_v51 = vadd.f32 %v2640_v39, %v5226_v32  ;;  %v2692_v32 = vadd.f32 %v5232_v41, %v5228_v62 }
 0x318   : > { %v2693_v39 = vadd.f32 %v5234_v12, %v5230_v16 }
 0x31a   : > { %v2664_v14 = vpop.f32.mrf.mxu2 }
 0x31b   : > { %v2683_v60 = vpop.f32.mrf.mxu3  ;;  %v5248_v46 = vadd.f32 %v2664_v14, %v2575_v61 }
 0x31c   : > { %v5250_v26 = vadd.f32 %v2683_v60, %v2576_v4  ;;  %v3027_v4 = vpop.permute.xlu2 %3026 }
 0x31e   : > { %v2807_v0 = vpop.f32.mrf.mxu0  ;;  %v2826_v18 = vpop.f32.mrf.mxu1 }
 0x31f   : > { %v2874_v33 = vadd.f32 %v2807_v0, %v2686_v25  ;;  %v2875_v54 = vadd.f32 %v2826_v18, %v2687_v9 }
 0x322   : > { %v2845_v20 = vpop.f32.mrf.mxu2 }
 0x323   : > { %v2864_v15 = vpop.f32.mrf.mxu3  ;;  %v2876_v17 = vadd.f32 %v2845_v20, %v2688_v27 }
 0x324   : > { %v2877_v61 = vadd.f32 %v2864_v15, %v2689_v28 }
 0x326   : > { %v2809_v6 = vpop.f32.mrf.mxu0  ;;  %v2828_v57 = vpop.f32.mrf.mxu1 }
 0x327   : > { %v2878_v5 = vadd.f32 %v2809_v6, %v2690_v34  ;;  %v2879_v36 = vadd.f32 %v2828_v57, %v2691_v51 }
 0x32a   : > { %v2847_v55 = vpop.f32.mrf.mxu2 }
 0x32b   : > { %v2866_v47 = vpop.f32.mrf.mxu3  ;;  %v2880_v60 = vadd.f32 %v2847_v55, %v2692_v32 }
 0x32c   : > { %v2881_v18 = vadd.f32 %v2866_v47, %v2693_v39 }
 0x32e   : > { %v2812_v21 = vpop.f32.mrf.mxu0  ;;  %v2831_v30 = vpop.f32.mrf.mxu1 }
 0x32f   : > { %v2883_v47 = vadd.f32 %v2831_v30, %v5238_v7 }
 0x332   : > { %v5252_v2 = vpop.f32.mrf.mxu2 }
 0x333   : > { %v5254_v8 = vpop.f32.mrf.mxu3 }
 0x336   : > { %v5256_v53 = vpop.f32.mrf.mxu0  ;;  %v5258_v48 = vpop.f32.mrf.mxu1 }
 0x337   : > { %v5290_v51 = vadd.f32 %v5256_v53, %v5244_v40 }
 0x33a   : > { %v5260_v31 = vpop.f32.mrf.mxu2 }
 0x33b   : > { %v5262_v63 = vpop.f32.mrf.mxu3 }
 0x33e   : > { %v2932_v11 = vpop.f32.mrf.mxu0  ;;  %v2951_v23 = vpop.f32.mrf.mxu1 }
 0x33f   : > { %v2999_v38 = vadd.f32 %v2932_v11, %v2874_v33  ;;  %v3000_v52 = vadd.f32 %v2951_v23, %v2875_v54 }
 0x341   : > { %v3039_v35 = vadd.f32 %v3022_v3, %v2999_v38  ;;  %v3040_v59 = vadd.f32 %v3022_v3, %v3000_v52  ;;  %v2884_v38 = vadd.f32 %v5252_v2, %v5240_v29  ;;  %v5294_v29 = vadd.f32 %v5258_v48, %v5246_v10 }
 0x342   : > { %v2970_v25 = vpop.f32.mrf.mxu2 }
 0x343   : > { %v3748_v56 = vmul.f32 -1.442695, %v3039_v35  ;;  %v3749_v22 = vmul.f32 -1.442695, %v3040_v59  ;;  %v2989_v9 = vpop.f32.mrf.mxu3  ;;  %v3001_v45 = vadd.f32 %v2970_v25, %v2876_v17  ;;  %v5284_v35 = vadd.f32 %v5254_v8, %v5242_v44 }
 0x344   : > { %v3002_v49 = vadd.f32 %v2989_v9, %v2877_v61  ;;  %v5302_v44 = vadd.f32 %v5260_v31, %v5248_v46 }
 0x345   : > { %3821 = vpow2.f32 %v3748_v56  ;;  %v3041_v50 = vadd.f32 %v3022_v3, %v3001_v45 }
 0x346   : > { %3823 = vpow2.f32 %v3749_v22  ;;  %v2934_v42 = vpop.f32.mrf.mxu0  ;;  %v2953_v58 = vpop.f32.mrf.mxu1  ;;  %v3042_v1 = vadd.f32 %v3022_v3, %v3002_v49  ;;  %v2882_v3 = vadd.f32 %v2812_v21, %v5236_v24 }
 0x347   : > { %v3003_v37 = vadd.f32 %v2934_v42, %v2878_v5  ;;  %v3004_v43 = vadd.f32 %v2953_v58, %v2879_v36  ;;  %v3750_v19 = vmul.f32 -1.442695, %v3041_v50  ;;  %v5280_v24 = vpop.permute.xlu1 %3031 }
 0x348   : > { %v3751_v13 = vmul.f32 -1.442695, %v3042_v1 }
 0x349   : > { %v3043_v27 = vadd.f32 %v3027_v4, %v3003_v37  ;;  %v3044_v28 = vadd.f32 %v3027_v4, %v3004_v43  ;;  %3825 = vpow2.f32 %v3750_v19 }
 0x34a   : > { %3827 = vpow2.f32 %v3751_v13  ;;  %v2972_v62 = vpop.f32.mrf.mxu2 }
 0x34b   : > { %v3822_v14 = vpop.eup %3821  ;;  %v3752_v15 = vmul.f32 -1.442695, %v3043_v27  ;;  %v3753_v57 = vmul.f32 -1.442695, %v3044_v28  ;;  %v2991_v41 = vpop.f32.mrf.mxu3  ;;  %v3005_v16 = vadd.f32 %v2972_v62, %v2880_v60 }
 0x34c   : > { %v3824_v0 = vpop.eup %3823  ;;  %v5270_v20 = vadd.f32 1.0, %v3822_v14  ;;  %v3006_v12 = vadd.f32 %v2991_v41, %v2881_v18 }
 0x34d   : > { %v5272_v6 = vadd.f32 1.0, %v3824_v0  ;;  %v3045_v54 = vadd.f32 %v3027_v4, %v3005_v16 }
 0x34e   : > { %3829 = vrcp.f32 %v5270_v20  ;;  %v2937_v33 = vpop.f32.mrf.mxu0  ;;  %v2956_v55 = vpop.f32.mrf.mxu1  ;;  %v3046_v11 = vadd.f32 %v3027_v4, %v3006_v12  ;;  %v3080_v7 = vand.u32 2147483647, %v5270_v20  ;;  %v3082_v30 = vand.u32 2147483648, %v5270_v20 }
 0x34f   : > { %3831 = vrcp.f32 %v5272_v6  ;;  %v3007_v23 = vadd.f32 %v2937_v33, %v2882_v3  ;;  %v3008_v52 = vadd.f32 %v2956_v55, %v2883_v47  ;;  %v3826_v21 = vpop.eup %3825  ;;  %v3754_v59 = vmul.f32 -1.442695, %v3045_v54 }
 0x350   : > { %3833 = vpow2.f32 %v3752_v15  ;;  %v3828_v34 = vpop.eup %3827  ;;  %v5296_v2 = vadd.f32 1.0, %v3826_v21  ;;  %v3755_v56 = vmul.f32 -1.442695, %v3046_v11  ;;  %vm3076_vm12 = vweird.f32 %v5270_v20 }
 0x351   : > { %3835 = vpow2.f32 %v3753_v57  ;;  %v5304_v8 = vadd.f32 1.0, %v3828_v34  ;;  %v3047_v17 = vadd.f32 %v5280_v24, %v3007_v23  ;;  %v3048_v10 = vadd.f32 %v5280_v24, %v3008_v52 }
 0x352   : > { %3837 = vpow2.f32 %v3754_v59  ;;  %vm5314_vm13 = vcmp.eq.f32.partialorder %v3080_v7, 8.507059e+37  ;;  %v3083_v31 = vor.u32 1.1754944e-38, %v3082_v30  ;;  %v3095_v4 = vand.u32 2147483647, %v5272_v6  ;;  %v2975_v37 = vpop.f32.mrf.mxu2 }
 0x353   : > { %3839 = vrcp.f32 %v5296_v2  ;;  %vm3091_vm14 = vweird.f32 %v5272_v6  ;;  %v3097_v49 = vand.u32 2147483648, %v5272_v6  ;;  %v3009_v18 = vadd.f32 %v2975_v37, %v2884_v38 }
 0x354   : > { %v5298_v22 = vpop.eup %3829  ;;  %3841 = vrcp.f32 %v5304_v8  ;;  %vm5330_vm1 = vcmp.eq.f32.partialorder %v3095_v4, 8.507059e+37  ;;  %vm3106_vm4 = vweird.f32 %v5296_v2 }
 0x355   : > { %v3832_v40 = vpop.eup %3831  ;;  %v3072_v53 = vmul.f32 %v5298_v22, %v5270_v20  ;;  %3843 = vpow2.f32 %v3755_v56  ;;  %vm3077_vm15 = vweird.f32 %v5298_v22  ;;  %v3098_v0 = vor.u32 1.1754944e-38, %v3097_v49 }
 0x356   : > { %v3834_v48 = vpop.eup %3833  ;;  %v3087_v61 = vmul.f32 %v3832_v40, %v5272_v6  ;;  %3845 = vtanh.f32 %v3047_v17  ;;  %vm3092_vm0 = vweird.f32 %v3832_v40  ;;  %vm5346_vm2 = vmor %vm3076_vm12, %vm3077_vm15  ;;  %v3112_v49 = vand.u32 2147483648, %v5296_v2 }
 0x357   : > { %v3836_v5 = vpop.eup %3835  ;;  %v3073_v36 = vsub.f32 1.0, %v3072_v53  ;;  %v5319_v25 = vadd.f32 1.0, %v3834_v48  ;;  %vm3093_vm3 = vmor %vm3091_vm14, %vm3092_vm0  ;;  %v3049_v48 = vadd.f32 %v5280_v24, %v3009_v18 }
 0x358   : > { %v3088_v9 = vsub.f32 1.0, %v3087_v61  ;;  %v5322_v45 = vadd.f32 1.0, %v3836_v5  ;;  %v3838_v43 = vpop.eup %3837 }
 0x359   : > { %3847 = vrcp.f32 %v5319_v25  ;;  %v3158_v42 = vand.u32 2147483648, %v5319_v25  ;;  %v3074_v58 = vmul.f32 %v5298_v22, %v3073_v36  ;;  %v5334_v32 = vpop.eup %3839  ;;  %v5337_v28 = vadd.f32 1.0, %v3838_v43 }
 0x35a   : > { %3849 = vrcp.f32 %v5322_v45  ;;  %v3089_v50 = vmul.f32 %v3832_v40, %v3088_v9  ;;  %v3173_v27 = vand.u32 2147483648, %v5322_v45  ;;  %v5340_v19 = vpop.eup %3841  ;;  %v3102_v13 = vmul.f32 %v5334_v32, %v5296_v2 }
 0x35b   : > { %v3075_v39 = vadd.f32 %v5298_v22, %v3074_v58  ;;  %3851 = vtanh.f32 %v3048_v10  ;;  %v3844_v15 = vpop.eup %3843  ;;  %v5352_v57 = vmul.f32 %v5340_v19, %v5304_v8  ;;  %v5354_v62 = vor.u32 1.1754944e-38, %v3158_v42 }
 0x35c   : > { %v3090_v60 = vadd.f32 %v3832_v40, %v3089_v50  ;;  %3853 = vrcp.f32 %v5337_v28  ;;  %v3188_v41 = vand.u32 2147483648, %v5337_v28  ;;  %v3846_v20 = vpop.eup %3845  ;;  %vm3152_vm5 = vweird.f32 %v5319_v25  ;;  %v2994_v50 = vpop.f32.mrf.mxu3 }
 0x35d   : > { %v5363_v3 = vadd.f32 1.0, %v3844_v15  ;;  %v3079_v16 = vsel %vm5346_vm2, %v5298_v22, %v3075_v39  ;;  %v3156_v33 = vand.u32 2147483647, %v5319_v25  ;;  %v3103_v47 = vsub.f32 1.0, %v3102_v13 }
 0x35e   : > { %v3094_v12 = vsel %vm3093_vm3, %v3832_v40, %v3090_v60  ;;  %vm3167_vm6 = vweird.f32 %v5322_v45  ;;  %v3174_v6 = vor.u32 1.1754944e-38, %v3173_v27  ;;  %v3084_v54 = vsel %vm5314_vm13, %v3083_v31, %v3079_v16  ;;  %v3287_v27 = vld [vmem:[#allocation3] sm:$0xff] }
 0x35f   : > { %v3848_v55 = vpop.eup %3847  ;;  %v3099_v11 = vsel %vm5330_vm1, %v3098_v0, %v3094_v12  ;;  %v3118_v38 = vsub.f32 1.0, %v5352_v57  ;;  %3855 = vrcp.f32 %v5363_v3  ;;  %v3171_v21 = vand.u32 2147483647, %v5322_v45 }
 0x360   : > { %v3850_v23 = vpop.eup %3849  ;;  %v3148_v52 = vmul.f32 %v3848_v55, %v5319_v25  ;;  %vm3153_vm7 = vweird.f32 %v3848_v55  ;;  %v3189_v30 = vor.u32 1.1754944e-38, %v3188_v41  ;;  %vm3182_vm9 = vweird.f32 %v5337_v28  ;;  %v3288_v25 = vld [vmem:[#allocation3 + $0x18] sm:$0xff] }
 0x361   : > { %v3852_v59 = vpop.eup %3851  ;;  %v3163_v7 = vmul.f32 %v3850_v23, %v5322_v45  ;;  %vm3168_vm8 = vweird.f32 %v3850_v23  ;;  %v3203_v56 = vand.u32 2147483648, %v5363_v3  ;;  %v3295_v22 = vmul.f32 %v3846_v20, %v3084_v54  ;;  %vm3154_vm15 = vmor %vm3152_vm5, %vm3153_vm7 }
 0x362   : > { %v3149_v34 = vsub.f32 1.0, %v3148_v52  ;;  %v3296_v17 = vmul.f32 %v3852_v59, %v3099_v11  ;;  %v3854_v40 = vpop.eup %3853  ;;  %vm5381_vm10 = vcmp.eq.f32.partialorder %v3156_v33, 8.507059e+37  ;;  %v3104_v61 = vmul.f32 %v5334_v32, %v3103_v47  ;;  %vm3169_vm0 = vmor %vm3167_vm6, %vm3168_vm8  ;;  %v3289_v33 = vld [vmem:[#allocation3 + $0x8] sm:$0xff] }
 0x363   : > { %v3164_v53 = vsub.f32 1.0, %v3163_v7  ;;  %v3178_v31 = vmul.f32 %v3854_v40, %v5337_v28  ;;  %vm5388_vm11 = vcmp.eq.f32.partialorder %v3171_v21, 8.507059e+37  ;;  %vm3107_vm12 = vweird.f32 %v5334_v32  ;;  %v2939_v21 = vpop.f32.mrf.mxu0 }
 0x364   : > { %v3150_v46 = vmul.f32 %v3848_v55, %v3149_v34  ;;  %v3105_v36 = vadd.f32 %v5334_v32, %v3104_v61  ;;  %v3110_v9 = vand.u32 2147483647, %v5296_v2  ;;  %vm3183_vm13 = vweird.f32 %v3854_v40  ;;  %vm5400_vm14 = vmor %vm3106_vm4, %vm3107_vm12  ;;  %v2996_v61 = vpop.f32.mrf.mxu3 }
 0x365   : > { %v3165_v5 = vmul.f32 %v3850_v23, %v3164_v53  ;;  %v5396_v42 = vpop.eup %3855  ;;  %v3179_v58 = vsub.f32 1.0, %v3178_v31  ;;  %3857 = vtanh.f32 %v3049_v48  ;;  %v3186_v2 = vand.u32 2147483647, %v5337_v28  ;;  %vm3184_vm3 = vmor %vm3182_vm9, %vm3183_vm13  ;;  %v3290_v31 = vld [vmem:[#allocation3 + $0x10] sm:$0xff] }
 0x366   : > { %v3151_v37 = vadd.f32 %v3848_v55, %v3150_v46  ;;  %v3193_v1 = vmul.f32 %v5396_v42, %v5363_v3  ;;  %v3109_v13 = vsel %vm5400_vm14, %v5334_v32, %v3105_v36  ;;  %vm3198_vm1 = vweird.f32 %v5396_v42 }
 0x367   : > { %v3166_v39 = vadd.f32 %v3850_v23, %v3165_v5  ;;  %v3180_v14 = vmul.f32 %v3854_v40, %v3179_v58  ;;  %v3113_v0 = vor.u32 1.1754944e-38, %v3112_v49  ;;  %vm3111_vm2 = vcmp.eq.f32.partialorder %v3110_v9, 8.507059e+37 }
 0x368   : > { %v3155_v60 = vsel %vm3154_vm15, %v3848_v55, %v3151_v37  ;;  %v3194_v18 = vsub.f32 1.0, %v3193_v1  ;;  %v3010_v55 = vadd.f32 %v2994_v50, %v5284_v35  ;;  %vm3187_vm4 = vcmp.eq.f32.partialorder %v3186_v2, 8.507059e+37 }
 0x369   : > { %v3160_v15 = vsel %vm5381_vm10, %v5354_v62, %v3155_v60  ;;  %v3170_v57 = vsel %vm3169_vm0, %v3850_v23, %v3166_v39  ;;  %v3114_v20 = vsel %vm3111_vm2, %v3113_v0, %v3109_v13  ;;  %v3181_v45 = vadd.f32 %v3854_v40, %v3180_v14 }
 0x36a   : > { %v3175_v32 = vsel %vm5388_vm11, %v3174_v6, %v3170_v57  ;;  %v3291_v41 = vmul.f32 %v3287_v27, %v3160_v15  ;;  %v3195_v16 = vmul.f32 %v5396_v42, %v3194_v18  ;;  %v3119_v62 = vmul.f32 %v5340_v19, %v3118_v38 }
 0x36b   : > { %v3292_v12 = vmul.f32 %v3288_v25, %v3175_v32  ;;  %v3858_v47 = vpop.eup %3857  ;;  %v3185_v11 = vsel %vm3184_vm3, %v3854_v40, %v3181_v45  ;;  %vm3122_vm5 = vweird.f32 %v5340_v19  ;;  %v3050_v52 = vadd.f32 %v5280_v24, %v3010_v55 }
 0x36c   : > { %v5428_v54 = vadd.f32 %v3295_v22, %v3291_v41  ;;  %v3190_v23 = vsel %vm3187_vm4, %v3189_v30, %v3185_v11  ;;  %v3297_v28 = vmul.f32 %v3858_v47, %v3114_v20  ;;  %vm3197_vm6 = vweird.f32 %v5363_v3  ;;  %v2958_v22 = vpop.f32.mrf.mxu1 }
 0x36d   : > { %v5431_v6 = vadd.f32 %v3296_v17, %v3292_v12  ;;  %v3293_v35 = vmul.f32 %v3289_v33, %v3190_v23  ;;  %v3120_v38 = vadd.f32 %v5340_v19, %v3119_v62  ;;  %vm3121_vm7 = vweird.f32 %v5304_v8  ;;  %vm5440_vm8 = vmor %vm3197_vm6, %vm3198_vm1  ;;  %v2977_v17 = vpop.f32.mrf.mxu2 }
 0x36e   : > { %3311 = vst [vmem:[#allocation3] sm:$0xff] %v5428_v54  ;;  %v3125_v24 = vand.u32 2147483647, %v5304_v8  ;;  %v3127_v7 = vand.u32 2147483648, %v5304_v8  ;;  %v3196_v30 = vadd.f32 %v5396_v42, %v3195_v16  ;;  %v3201_v34 = vand.u32 2147483647, %v5363_v3  ;;  %vm5455_vm9 = vmor %vm3121_vm7, %vm3122_vm5  ;;  %v3037_v8 = vpop.permute.xlu0 %3036 }
 0x36f   : > { %3312 = vst [vmem:[#allocation3 + $0x18] sm:$0xff] %v5431_v6  ;;  %v2889_v40 = vadd.f32 %v5262_v63, %v5250_v26  ;;  %v3204_v53 = vor.u32 1.1754944e-38, %v3203_v56  ;;  %v3301_v10 = vadd.f32 %v3297_v28, %v3293_v35  ;;  %3859 = vtanh.f32 %v3050_v52 }
 0x370   : > { %v3124_v46 = vsel %vm5455_vm9, %v5340_v19, %v3120_v38  ;;  %v3200_v26 = vsel %vm5440_vm8, %v5396_v42, %v3196_v30  ;;  %vm3202_vm10 = vcmp.eq.f32.partialorder %v3201_v34, 8.507059e+37  ;;  %v3011_v63 = vadd.f32 %v2939_v21, %v5290_v51 }
 0x371   : > { %3313 = vst [vmem:[#allocation3 + $0x8] sm:$0xff] %v3301_v10  ;;  %v3128_v3 = vor.u32 1.1754944e-38, %v3127_v7  ;;  %v3205_v56 = vsel %vm3202_vm10, %v3204_v53, %v3200_v26  ;;  %v3012_v4 = vadd.f32 %v2958_v22, %v5294_v29  ;;  %v3013_v5 = vadd.f32 %v2977_v17, %v5302_v44 }
 0x372   : > { %vm3126_vm11 = vcmp.eq.f32.partialorder %v3125_v24, 8.507059e+37  ;;  %v3051_v36 = vadd.f32 %v3037_v8, %v3011_v63  ;;  %v3014_v9 = vadd.f32 %v2996_v61, %v2889_v40  ;;  %v3294_v37 = vmul.f32 %v3290_v31, %v3205_v56 }
 0x373   : > { %v3129_v49 = vsel %vm3126_vm11, %v3128_v3, %v3124_v46  ;;  %v3052_v19 = vadd.f32 %v3037_v8, %v3012_v4  ;;  %v3053_v58 = vadd.f32 %v3037_v8, %v3013_v5 }
 0x374   : > { %v3756_v43 = vmul.f32 -1.442695, %v3051_v36  ;;  %v3054_v42 = vadd.f32 %v3037_v8, %v3014_v9 }
 0x375   : > { %v3860_v50 = vpop.eup %3859  ;;  %v3757_v1 = vmul.f32 -1.442695, %v3052_v19  ;;  %v3758_v51 = vmul.f32 -1.442695, %v3053_v58 }
 0x376   : > { %v3298_v27 = vmul.f32 %v3860_v50, %v3129_v49  ;;  %3861 = vpow2.f32 %v3756_v43  ;;  %v3759_v39 = vmul.f32 -1.442695, %v3054_v42 }
 0x377   : > { %3863 = vpow2.f32 %v3757_v1 }
 0x378   : > { %v3302_v13 = vadd.f32 %v3298_v27, %v3294_v37  ;;  %3865 = vpow2.f32 %v3758_v51 }
 0x379   : > { %3867 = vpow2.f32 %v3759_v39 }
 0x37a   : > { %3314 = vst [vmem:[#allocation3 + $0x10] sm:$0xff] %v3302_v13 }
 0x37c   : > { %v3862_v29 = vpop.eup %3861 }
 0x37d   : > { %v3864_v44 = vpop.eup %3863  ;;  %v3223_v2 = vadd.f32 1.0, %v3862_v29 }
 0x37e   : > { %v3866_v14 = vpop.eup %3865  ;;  %v3224_v25 = vadd.f32 1.0, %v3864_v44 }
 0x37f   : > { %v3868_v60 = vpop.eup %3867  ;;  %3869 = vrcp.f32 %v3223_v2  ;;  %v5468_v0 = vadd.f32 1.0, %v3866_v14  ;;  %v3236_v57 = vand.u32 2147483647, %v3223_v2  ;;  %v3238_v20 = vand.u32 2147483648, %v3223_v2 }
 0x380   : > { %3871 = vrcp.f32 %v3224_v25  ;;  %v5470_v18 = vadd.f32 1.0, %v3868_v60  ;;  %v3251_v16 = vand.u32 2147483647, %v3224_v25  ;;  %v3253_v33 = vand.u32 2147483648, %v3224_v25 }
 0x381   : > { %3873 = vrcp.f32 %v5468_v0  ;;  %vm3232_vm12 = vweird.f32 %v3223_v2  ;;  %vm5476_vm13 = vcmp.eq.f32.partialorder %v3236_v57, 8.507059e+37  ;;  %vm3247_vm14 = vweird.f32 %v3224_v25 }
 0x382   : > { %3875 = vrcp.f32 %v5470_v18  ;;  %vm5481_vm1 = vcmp.eq.f32.partialorder %v3251_v16, 8.507059e+37  ;;  %v3254_v24 = vor.u32 1.1754944e-38, %v3253_v33  ;;  %v3266_v30 = vand.u32 2147483647, %v5468_v0 }
 0x383   : > { %3877 = vtanh.f32 %v5428_v54  ;;  %v3268_v17 = vand.u32 2147483648, %v5468_v0  ;;  %v3281_v53 = vand.u32 2147483647, %v5470_v18  ;;  %v3283_v61 = vand.u32 2147483648, %v5470_v18 }
 0x384   : > { %3879 = vtanh.f32 %v5431_v6  ;;  %v3239_v6 = vor.u32 1.1754944e-38, %v3238_v20  ;;  %vm3262_vm6 = vweird.f32 %v5468_v0  ;;  %vm3277_vm8 = vweird.f32 %v5470_v18 }
 0x385   : > { %v3870_v15 = vpop.eup %3869  ;;  %3881 = vtanh.f32 %v3301_v10  ;;  %v3269_v5 = vor.u32 1.1754944e-38, %v3268_v17  ;;  %vm3267_vm9 = vcmp.eq.f32.partialorder %v3266_v30, 8.507059e+37  ;;  %v3284_v49 = vor.u32 1.1754944e-38, %v3283_v61 }
 0x386   : > { %v3872_v32 = vpop.eup %3871  ;;  %v3228_v41 = vmul.f32 %v3870_v15, %v3223_v2  ;;  %3883 = vtanh.f32 %v3302_v13  ;;  %vm3233_vm15 = vweird.f32 %v3870_v15  ;;  %vm3282_vm11 = vcmp.eq.f32.partialorder %v3281_v53, 8.507059e+37 }
 0x387   : > { %v3243_v45 = vmul.f32 %v3872_v32, %v3224_v25  ;;  %v3874_v55 = vpop.eup %3873  ;;  %vm3248_vm0 = vweird.f32 %v3872_v32  ;;  %vm3234_vm2 = vmor %vm3232_vm12, %vm3233_vm15 }
 0x388   : > { %v3229_v12 = vsub.f32 1.0, %v3228_v41  ;;  %v3876_v54 = vpop.eup %3875  ;;  %v3258_v23 = vmul.f32 %v3874_v55, %v5468_v0  ;;  %vm3249_vm3 = vmor %vm3247_vm14, %vm3248_vm0  ;;  %vm3263_vm4 = vweird.f32 %v3874_v55 }
 0x389   : > { %v3244_v47 = vsub.f32 1.0, %v3243_v45  ;;  %v3878_v28 = vpop.eup %3877  ;;  %v3273_v38 = vmul.f32 %v3876_v54, %v5470_v18  ;;  %vm3278_vm5 = vweird.f32 %v3876_v54  ;;  %vm3264_vm7 = vmor %vm3262_vm6, %vm3263_vm4 }
 0x38a   : > { %v3230_v11 = vmul.f32 %v3870_v15, %v3229_v12  ;;  %v3880_v21 = vpop.eup %3879  ;;  %v3259_v7 = vsub.f32 1.0, %v3258_v23  ;;  %vm3279_vm10 = vmor %vm3277_vm8, %vm3278_vm5 }
 0x38b   : > { %v3245_v52 = vmul.f32 %v3872_v32, %v3244_v47  ;;  %v3882_v34 = vpop.eup %3881  ;;  %v3274_v40 = vsub.f32 1.0, %v3273_v38 }
 0x38c   : > { %v3231_v59 = vadd.f32 %v3870_v15, %v3230_v11  ;;  %v3884_v10 = vpop.eup %3883  ;;  %v3260_v8 = vmul.f32 %v3874_v55, %v3259_v7 }
 0x38d   : > { %v3246_v22 = vadd.f32 %v3872_v32, %v3245_v52  ;;  %v3275_v63 = vmul.f32 %v3876_v54, %v3274_v40 }
 0x38e   : > { %v3235_v48 = vsel %vm3234_vm2, %v3870_v15, %v3231_v59  ;;  %v3261_v31 = vadd.f32 %v3874_v55, %v3260_v8 }
 0x38f   : > { %v3240_v46 = vsel %vm5476_vm13, %v3239_v6, %v3235_v48  ;;  %v3250_v26 = vsel %vm3249_vm3, %v3872_v32, %v3246_v22  ;;  %v3276_v36 = vadd.f32 %v3876_v54, %v3275_v63 }
 0x390   : > { %v3255_v3 = vsel %vm5481_vm1, %v3254_v24, %v3250_v26  ;;  %v3307_v56 = vmul.f32 %v3878_v28, %v3240_v46  ;;  %v3265_v9 = vsel %vm3264_vm7, %v3874_v55, %v3261_v31 }
 0x391   : > { %v3308_v4 = vmul.f32 %v3880_v21, %v3255_v3  ;;  %v3270_v19 = vsel %vm3267_vm9, %v3269_v5, %v3265_v9  ;;  %v3280_v58 = vsel %vm3279_vm10, %v3876_v54, %v3276_v36 }
 0x392   : > { %3315 = vst [vmem:[#allocation2 + $0x10] sm:$0xff] %v3307_v56  ;;  %v3309_v37 = vmul.f32 %v3882_v34, %v3270_v19  ;;  %v3285_v43 = vsel %vm3282_vm11, %v3284_v49, %v3280_v58 }
 0x393   : > { %3316 = vst [vmem:[#allocation2] sm:$0xff] %v3308_v4  ;;  %v3310_v42 = vmul.f32 %v3884_v10, %v3285_v43 }
 0x394   : > { %3319 = vst [vmem:[%s3951_s28] sm:$0xff] %v3307_v56 }
 0x395   : > { %3320 = vst [vmem:[%s3951_s28 + $0x8] sm:$0xff] %v3308_v4 }
 0x396   : > { %3317 = vst [vmem:[#allocation2 + $0x18] sm:$0xff] %v3309_v37 }
 0x397   : > { %3321 = vst [vmem:[%s3951_s28 + $0x10] sm:$0xff] %v3309_v37 }
 0x398   : > { %3318 = vst [vmem:[#allocation2 + $0x8] sm:$0xff] %v3310_v42 }
 0x399   : > { %3322 = vst [vmem:[%s3951_s28 + $0x18] sm:$0xff] %v3310_v42 }
 0x39a PF: > { %s15_s18 = sadd.s32 1, %s3895_s18  }
 0x39b   : > { %p12_p5 = scmp.ge.s32.totalorder %s15_s18, 6  }
 0x39d   :  { %14 = sbr.rel (!%p12_p5) target bundleno = 1 (0x1), region = 107 }

</bundles_post_ra>
